<compile_context>
chip_gen: v7x
topology: tpu7x:2x2x1
jax: 0.10.0
libtpu: 0.0.40
codegen_flags: <defaults>
</compile_context>

<pallas_src>
from functools import partial

import jax
import jax.numpy as jnp
from jax.experimental import pallas as pl
from jax.experimental.pallas import tpu as pltpu


def _mxu_contract_is_256():
    """True on chips whose MXU contracts 256 natively (v6e/v7x); False on v5*."""
    try:
        kind = jax.devices()[0].device_kind.lower()
    except Exception:
        return True
    return "v5" not in kind


# -----------------------------------------------------------------------------
# Fused kernel.
#   ins : x2d (T*B, C) bf16 time-major, wih_cat (C, 6H) bf16,
#         whh (2H, 6H) bf16 block-diag  [merged]  or (2H, 3H) bf16 stacked,
#         gxbias (1, 6H) f32, bhhn (1, 2H) f32,
#         w1 (6H, U) bf16, b1 (1, U) f32, w2 (U, NC) bf16, b2 (1, NC) f32
#   out : probas (B, NC) f32
#   scratch: gx (T*B, 6H) f32  -- hoisted input projection, both directions
# -----------------------------------------------------------------------------
def _fused_kernel(x_ref, wih_ref, whh_ref, gxbias_ref, bhhn_ref,
                  w1_ref, b1_ref, w2_ref, b2_ref,
                  out_ref, gx_ref, *, batch, seq_len, merge_whh):
    B, T = batch, seq_len
    H = w1_ref.shape[0] // 6
    G = 3 * H
    bf16 = jnp.bfloat16
    f32 = jnp.float32

    # ---- Hoisted input projection for both directions in ONE bf16 dot
    #      (off the serial chain).  b_ih and the r/z parts of b_hh are already
    #      folded into gxbias, so the recurrence never re-adds them.
    gx_ref[...] = (jnp.dot(x_ref[...], wih_ref[...],
                           preferred_element_type=f32) + gxbias_ref[...])

    bhhn_f = bhhn_ref[:, 0:H]          # n-gate bias stays per step (scaled by r)
    bhhn_b = bhhn_ref[:, H:2 * H]

    def cell(gx, gh_rz, gh_n, h):
        # PyTorch gate order r, z, n ;  h' = n + z*(h - n).
        if gh_rz is None:              # h == 0 step: h @ W_hh == 0
            r = jax.nn.sigmoid(gx[:, 0:H])
            z = jax.nn.sigmoid(gx[:, H:2 * H])
        else:
            r = jax.nn.sigmoid(gx[:, 0:H] + gh_rz[:, 0:H])
            z = jax.nn.sigmoid(gx[:, H:2 * H] + gh_rz[:, H:2 * H])
        n = jnp.tanh(gx[:, 2 * H:G] + r * gh_n)
        return n + z * (h - n)

    hf = jnp.zeros((B, H), f32)
    hb = jnp.zeros((B, H), f32)
    maxf = maxb = sumf = sumb = None

    # ---- Fully unrolled recurrence (T static & small); fwd/bwd interleaved so
    #      the two cell() chains hide each other's latency.
    for t in range(T):
        gxf = gx_ref[t * B:(t + 1) * B, 0:G]
        tb = T - 1 - t                                       # reversed time
        gxb = gx_ref[tb * B:(tb + 1) * B, G:2 * G]

        if t == 0:
            ghf_rz = ghb_rz = None
            ghf_n, ghb_n = bhhn_f, bhhn_b
        else:
            if merge_whh:
                # One K=2H dot per step on the 256-wide MXU (v6e/v7x);
                # whh_ref is block_diag(whh_f, whh_b).
                hcat = jnp.concatenate([hf, hb], axis=1).astype(bf16)
                gh = jnp.dot(hcat, whh_ref[...], preferred_element_type=f32)
                ghf, ghb = gh[:, 0:G], gh[:, G:2 * G]
            else:
                # Two native K=H dots (v5e); whh_ref is [whh_f; whh_b] stacked.
                ghf = jnp.dot(hf.astype(bf16), whh_ref[0:H, :],
                              preferred_element_type=f32)
                ghb = jnp.dot(hb.astype(bf16), whh_ref[H:2 * H, :],
                              preferred_element_type=f32)
            ghf_rz, ghf_n = ghf[:, 0:2 * H], ghf[:, 2 * H:G] + bhhn_f
            ghb_rz, ghb_n = ghb[:, 0:2 * H], ghb[:, 2 * H:G] + bhhn_b

        hf = cell(gxf, ghf_rz, ghf_n, hf)
        hb = cell(gxb, ghb_rz, ghb_n, hb)

        # On-the-fly time pooling (order-invariant, reversed order is fine).
        if t == 0:
            maxf, maxb, sumf, sumb = hf, hb, hf, hb
        else:
            maxf = jnp.maximum(maxf, hf)
            maxb = jnp.maximum(maxb, hb)
            sumf = sumf + hf
            sumb = sumb + hb

    # ---- torch h_n.view(B, -1) batch-row mixing via two tiny selection
    #      matmuls (no per-row masked stores, no scratch round-trip).
    hn_cat = jnp.concatenate([hf, hb], axis=0).astype(bf16)            # (2B, H)
    row = jax.lax.broadcasted_iota(jnp.int32, (B, 2 * B), 0)
    col = jax.lax.broadcasted_iota(jnp.int32, (B, 2 * B), 1)
    sel_e = (col == 2 * row).astype(bf16)                              # rows 0,2,...
    sel_o = (col == 2 * row + 1).astype(bf16)                          # rows 1,3,...
    hn_e = jnp.dot(sel_e, hn_cat, preferred_element_type=f32)          # (B, H)
    hn_o = jnp.dot(sel_o, hn_cat, preferred_element_type=f32)          # (B, H)

    # ---- Head: cat([max_pool, avg_pool, h_n]) -> Linear/ReLU/Linear/softmax.
    inv_t = 1.0 / T
    feat = jnp.concatenate(
        [maxf, maxb, sumf * inv_t, sumb * inv_t, hn_e, hn_o], axis=1)  # (B, 6H)
    hidden = jnp.dot(feat.astype(bf16), w1_ref[...],
                     preferred_element_type=f32) + b1_ref[...]
    hidden = jnp.maximum(hidden, 0.0)
    logits = jnp.dot(hidden.astype(bf16), w2_ref[...],
                     preferred_element_type=f32) + b2_ref[...]

    m = jnp.max(logits, axis=1, keepdims=True)
    e = jnp.exp(logits - m)
    out_ref[...] = e * pl.reciprocal(jnp.sum(e, axis=1, keepdims=True),
                                     approx=True)


# -----------------------------------------------------------------------------
# Forward-pass wrapper: weight prep (concat / block-diag / bias fold / bf16
# casts) + one fused pallas_call.
# -----------------------------------------------------------------------------
def best_classifier_forward(x, p):
    # x: (B, T, C) batch-first, matching torch batch_first=True.
    B, T, C = x.shape
    H = p["w_hh_f"].shape[0]
    G = 3 * H
    NC = p["w2"].shape[1]
    bf16 = jnp.bfloat16
    f32 = jnp.float32

    # Dropout2d(0.5) on embeddings and F.dropout(p=0.5) on features: eval-mode
    # identity (see TODO at top of file).

    # Time-major flatten; bf16 operand for the hoisted input projection.
    x2d = jnp.transpose(x, (1, 0, 2)).reshape(T * B, C).astype(bf16)

    # Fused input-projection weights for both directions (C, 6H).
    wih_cat = jnp.concatenate([p["w_ih_f"], p["w_ih_b"]], axis=1).astype(bf16)

    # Hoisted per-timestep bias: b_ih plus the r/z components of b_hh.
    zeros_h = jnp.zeros((1, H), f32)
    gxbias = jnp.concatenate(
        [p["b_ih_f"] + jnp.concatenate([p["b_hh_f"][:, :2 * H], zeros_h], axis=1),
         p["b_ih_b"] + jnp.concatenate([p["b_hh_b"][:, :2 * H], zeros_h], axis=1)],
        axis=1)                                                        # (1, 6H)
    # n-gate recurrent bias (must stay inside r * (.) in the loop).
    bhhn = jnp.concatenate([p["b_hh_f"][:, 2 * H:], p["b_hh_b"][:, 2 * H:]],
                           axis=1)                                     # (1, 2H)

    merge_whh = _mxu_contract_is_256()
    if merge_whh:
        zhh = jnp.zeros((H, G), f32)
        whh = jnp.concatenate(
            [jnp.concatenate([p["w_hh_f"], zhh], axis=1),
             jnp.concatenate([zhh, p["w_hh_b"]], axis=1)],
            axis=0).astype(bf16)                                       # (2H, 6H)
    else:
        whh = jnp.concatenate([p["w_hh_f"], p["w_hh_b"]], axis=0).astype(bf16)

    probas = pl.pallas_call(
        partial(_fused_kernel, batch=B, seq_len=T, merge_whh=merge_whh),
        out_shape=jax.ShapeDtypeStruct((B, NC), jnp.float32),
        scratch_shapes=[
            pltpu.VMEM((T * B, 2 * G), jnp.float32),   # hoisted gx, both dirs
        ],
    )(x2d, wih_cat, whh, gxbias, bhhn,
      p["w1"].astype(bf16), p["b1"], p["w2"].astype(bf16), p["b2"])
    return probas


# -----------------------------------------------------------------------------
# Pure-JAX (f32) reference for correctness checking.
# -----------------------------------------------------------------------------
def _ref_forward(x, p):
    B, T, _ = x.shape
    H = p["w_hh_f"].shape[0]

    def run_dir(xd, wih_t, whh_t, bih, bhh):
        def step(h, x_t):
            gx = x_t @ wih_t + bih
            gh = h @ whh_t + bhh
            r = jax.nn.sigmoid(gx[:, :H] + gh[:, :H])
            z = jax.nn.sigmoid(gx[:, H:2 * H] + gh[:, H:2 * H])
            n = jnp.tanh(gx[:, 2 * H:] + r * gh[:, 2 * H:])
            h_new = (1.0 - z) * n + z * h
            return h_new, h_new
        h0 = jnp.zeros((B, H), jnp.float32)
        hT, st = jax.lax.scan(step, h0, jnp.transpose(xd, (1, 0, 2)))
        return jnp.transpose(st, (1, 0, 2)), hT

    st_f, hn_f = run_dir(x, p["w_ih_f"], p["w_hh_f"], p["b_ih_f"], p["b_hh_f"])
    st_b, hn_b = run_dir(x[:, ::-1], p["w_ih_b"], p["w_hh_b"], p["b_ih_b"], p["b_hh_b"])
    st_b = st_b[:, ::-1]
    states = jnp.concatenate([st_f, st_b], axis=-1)
    h_n = jnp.stack([hn_f, hn_b], axis=0).reshape(B, 2 * H)
    feat = jnp.concatenate([states.max(axis=1), states.sum(axis=1) / T, h_n], axis=-1)
    hidden = jnp.maximum(feat @ p["w1"] + p["b1"], 0.0)
    logits = hidden @ p["w2"] + p["b2"]
    return jax.nn.softmax(logits, axis=1)


if __name__ == "__main__":
    B, T, C = 8, 8, 32            # batch, seq, input_size
    H, U, NC = 128, 64, 4         # rnn_units, classifier_units, num_classes

    key = jax.random.PRNGKey(0)
    ks = jax.random.split(key, 14)
    sg = float(1.0 / jnp.sqrt(H))
    f32 = jnp.float32

    params = {
        # GRU weights stored transposed for x @ W.T convenience; biases 2D.
        "w_ih_f": jax.random.normal(ks[0], (C, 3 * H), f32) * sg,
        "w_hh_f": jax.random.normal(ks[1], (H, 3 * H), f32) * sg,
        "b_ih_f": jax.random.normal(ks[2], (1, 3 * H), f32) * sg,
        "b_hh_f": jax.random.normal(ks[3], (1, 3 * H), f32) * sg,
        "w_ih_b": jax.random.normal(ks[4], (C, 3 * H), f32) * sg,
        "w_hh_b": jax.random.normal(ks[5], (H, 3 * H), f32) * sg,
        "b_ih_b": jax.random.normal(ks[6], (1, 3 * H), f32) * sg,
        "b_hh_b": jax.random.normal(ks[7], (1, 3 * H), f32) * sg,
        # MLP head (self.mlp in the torch module), stored as W.T.
        "w1": jax.random.normal(ks[8], (6 * H, U), f32) * float(1.0 / jnp.sqrt(6 * H)),
        "b1": jax.random.normal(ks[9], (1, U), f32) * 0.01,
        "w2": jax.random.normal(ks[10], (U, NC), f32) * float(1.0 / jnp.sqrt(U)),
        "b2": jax.random.normal(ks[11], (1, NC), f32) * 0.01,
    }

    x = jax.random.normal(ks[12], (B, T, C), f32)

    fwd = jax.jit(best_classifier_forward)
    ref_fn = jax.jit(_ref_forward)

    probas = jax.block_until_ready(fwd(x, params))
    ref = jax.block_until_ready(ref_fn(x, params))

    assert probas.shape == (B, NC)
    assert bool(jnp.all(jnp.isfinite(probas)))
    # approx=True reciprocal in the softmax => allow a slightly looser sum check.
    assert bool(jnp.allclose(jnp.sum(probas, axis=1), 1.0, atol=5e-3))
    assert bool(jnp.allclose(probas, ref, atol=2e-2, rtol=2e-2))
    print("KERNEL_OK")
</pallas_src>

<mosaic_0001>
module attributes {stable_mosaic.version = 11 : i64} {
  func.func @_fused_kernel(%arg0: memref<64x32xbf16, #tpu.memory_space<vmem>>, %arg1: memref<32x768xbf16, #tpu.memory_space<vmem>>, %arg2: memref<256x768xbf16, #tpu.memory_space<vmem>>, %arg3: memref<1x768xf32, #tpu.memory_space<vmem>>, %arg4: memref<1x256xf32, #tpu.memory_space<vmem>>, %arg5: memref<768x64xbf16, #tpu.memory_space<vmem>>, %arg6: memref<1x64xf32, #tpu.memory_space<vmem>>, %arg7: memref<64x4xbf16, #tpu.memory_space<vmem>>, %arg8: memref<1x4xf32, #tpu.memory_space<vmem>>, %arg9: memref<8x4xf32, #tpu.memory_space<vmem>>, %arg10: memref<64x768xf32, #tpu.memory_space<vmem>>) attributes {dimension_semantics = [], scalar_prefetch = 0 : i64, scratch_operands = 1 : i64, tpu.core_type = #tpu.core_type<tc>} {
    %c0 = arith.constant 0 : index
    %c0_0 = arith.constant 0 : index
    %0 = vector.load %arg0[%c0, %c0_0] : memref<64x32xbf16, #tpu.memory_space<vmem>>, vector<64x32xbf16>
    %c0_1 = arith.constant 0 : index
    %c0_2 = arith.constant 0 : index
    %1 = vector.load %arg1[%c0_1, %c0_2] : memref<32x768xbf16, #tpu.memory_space<vmem>>, vector<32x768xbf16>
    %cst = arith.constant dense<0.000000e+00> : vector<64x768xf32>
    %2 = tpu.matmul %0, %1, %cst {dimension_numbers = #tpu.dot_dimension_numbers<[1], [0], [0], [1], [0, 0, 1, 1], [], []>} : vector<64x32xbf16>, vector<32x768xbf16>, vector<64x768xf32> -> vector<64x768xf32>
    %c0_3 = arith.constant 0 : index
    %c0_4 = arith.constant 0 : index
    %3 = vector.load %arg3[%c0_3, %c0_4] : memref<1x768xf32, #tpu.memory_space<vmem>>, vector<1x768xf32>
    %4 = vector.broadcast %3 : vector<1x768xf32> to vector<64x768xf32>
    %5 = arith.addf %2, %4 : vector<64x768xf32>
    %c0_5 = arith.constant 0 : index
    %c0_6 = arith.constant 0 : index
    %6 = vector.load %arg10[%c0_5, %c0_6] : memref<64x768xf32, #tpu.memory_space<vmem>>, vector<64x768xf32>
    tpu.vector_store %arg10[%c0_5, %c0_6], %5 {strides = array<i32>} : memref<64x768xf32, #tpu.memory_space<vmem>>, vector<64x768xf32>,
    %c0_7 = arith.constant 0 : index
    %c0_8 = arith.constant 0 : index
    %7 = vector.load %arg4[%c0_7, %c0_8] : memref<1x256xf32, #tpu.memory_space<vmem>>, vector<1x128xf32>
    %c0_9 = arith.constant 0 : index
    %c128 = arith.constant 128 : index
    %8 = vector.load %arg4[%c0_9, %c128] : memref<1x256xf32, #tpu.memory_space<vmem>>, vector<1x128xf32>
    %cst_10 = arith.constant 0.000000e+00 : f32
    %9 = vector.broadcast %cst_10 : f32 to vector<8x128xf32>
    %cst_11 = arith.constant 0.000000e+00 : f32
    %10 = vector.broadcast %cst_11 : f32 to vector<8x128xf32>
    %c0_12 = arith.constant 0 : index
    %c0_13 = arith.constant 0 : index
    %11 = vector.load %arg10[%c0_12, %c0_13] : memref<64x768xf32, #tpu.memory_space<vmem>>, vector<8x384xf32>
    %c56 = arith.constant 56 : index
    %c384 = arith.constant 384 : index
    %12 = vector.load %arg10[%c56, %c384] : memref<64x768xf32, #tpu.memory_space<vmem>>, vector<8x384xf32>
    %13 = vector.extract_strided_slice %11 {offsets = [0, 0], sizes = [8, 128], strides = [1, 1]} : vector<8x384xf32> to vector<8x128xf32>
    %14 = arith.negf %13 : vector<8x128xf32>
    %15 = math.exp %14 : vector<8x128xf32>
    %cst_14 = arith.constant 1.000000e+00 : f32
    %16 = vector.broadcast %cst_14 : f32 to vector<8x128xf32>
    %17 = arith.addf %16, %15 : vector<8x128xf32>
    %18 = arith.divf %16, %17 : vector<8x128xf32>
    %19 = vector.extract_strided_slice %11 {offsets = [0, 128], sizes = [8, 128], strides = [1, 1]} : vector<8x384xf32> to vector<8x128xf32>
    %20 = arith.negf %19 : vector<8x128xf32>
    %21 = math.exp %20 : vector<8x128xf32>
    %cst_15 = arith.constant 1.000000e+00 : f32
    %22 = vector.broadcast %cst_15 : f32 to vector<8x128xf32>
    %23 = arith.addf %22, %21 : vector<8x128xf32>
    %24 = arith.divf %22, %23 : vector<8x128xf32>
    %25 = vector.extract_strided_slice %11 {offsets = [0, 256], sizes = [8, 128], strides = [1, 1]} : vector<8x384xf32> to vector<8x128xf32>
    %26 = vector.broadcast %7 : vector<1x128xf32> to vector<8x128xf32>
    %27 = arith.mulf %18, %26 : vector<8x128xf32>
    %28 = arith.addf %25, %27 : vector<8x128xf32>
    %29 = math.tanh %28 : vector<8x128xf32>
    %30 = arith.subf %9, %29 : vector<8x128xf32>
    %31 = arith.mulf %24, %30 : vector<8x128xf32>
    %32 = arith.addf %29, %31 : vector<8x128xf32>
    %33 = vector.extract_strided_slice %12 {offsets = [0, 0], sizes = [8, 128], strides = [1, 1]} : vector<8x384xf32> to vector<8x128xf32>
    %34 = arith.negf %33 : vector<8x128xf32>
    %35 = math.exp %34 : vector<8x128xf32>
    %cst_16 = arith.constant 1.000000e+00 : f32
    %36 = vector.broadcast %cst_16 : f32 to vector<8x128xf32>
    %37 = arith.addf %36, %35 : vector<8x128xf32>
    %38 = arith.divf %36, %37 : vector<8x128xf32>
    %39 = vector.extract_strided_slice %12 {offsets = [0, 128], sizes = [8, 128], strides = [1, 1]} : vector<8x384xf32> to vector<8x128xf32>
    %40 = arith.negf %39 : vector<8x128xf32>
    %41 = math.exp %40 : vector<8x128xf32>
    %cst_17 = arith.constant 1.000000e+00 : f32
    %42 = vector.broadcast %cst_17 : f32 to vector<8x128xf32>
    %43 = arith.addf %42, %41 : vector<8x128xf32>
    %44 = arith.divf %42, %43 : vector<8x128xf32>
    %45 = vector.extract_strided_slice %12 {offsets = [0, 256], sizes = [8, 128], strides = [1, 1]} : vector<8x384xf32> to vector<8x128xf32>
    %46 = vector.broadcast %8 : vector<1x128xf32> to vector<8x128xf32>
    %47 = arith.mulf %38, %46 : vector<8x128xf32>
    %48 = arith.addf %45, %47 : vector<8x128xf32>
    %49 = math.tanh %48 : vector<8x128xf32>
    %50 = arith.subf %10, %49 : vector<8x128xf32>
    %51 = arith.mulf %44, %50 : vector<8x128xf32>
    %52 = arith.addf %49, %51 : vector<8x128xf32>
    %c8 = arith.constant 8 : index
    %c0_18 = arith.constant 0 : index
    %53 = vector.load %arg10[%c8, %c0_18] : memref<64x768xf32, #tpu.memory_space<vmem>>, vector<8x384xf32>
    %c48 = arith.constant 48 : index
    %c384_19 = arith.constant 384 : index
    %54 = vector.load %arg10[%c48, %c384_19] : memref<64x768xf32, #tpu.memory_space<vmem>>, vector<8x384xf32>
    %55 = tpu.concatenate %32, %52 in 1 : vector<8x128xf32>, vector<8x128xf32> -> vector<8x256xf32>
    %56 = arith.truncf %55 : vector<8x256xf32> to vector<8x256xbf16>
    %c0_20 = arith.constant 0 : index
    %c0_21 = arith.constant 0 : index
    %57 = vector.load %arg2[%c0_20, %c0_21] : memref<256x768xbf16, #tpu.memory_space<vmem>>, vector<256x768xbf16>
    %cst_22 = arith.constant dense<0.000000e+00> : vector<8x768xf32>
    %58 = tpu.matmul %56, %57, %cst_22 {dimension_numbers = #tpu.dot_dimension_numbers<[1], [0], [0], [1], [0, 0, 1, 1], [], []>} : vector<8x256xbf16>, vector<256x768xbf16>, vector<8x768xf32> -> vector<8x768xf32>
    %59 = vector.extract_strided_slice %58 {offsets = [0, 0], sizes = [8, 384], strides = [1, 1]} : vector<8x768xf32> to vector<8x384xf32>
    %60 = vector.extract_strided_slice %58 {offsets = [0, 384], sizes = [8, 384], strides = [1, 1]} : vector<8x768xf32> to vector<8x384xf32>
    %61 = vector.extract_strided_slice %59 {offsets = [0, 0], sizes = [8, 256], strides = [1, 1]} : vector<8x384xf32> to vector<8x256xf32>
    %62 = vector.extract_strided_slice %59 {offsets = [0, 256], sizes = [8, 128], strides = [1, 1]} : vector<8x384xf32> to vector<8x128xf32>
    %63 = vector.broadcast %7 : vector<1x128xf32> to vector<8x128xf32>
    %64 = arith.addf %62, %63 : vector<8x128xf32>
    %65 = vector.extract_strided_slice %60 {offsets = [0, 0], sizes = [8, 256], strides = [1, 1]} : vector<8x384xf32> to vector<8x256xf32>
    %66 = vector.extract_strided_slice %60 {offsets = [0, 256], sizes = [8, 128], strides = [1, 1]} : vector<8x384xf32> to vector<8x128xf32>
    %67 = vector.broadcast %8 : vector<1x128xf32> to vector<8x128xf32>
    %68 = arith.addf %66, %67 : vector<8x128xf32>
    %69 = vector.extract_strided_slice %53 {offsets = [0, 0], sizes = [8, 128], strides = [1, 1]} : vector<8x384xf32> to vector<8x128xf32>
    %70 = vector.extract_strided_slice %61 {offsets = [0, 0], sizes = [8, 128], strides = [1, 1]} : vector<8x256xf32> to vector<8x128xf32>
    %71 = arith.addf %69, %70 : vector<8x128xf32>
    %72 = arith.negf %71 : vector<8x128xf32>
    %73 = math.exp %72 : vector<8x128xf32>
    %cst_23 = arith.constant 1.000000e+00 : f32
    %74 = vector.broadcast %cst_23 : f32 to vector<8x128xf32>
    %75 = arith.addf %74, %73 : vector<8x128xf32>
    %76 = arith.divf %74, %75 : vector<8x128xf32>
    %77 = vector.extract_strided_slice %53 {offsets = [0, 128], sizes = [8, 128], strides = [1, 1]} : vector<8x384xf32> to vector<8x128xf32>
    %78 = vector.extract_strided_slice %61 {offsets = [0, 128], sizes = [8, 128], strides = [1, 1]} : vector<8x256xf32> to vector<8x128xf32>
    %79 = arith.addf %77, %78 : vector<8x128xf32>
    %80 = arith.negf %79 : vector<8x128xf32>
    %81 = math.exp %80 : vector<8x128xf32>
    %cst_24 = arith.constant 1.000000e+00 : f32
    %82 = vector.broadcast %cst_24 : f32 to vector<8x128xf32>
    %83 = arith.addf %82, %81 : vector<8x128xf32>
    %84 = arith.divf %82, %83 : vector<8x128xf32>
    %85 = vector.extract_strided_slice %53 {offsets = [0, 256], sizes = [8, 128], strides = [1, 1]} : vector<8x384xf32> to vector<8x128xf32>
    %86 = arith.mulf %76, %64 : vector<8x128xf32>
    %87 = arith.addf %85, %86 : vector<8x128xf32>
    %88 = math.tanh %87 : vector<8x128xf32>
    %89 = arith.subf %32, %88 : vector<8x128xf32>
    %90 = arith.mulf %84, %89 : vector<8x128xf32>
    %91 = arith.addf %88, %90 : vector<8x128xf32>
    %92 = vector.extract_strided_slice %54 {offsets = [0, 0], sizes = [8, 128], strides = [1, 1]} : vector<8x384xf32> to vector<8x128xf32>
    %93 = vector.extract_strided_slice %65 {offsets = [0, 0], sizes = [8, 128], strides = [1, 1]} : vector<8x256xf32> to vector<8x128xf32>
    %94 = arith.addf %92, %93 : vector<8x128xf32>
    %95 = arith.negf %94 : vector<8x128xf32>
    %96 = math.exp %95 : vector<8x128xf32>
    %cst_25 = arith.constant 1.000000e+00 : f32
    %97 = vector.broadcast %cst_25 : f32 to vector<8x128xf32>
    %98 = arith.addf %97, %96 : vector<8x128xf32>
    %99 = arith.divf %97, %98 : vector<8x128xf32>
    %100 = vector.extract_strided_slice %54 {offsets = [0, 128], sizes = [8, 128], strides = [1, 1]} : vector<8x384xf32> to vector<8x128xf32>
    %101 = vector.extract_strided_slice %65 {offsets = [0, 128], sizes = [8, 128], strides = [1, 1]} : vector<8x256xf32> to vector<8x128xf32>
    %102 = arith.addf %100, %101 : vector<8x128xf32>
    %103 = arith.negf %102 : vector<8x128xf32>
    %104 = math.exp %103 : vector<8x128xf32>
    %cst_26 = arith.constant 1.000000e+00 : f32
    %105 = vector.broadcast %cst_26 : f32 to vector<8x128xf32>
    %106 = arith.addf %105, %104 : vector<8x128xf32>
    %107 = arith.divf %105, %106 : vector<8x128xf32>
    %108 = vector.extract_strided_slice %54 {offsets = [0, 256], sizes = [8, 128], strides = [1, 1]} : vector<8x384xf32> to vector<8x128xf32>
    %109 = arith.mulf %99, %68 : vector<8x128xf32>
    %110 = arith.addf %108, %109 : vector<8x128xf32>
    %111 = math.tanh %110 : vector<8x128xf32>
    %112 = arith.subf %52, %111 : vector<8x128xf32>
    %113 = arith.mulf %107, %112 : vector<8x128xf32>
    %114 = arith.addf %111, %113 : vector<8x128xf32>
    %115 = arith.maximumf %32, %91 : vector<8x128xf32>
    %116 = arith.maximumf %52, %114 : vector<8x128xf32>
    %117 = arith.addf %32, %91 : vector<8x128xf32>
    %118 = arith.addf %52, %114 : vector<8x128xf32>
    %c16 = arith.constant 16 : index
    %c0_27 = arith.constant 0 : index
    %119 = vector.load %arg10[%c16, %c0_27] : memref<64x768xf32, #tpu.memory_space<vmem>>, vector<8x384xf32>
    %c40 = arith.constant 40 : index
    %c384_28 = arith.constant 384 : index
    %120 = vector.load %arg10[%c40, %c384_28] : memref<64x768xf32, #tpu.memory_space<vmem>>, vector<8x384xf32>
    %121 = tpu.concatenate %91, %114 in 1 : vector<8x128xf32>, vector<8x128xf32> -> vector<8x256xf32>
    %122 = arith.truncf %121 : vector<8x256xf32> to vector<8x256xbf16>
    %c0_29 = arith.constant 0 : index
    %c0_30 = arith.constant 0 : index
    %123 = vector.load %arg2[%c0_29, %c0_30] : memref<256x768xbf16, #tpu.memory_space<vmem>>, vector<256x768xbf16>
    %cst_31 = arith.constant dense<0.000000e+00> : vector<8x768xf32>
    %124 = tpu.matmul %122, %123, %cst_31 {dimension_numbers = #tpu.dot_dimension_numbers<[1], [0], [0], [1], [0, 0, 1, 1], [], []>} : vector<8x256xbf16>, vector<256x768xbf16>, vector<8x768xf32> -> vector<8x768xf32>
    %125 = vector.extract_strided_slice %124 {offsets = [0, 0], sizes = [8, 384], strides = [1, 1]} : vector<8x768xf32> to vector<8x384xf32>
    %126 = vector.extract_strided_slice %124 {offsets = [0, 384], sizes = [8, 384], strides = [1, 1]} : vector<8x768xf32> to vector<8x384xf32>
    %127 = vector.extract_strided_slice %125 {offsets = [0, 0], sizes = [8, 256], strides = [1, 1]} : vector<8x384xf32> to vector<8x256xf32>
    %128 = vector.extract_strided_slice %125 {offsets = [0, 256], sizes = [8, 128], strides = [1, 1]} : vector<8x384xf32> to vector<8x128xf32>
    %129 = vector.broadcast %7 : vector<1x128xf32> to vector<8x128xf32>
    %130 = arith.addf %128, %129 : vector<8x128xf32>
    %131 = vector.extract_strided_slice %126 {offsets = [0, 0], sizes = [8, 256], strides = [1, 1]} : vector<8x384xf32> to vector<8x256xf32>
    %132 = vector.extract_strided_slice %126 {offsets = [0, 256], sizes = [8, 128], strides = [1, 1]} : vector<8x384xf32> to vector<8x128xf32>
    %133 = vector.broadcast %8 : vector<1x128xf32> to vector<8x128xf32>
    %134 = arith.addf %132, %133 : vector<8x128xf32>
    %135 = vector.extract_strided_slice %119 {offsets = [0, 0], sizes = [8, 128], strides = [1, 1]} : vector<8x384xf32> to vector<8x128xf32>
    %136 = vector.extract_strided_slice %127 {offsets = [0, 0], sizes = [8, 128], strides = [1, 1]} : vector<8x256xf32> to vector<8x128xf32>
    %137 = arith.addf %135, %136 : vector<8x128xf32>
    %138 = arith.negf %137 : vector<8x128xf32>
    %139 = math.exp %138 : vector<8x128xf32>
    %cst_32 = arith.constant 1.000000e+00 : f32
    %140 = vector.broadcast %cst_32 : f32 to vector<8x128xf32>
    %141 = arith.addf %140, %139 : vector<8x128xf32>
    %142 = arith.divf %140, %141 : vector<8x128xf32>
    %143 = vector.extract_strided_slice %119 {offsets = [0, 128], sizes = [8, 128], strides = [1, 1]} : vector<8x384xf32> to vector<8x128xf32>
    %144 = vector.extract_strided_slice %127 {offsets = [0, 128], sizes = [8, 128], strides = [1, 1]} : vector<8x256xf32> to vector<8x128xf32>
    %145 = arith.addf %143, %144 : vector<8x128xf32>
    %146 = arith.negf %145 : vector<8x128xf32>
    %147 = math.exp %146 : vector<8x128xf32>
    %cst_33 = arith.constant 1.000000e+00 : f32
    %148 = vector.broadcast %cst_33 : f32 to vector<8x128xf32>
    %149 = arith.addf %148, %147 : vector<8x128xf32>
    %150 = arith.divf %148, %149 : vector<8x128xf32>
    %151 = vector.extract_strided_slice %119 {offsets = [0, 256], sizes = [8, 128], strides = [1, 1]} : vector<8x384xf32> to vector<8x128xf32>
    %152 = arith.mulf %142, %130 : vector<8x128xf32>
    %153 = arith.addf %151, %152 : vector<8x128xf32>
    %154 = math.tanh %153 : vector<8x128xf32>
    %155 = arith.subf %91, %154 : vector<8x128xf32>
    %156 = arith.mulf %150, %155 : vector<8x128xf32>
    %157 = arith.addf %154, %156 : vector<8x128xf32>
    %158 = vector.extract_strided_slice %120 {offsets = [0, 0], sizes = [8, 128], strides = [1, 1]} : vector<8x384xf32> to vector<8x128xf32>
    %159 = vector.extract_strided_slice %131 {offsets = [0, 0], sizes = [8, 128], strides = [1, 1]} : vector<8x256xf32> to vector<8x128xf32>
    %160 = arith.addf %158, %159 : vector<8x128xf32>
    %161 = arith.negf %160 : vector<8x128xf32>
    %162 = math.exp %161 : vector<8x128xf32>
    %cst_34 = arith.constant 1.000000e+00 : f32
    %163 = vector.broadcast %cst_34 : f32 to vector<8x128xf32>
    %164 = arith.addf %163, %162 : vector<8x128xf32>
    %165 = arith.divf %163, %164 : vector<8x128xf32>
    %166 = vector.extract_strided_slice %120 {offsets = [0, 128], sizes = [8, 128], strides = [1, 1]} : vector<8x384xf32> to vector<8x128xf32>
    %167 = vector.extract_strided_slice %131 {offsets = [0, 128], sizes = [8, 128], strides = [1, 1]} : vector<8x256xf32> to vector<8x128xf32>
    %168 = arith.addf %166, %167 : vector<8x128xf32>
    %169 = arith.negf %168 : vector<8x128xf32>
    %170 = math.exp %169 : vector<8x128xf32>
    %cst_35 = arith.constant 1.000000e+00 : f32
    %171 = vector.broadcast %cst_35 : f32 to vector<8x128xf32>
    %172 = arith.addf %171, %170 : vector<8x128xf32>
    %173 = arith.divf %171, %172 : vector<8x128xf32>
    %174 = vector.extract_strided_slice %120 {offsets = [0, 256], sizes = [8, 128], strides = [1, 1]} : vector<8x384xf32> to vector<8x128xf32>
    %175 = arith.mulf %165, %134 : vector<8x128xf32>
    %176 = arith.addf %174, %175 : vector<8x128xf32>
    %177 = math.tanh %176 : vector<8x128xf32>
    %178 = arith.subf %114, %177 : vector<8x128xf32>
    %179 = arith.mulf %173, %178 : vector<8x128xf32>
    %180 = arith.addf %177, %179 : vector<8x128xf32>
    %181 = arith.maximumf %115, %157 : vector<8x128xf32>
    %182 = arith.maximumf %116, %180 : vector<8x128xf32>
    %183 = arith.addf %117, %157 : vector<8x128xf32>
    %184 = arith.addf %118, %180 : vector<8x128xf32>
    %c24 = arith.constant 24 : index
    %c0_36 = arith.constant 0 : index
    %185 = vector.load %arg10[%c24, %c0_36] : memref<64x768xf32, #tpu.memory_space<vmem>>, vector<8x384xf32>
    %c32 = arith.constant 32 : index
    %c384_37 = arith.constant 384 : index
    %186 = vector.load %arg10[%c32, %c384_37] : memref<64x768xf32, #tpu.memory_space<vmem>>, vector<8x384xf32>
    %187 = tpu.concatenate %157, %180 in 1 : vector<8x128xf32>, vector<8x128xf32> -> vector<8x256xf32>
    %188 = arith.truncf %187 : vector<8x256xf32> to vector<8x256xbf16>
    %c0_38 = arith.constant 0 : index
    %c0_39 = arith.constant 0 : index
    %189 = vector.load %arg2[%c0_38, %c0_39] : memref<256x768xbf16, #tpu.memory_space<vmem>>, vector<256x768xbf16>
    %cst_40 = arith.constant dense<0.000000e+00> : vector<8x768xf32>
    %190 = tpu.matmul %188, %189, %cst_40 {dimension_numbers = #tpu.dot_dimension_numbers<[1], [0], [0], [1], [0, 0, 1, 1], [], []>} : vector<8x256xbf16>, vector<256x768xbf16>, vector<8x768xf32> -> vector<8x768xf32>
    %191 = vector.extract_strided_slice %190 {offsets = [0, 0], sizes = [8, 384], strides = [1, 1]} : vector<8x768xf32> to vector<8x384xf32>
    %192 = vector.extract_strided_slice %190 {offsets = [0, 384], sizes = [8, 384], strides = [1, 1]} : vector<8x768xf32> to vector<8x384xf32>
    %193 = vector.extract_strided_slice %191 {offsets = [0, 0], sizes = [8, 256], strides = [1, 1]} : vector<8x384xf32> to vector<8x256xf32>
    %194 = vector.extract_strided_slice %191 {offsets = [0, 256], sizes = [8, 128], strides = [1, 1]} : vector<8x384xf32> to vector<8x128xf32>
    %195 = vector.broadcast %7 : vector<1x128xf32> to vector<8x128xf32>
    %196 = arith.addf %194, %195 : vector<8x128xf32>
    %197 = vector.extract_strided_slice %192 {offsets = [0, 0], sizes = [8, 256], strides = [1, 1]} : vector<8x384xf32> to vector<8x256xf32>
    %198 = vector.extract_strided_slice %192 {offsets = [0, 256], sizes = [8, 128], strides = [1, 1]} : vector<8x384xf32> to vector<8x128xf32>
    %199 = vector.broadcast %8 : vector<1x128xf32> to vector<8x128xf32>
    %200 = arith.addf %198, %199 : vector<8x128xf32>
    %201 = vector.extract_strided_slice %185 {offsets = [0, 0], sizes = [8, 128], strides = [1, 1]} : vector<8x384xf32> to vector<8x128xf32>
    %202 = vector.extract_strided_slice %193 {offsets = [0, 0], sizes = [8, 128], strides = [1, 1]} : vector<8x256xf32> to vector<8x128xf32>
    %203 = arith.addf %201, %202 : vector<8x128xf32>
    %204 = arith.negf %203 : vector<8x128xf32>
    %205 = math.exp %204 : vector<8x128xf32>
    %cst_41 = arith.constant 1.000000e+00 : f32
    %206 = vector.broadcast %cst_41 : f32 to vector<8x128xf32>
    %207 = arith.addf %206, %205 : vector<8x128xf32>
    %208 = arith.divf %206, %207 : vector<8x128xf32>
    %209 = vector.extract_strided_slice %185 {offsets = [0, 128], sizes = [8, 128], strides = [1, 1]} : vector<8x384xf32> to vector<8x128xf32>
    %210 = vector.extract_strided_slice %193 {offsets = [0, 128], sizes = [8, 128], strides = [1, 1]} : vector<8x256xf32> to vector<8x128xf32>
    %211 = arith.addf %209, %210 : vector<8x128xf32>
    %212 = arith.negf %211 : vector<8x128xf32>
    %213 = math.exp %212 : vector<8x128xf32>
    %cst_42 = arith.constant 1.000000e+00 : f32
    %214 = vector.broadcast %cst_42 : f32 to vector<8x128xf32>
    %215 = arith.addf %214, %213 : vector<8x128xf32>
    %216 = arith.divf %214, %215 : vector<8x128xf32>
    %217 = vector.extract_strided_slice %185 {offsets = [0, 256], sizes = [8, 128], strides = [1, 1]} : vector<8x384xf32> to vector<8x128xf32>
    %218 = arith.mulf %208, %196 : vector<8x128xf32>
    %219 = arith.addf %217, %218 : vector<8x128xf32>
    %220 = math.tanh %219 : vector<8x128xf32>
    %221 = arith.subf %157, %220 : vector<8x128xf32>
    %222 = arith.mulf %216, %221 : vector<8x128xf32>
    %223 = arith.addf %220, %222 : vector<8x128xf32>
    %224 = vector.extract_strided_slice %186 {offsets = [0, 0], sizes = [8, 128], strides = [1, 1]} : vector<8x384xf32> to vector<8x128xf32>
    %225 = vector.extract_strided_slice %197 {offsets = [0, 0], sizes = [8, 128], strides = [1, 1]} : vector<8x256xf32> to vector<8x128xf32>
    %226 = arith.addf %224, %225 : vector<8x128xf32>
    %227 = arith.negf %226 : vector<8x128xf32>
    %228 = math.exp %227 : vector<8x128xf32>
    %cst_43 = arith.constant 1.000000e+00 : f32
    %229 = vector.broadcast %cst_43 : f32 to vector<8x128xf32>
    %230 = arith.addf %229, %228 : vector<8x128xf32>
    %231 = arith.divf %229, %230 : vector<8x128xf32>
    %232 = vector.extract_strided_slice %186 {offsets = [0, 128], sizes = [8, 128], strides = [1, 1]} : vector<8x384xf32> to vector<8x128xf32>
    %233 = vector.extract_strided_slice %197 {offsets = [0, 128], sizes = [8, 128], strides = [1, 1]} : vector<8x256xf32> to vector<8x128xf32>
    %234 = arith.addf %232, %233 : vector<8x128xf32>
    %235 = arith.negf %234 : vector<8x128xf32>
    %236 = math.exp %235 : vector<8x128xf32>
    %cst_44 = arith.constant 1.000000e+00 : f32
    %237 = vector.broadcast %cst_44 : f32 to vector<8x128xf32>
    %238 = arith.addf %237, %236 : vector<8x128xf32>
    %239 = arith.divf %237, %238 : vector<8x128xf32>
    %240 = vector.extract_strided_slice %186 {offsets = [0, 256], sizes = [8, 128], strides = [1, 1]} : vector<8x384xf32> to vector<8x128xf32>
    %241 = arith.mulf %231, %200 : vector<8x128xf32>
    %242 = arith.addf %240, %241 : vector<8x128xf32>
    %243 = math.tanh %242 : vector<8x128xf32>
    %244 = arith.subf %180, %243 : vector<8x128xf32>
    %245 = arith.mulf %239, %244 : vector<8x128xf32>
    %246 = arith.addf %243, %245 : vector<8x128xf32>
    %247 = arith.maximumf %181, %223 : vector<8x128xf32>
    %248 = arith.maximumf %182, %246 : vector<8x128xf32>
    %249 = arith.addf %183, %223 : vector<8x128xf32>
    %250 = arith.addf %184, %246 : vector<8x128xf32>
    %c32_45 = arith.constant 32 : index
    %c0_46 = arith.constant 0 : index
    %251 = vector.load %arg10[%c32_45, %c0_46] : memref<64x768xf32, #tpu.memory_space<vmem>>, vector<8x384xf32>
    %c24_47 = arith.constant 24 : index
    %c384_48 = arith.constant 384 : index
    %252 = vector.load %arg10[%c24_47, %c384_48] : memref<64x768xf32, #tpu.memory_space<vmem>>, vector<8x384xf32>
    %253 = tpu.concatenate %223, %246 in 1 : vector<8x128xf32>, vector<8x128xf32> -> vector<8x256xf32>
    %254 = arith.truncf %253 : vector<8x256xf32> to vector<8x256xbf16>
    %c0_49 = arith.constant 0 : index
    %c0_50 = arith.constant 0 : index
    %255 = vector.load %arg2[%c0_49, %c0_50] : memref<256x768xbf16, #tpu.memory_space<vmem>>, vector<256x768xbf16>
    %cst_51 = arith.constant dense<0.000000e+00> : vector<8x768xf32>
    %256 = tpu.matmul %254, %255, %cst_51 {dimension_numbers = #tpu.dot_dimension_numbers<[1], [0], [0], [1], [0, 0, 1, 1], [], []>} : vector<8x256xbf16>, vector<256x768xbf16>, vector<8x768xf32> -> vector<8x768xf32>
    %257 = vector.extract_strided_slice %256 {offsets = [0, 0], sizes = [8, 384], strides = [1, 1]} : vector<8x768xf32> to vector<8x384xf32>
    %258 = vector.extract_strided_slice %256 {offsets = [0, 384], sizes = [8, 384], strides = [1, 1]} : vector<8x768xf32> to vector<8x384xf32>
    %259 = vector.extract_strided_slice %257 {offsets = [0, 0], sizes = [8, 256], strides = [1, 1]} : vector<8x384xf32> to vector<8x256xf32>
    %260 = vector.extract_strided_slice %257 {offsets = [0, 256], sizes = [8, 128], strides = [1, 1]} : vector<8x384xf32> to vector<8x128xf32>
    %261 = vector.broadcast %7 : vector<1x128xf32> to vector<8x128xf32>
    %262 = arith.addf %260, %261 : vector<8x128xf32>
    %263 = vector.extract_strided_slice %258 {offsets = [0, 0], sizes = [8, 256], strides = [1, 1]} : vector<8x384xf32> to vector<8x256xf32>
    %264 = vector.extract_strided_slice %258 {offsets = [0, 256], sizes = [8, 128], strides = [1, 1]} : vector<8x384xf32> to vector<8x128xf32>
    %265 = vector.broadcast %8 : vector<1x128xf32> to vector<8x128xf32>
    %266 = arith.addf %264, %265 : vector<8x128xf32>
    %267 = vector.extract_strided_slice %251 {offsets = [0, 0], sizes = [8, 128], strides = [1, 1]} : vector<8x384xf32> to vector<8x128xf32>
    %268 = vector.extract_strided_slice %259 {offsets = [0, 0], sizes = [8, 128], strides = [1, 1]} : vector<8x256xf32> to vector<8x128xf32>
    %269 = arith.addf %267, %268 : vector<8x128xf32>
    %270 = arith.negf %269 : vector<8x128xf32>
    %271 = math.exp %270 : vector<8x128xf32>
    %cst_52 = arith.constant 1.000000e+00 : f32
    %272 = vector.broadcast %cst_52 : f32 to vector<8x128xf32>
    %273 = arith.addf %272, %271 : vector<8x128xf32>
    %274 = arith.divf %272, %273 : vector<8x128xf32>
    %275 = vector.extract_strided_slice %251 {offsets = [0, 128], sizes = [8, 128], strides = [1, 1]} : vector<8x384xf32> to vector<8x128xf32>
    %276 = vector.extract_strided_slice %259 {offsets = [0, 128], sizes = [8, 128], strides = [1, 1]} : vector<8x256xf32> to vector<8x128xf32>
    %277 = arith.addf %275, %276 : vector<8x128xf32>
    %278 = arith.negf %277 : vector<8x128xf32>
    %279 = math.exp %278 : vector<8x128xf32>
    %cst_53 = arith.constant 1.000000e+00 : f32
    %280 = vector.broadcast %cst_53 : f32 to vector<8x128xf32>
    %281 = arith.addf %280, %279 : vector<8x128xf32>
    %282 = arith.divf %280, %281 : vector<8x128xf32>
    %283 = vector.extract_strided_slice %251 {offsets = [0, 256], sizes = [8, 128], strides = [1, 1]} : vector<8x384xf32> to vector<8x128xf32>
    %284 = arith.mulf %274, %262 : vector<8x128xf32>
    %285 = arith.addf %283, %284 : vector<8x128xf32>
    %286 = math.tanh %285 : vector<8x128xf32>
    %287 = arith.subf %223, %286 : vector<8x128xf32>
    %288 = arith.mulf %282, %287 : vector<8x128xf32>
    %289 = arith.addf %286, %288 : vector<8x128xf32>
    %290 = vector.extract_strided_slice %252 {offsets = [0, 0], sizes = [8, 128], strides = [1, 1]} : vector<8x384xf32> to vector<8x128xf32>
    %291 = vector.extract_strided_slice %263 {offsets = [0, 0], sizes = [8, 128], strides = [1, 1]} : vector<8x256xf32> to vector<8x128xf32>
    %292 = arith.addf %290, %291 : vector<8x128xf32>
    %293 = arith.negf %292 : vector<8x128xf32>
    %294 = math.exp %293 : vector<8x128xf32>
    %cst_54 = arith.constant 1.000000e+00 : f32
    %295 = vector.broadcast %cst_54 : f32 to vector<8x128xf32>
    %296 = arith.addf %295, %294 : vector<8x128xf32>
    %297 = arith.divf %295, %296 : vector<8x128xf32>
    %298 = vector.extract_strided_slice %252 {offsets = [0, 128], sizes = [8, 128], strides = [1, 1]} : vector<8x384xf32> to vector<8x128xf32>
    %299 = vector.extract_strided_slice %263 {offsets = [0, 128], sizes = [8, 128], strides = [1, 1]} : vector<8x256xf32> to vector<8x128xf32>
    %300 = arith.addf %298, %299 : vector<8x128xf32>
    %301 = arith.negf %300 : vector<8x128xf32>
    %302 = math.exp %301 : vector<8x128xf32>
    %cst_55 = arith.constant 1.000000e+00 : f32
    %303 = vector.broadcast %cst_55 : f32 to vector<8x128xf32>
    %304 = arith.addf %303, %302 : vector<8x128xf32>
    %305 = arith.divf %303, %304 : vector<8x128xf32>
    %306 = vector.extract_strided_slice %252 {offsets = [0, 256], sizes = [8, 128], strides = [1, 1]} : vector<8x384xf32> to vector<8x128xf32>
    %307 = arith.mulf %297, %266 : vector<8x128xf32>
    %308 = arith.addf %306, %307 : vector<8x128xf32>
    %309 = math.tanh %308 : vector<8x128xf32>
    %310 = arith.subf %246, %309 : vector<8x128xf32>
    %311 = arith.mulf %305, %310 : vector<8x128xf32>
    %312 = arith.addf %309, %311 : vector<8x128xf32>
    %313 = arith.maximumf %247, %289 : vector<8x128xf32>
    %314 = arith.maximumf %248, %312 : vector<8x128xf32>
    %315 = arith.addf %249, %289 : vector<8x128xf32>
    %316 = arith.addf %250, %312 : vector<8x128xf32>
    %c40_56 = arith.constant 40 : index
    %c0_57 = arith.constant 0 : index
    %317 = vector.load %arg10[%c40_56, %c0_57] : memref<64x768xf32, #tpu.memory_space<vmem>>, vector<8x384xf32>
    %c16_58 = arith.constant 16 : index
    %c384_59 = arith.constant 384 : index
    %318 = vector.load %arg10[%c16_58, %c384_59] : memref<64x768xf32, #tpu.memory_space<vmem>>, vector<8x384xf32>
    %319 = tpu.concatenate %289, %312 in 1 : vector<8x128xf32>, vector<8x128xf32> -> vector<8x256xf32>
    %320 = arith.truncf %319 : vector<8x256xf32> to vector<8x256xbf16>
    %c0_60 = arith.constant 0 : index
    %c0_61 = arith.constant 0 : index
    %321 = vector.load %arg2[%c0_60, %c0_61] : memref<256x768xbf16, #tpu.memory_space<vmem>>, vector<256x768xbf16>
    %cst_62 = arith.constant dense<0.000000e+00> : vector<8x768xf32>
    %322 = tpu.matmul %320, %321, %cst_62 {dimension_numbers = #tpu.dot_dimension_numbers<[1], [0], [0], [1], [0, 0, 1, 1], [], []>} : vector<8x256xbf16>, vector<256x768xbf16>, vector<8x768xf32> -> vector<8x768xf32>
    %323 = vector.extract_strided_slice %322 {offsets = [0, 0], sizes = [8, 384], strides = [1, 1]} : vector<8x768xf32> to vector<8x384xf32>
    %324 = vector.extract_strided_slice %322 {offsets = [0, 384], sizes = [8, 384], strides = [1, 1]} : vector<8x768xf32> to vector<8x384xf32>
    %325 = vector.extract_strided_slice %323 {offsets = [0, 0], sizes = [8, 256], strides = [1, 1]} : vector<8x384xf32> to vector<8x256xf32>
    %326 = vector.extract_strided_slice %323 {offsets = [0, 256], sizes = [8, 128], strides = [1, 1]} : vector<8x384xf32> to vector<8x128xf32>
    %327 = vector.broadcast %7 : vector<1x128xf32> to vector<8x128xf32>
    %328 = arith.addf %326, %327 : vector<8x128xf32>
    %329 = vector.extract_strided_slice %324 {offsets = [0, 0], sizes = [8, 256], strides = [1, 1]} : vector<8x384xf32> to vector<8x256xf32>
    %330 = vector.extract_strided_slice %324 {offsets = [0, 256], sizes = [8, 128], strides = [1, 1]} : vector<8x384xf32> to vector<8x128xf32>
    %331 = vector.broadcast %8 : vector<1x128xf32> to vector<8x128xf32>
    %332 = arith.addf %330, %331 : vector<8x128xf32>
    %333 = vector.extract_strided_slice %317 {offsets = [0, 0], sizes = [8, 128], strides = [1, 1]} : vector<8x384xf32> to vector<8x128xf32>
    %334 = vector.extract_strided_slice %325 {offsets = [0, 0], sizes = [8, 128], strides = [1, 1]} : vector<8x256xf32> to vector<8x128xf32>
    %335 = arith.addf %333, %334 : vector<8x128xf32>
    %336 = arith.negf %335 : vector<8x128xf32>
    %337 = math.exp %336 : vector<8x128xf32>
    %cst_63 = arith.constant 1.000000e+00 : f32
    %338 = vector.broadcast %cst_63 : f32 to vector<8x128xf32>
    %339 = arith.addf %338, %337 : vector<8x128xf32>
    %340 = arith.divf %338, %339 : vector<8x128xf32>
    %341 = vector.extract_strided_slice %317 {offsets = [0, 128], sizes = [8, 128], strides = [1, 1]} : vector<8x384xf32> to vector<8x128xf32>
    %342 = vector.extract_strided_slice %325 {offsets = [0, 128], sizes = [8, 128], strides = [1, 1]} : vector<8x256xf32> to vector<8x128xf32>
    %343 = arith.addf %341, %342 : vector<8x128xf32>
    %344 = arith.negf %343 : vector<8x128xf32>
    %345 = math.exp %344 : vector<8x128xf32>
    %cst_64 = arith.constant 1.000000e+00 : f32
    %346 = vector.broadcast %cst_64 : f32 to vector<8x128xf32>
    %347 = arith.addf %346, %345 : vector<8x128xf32>
    %348 = arith.divf %346, %347 : vector<8x128xf32>
    %349 = vector.extract_strided_slice %317 {offsets = [0, 256], sizes = [8, 128], strides = [1, 1]} : vector<8x384xf32> to vector<8x128xf32>
    %350 = arith.mulf %340, %328 : vector<8x128xf32>
    %351 = arith.addf %349, %350 : vector<8x128xf32>
    %352 = math.tanh %351 : vector<8x128xf32>
    %353 = arith.subf %289, %352 : vector<8x128xf32>
    %354 = arith.mulf %348, %353 : vector<8x128xf32>
    %355 = arith.addf %352, %354 : vector<8x128xf32>
    %356 = vector.extract_strided_slice %318 {offsets = [0, 0], sizes = [8, 128], strides = [1, 1]} : vector<8x384xf32> to vector<8x128xf32>
    %357 = vector.extract_strided_slice %329 {offsets = [0, 0], sizes = [8, 128], strides = [1, 1]} : vector<8x256xf32> to vector<8x128xf32>
    %358 = arith.addf %356, %357 : vector<8x128xf32>
    %359 = arith.negf %358 : vector<8x128xf32>
    %360 = math.exp %359 : vector<8x128xf32>
    %cst_65 = arith.constant 1.000000e+00 : f32
    %361 = vector.broadcast %cst_65 : f32 to vector<8x128xf32>
    %362 = arith.addf %361, %360 : vector<8x128xf32>
    %363 = arith.divf %361, %362 : vector<8x128xf32>
    %364 = vector.extract_strided_slice %318 {offsets = [0, 128], sizes = [8, 128], strides = [1, 1]} : vector<8x384xf32> to vector<8x128xf32>
    %365 = vector.extract_strided_slice %329 {offsets = [0, 128], sizes = [8, 128], strides = [1, 1]} : vector<8x256xf32> to vector<8x128xf32>
    %366 = arith.addf %364, %365 : vector<8x128xf32>
    %367 = arith.negf %366 : vector<8x128xf32>
    %368 = math.exp %367 : vector<8x128xf32>
    %cst_66 = arith.constant 1.000000e+00 : f32
    %369 = vector.broadcast %cst_66 : f32 to vector<8x128xf32>
    %370 = arith.addf %369, %368 : vector<8x128xf32>
    %371 = arith.divf %369, %370 : vector<8x128xf32>
    %372 = vector.extract_strided_slice %318 {offsets = [0, 256], sizes = [8, 128], strides = [1, 1]} : vector<8x384xf32> to vector<8x128xf32>
    %373 = arith.mulf %363, %332 : vector<8x128xf32>
    %374 = arith.addf %372, %373 : vector<8x128xf32>
    %375 = math.tanh %374 : vector<8x128xf32>
    %376 = arith.subf %312, %375 : vector<8x128xf32>
    %377 = arith.mulf %371, %376 : vector<8x128xf32>
    %378 = arith.addf %375, %377 : vector<8x128xf32>
    %379 = arith.maximumf %313, %355 : vector<8x128xf32>
    %380 = arith.maximumf %314, %378 : vector<8x128xf32>
    %381 = arith.addf %315, %355 : vector<8x128xf32>
    %382 = arith.addf %316, %378 : vector<8x128xf32>
    %c48_67 = arith.constant 48 : index
    %c0_68 = arith.constant 0 : index
    %383 = vector.load %arg10[%c48_67, %c0_68] : memref<64x768xf32, #tpu.memory_space<vmem>>, vector<8x384xf32>
    %c8_69 = arith.constant 8 : index
    %c384_70 = arith.constant 384 : index
    %384 = vector.load %arg10[%c8_69, %c384_70] : memref<64x768xf32, #tpu.memory_space<vmem>>, vector<8x384xf32>
    %385 = tpu.concatenate %355, %378 in 1 : vector<8x128xf32>, vector<8x128xf32> -> vector<8x256xf32>
    %386 = arith.truncf %385 : vector<8x256xf32> to vector<8x256xbf16>
    %c0_71 = arith.constant 0 : index
    %c0_72 = arith.constant 0 : index
    %387 = vector.load %arg2[%c0_71, %c0_72] : memref<256x768xbf16, #tpu.memory_space<vmem>>, vector<256x768xbf16>
    %cst_73 = arith.constant dense<0.000000e+00> : vector<8x768xf32>
    %388 = tpu.matmul %386, %387, %cst_73 {dimension_numbers = #tpu.dot_dimension_numbers<[1], [0], [0], [1], [0, 0, 1, 1], [], []>} : vector<8x256xbf16>, vector<256x768xbf16>, vector<8x768xf32> -> vector<8x768xf32>
    %389 = vector.extract_strided_slice %388 {offsets = [0, 0], sizes = [8, 384], strides = [1, 1]} : vector<8x768xf32> to vector<8x384xf32>
    %390 = vector.extract_strided_slice %388 {offsets = [0, 384], sizes = [8, 384], strides = [1, 1]} : vector<8x768xf32> to vector<8x384xf32>
    %391 = vector.extract_strided_slice %389 {offsets = [0, 0], sizes = [8, 256], strides = [1, 1]} : vector<8x384xf32> to vector<8x256xf32>
    %392 = vector.extract_strided_slice %389 {offsets = [0, 256], sizes = [8, 128], strides = [1, 1]} : vector<8x384xf32> to vector<8x128xf32>
    %393 = vector.broadcast %7 : vector<1x128xf32> to vector<8x128xf32>
    %394 = arith.addf %392, %393 : vector<8x128xf32>
    %395 = vector.extract_strided_slice %390 {offsets = [0, 0], sizes = [8, 256], strides = [1, 1]} : vector<8x384xf32> to vector<8x256xf32>
    %396 = vector.extract_strided_slice %390 {offsets = [0, 256], sizes = [8, 128], strides = [1, 1]} : vector<8x384xf32> to vector<8x128xf32>
    %397 = vector.broadcast %8 : vector<1x128xf32> to vector<8x128xf32>
    %398 = arith.addf %396, %397 : vector<8x128xf32>
    %399 = vector.extract_strided_slice %383 {offsets = [0, 0], sizes = [8, 128], strides = [1, 1]} : vector<8x384xf32> to vector<8x128xf32>
    %400 = vector.extract_strided_slice %391 {offsets = [0, 0], sizes = [8, 128], strides = [1, 1]} : vector<8x256xf32> to vector<8x128xf32>
    %401 = arith.addf %399, %400 : vector<8x128xf32>
    %402 = arith.negf %401 : vector<8x128xf32>
    %403 = math.exp %402 : vector<8x128xf32>
    %cst_74 = arith.constant 1.000000e+00 : f32
    %404 = vector.broadcast %cst_74 : f32 to vector<8x128xf32>
    %405 = arith.addf %404, %403 : vector<8x128xf32>
    %406 = arith.divf %404, %405 : vector<8x128xf32>
    %407 = vector.extract_strided_slice %383 {offsets = [0, 128], sizes = [8, 128], strides = [1, 1]} : vector<8x384xf32> to vector<8x128xf32>
    %408 = vector.extract_strided_slice %391 {offsets = [0, 128], sizes = [8, 128], strides = [1, 1]} : vector<8x256xf32> to vector<8x128xf32>
    %409 = arith.addf %407, %408 : vector<8x128xf32>
    %410 = arith.negf %409 : vector<8x128xf32>
    %411 = math.exp %410 : vector<8x128xf32>
    %cst_75 = arith.constant 1.000000e+00 : f32
    %412 = vector.broadcast %cst_75 : f32 to vector<8x128xf32>
    %413 = arith.addf %412, %411 : vector<8x128xf32>
    %414 = arith.divf %412, %413 : vector<8x128xf32>
    %415 = vector.extract_strided_slice %383 {offsets = [0, 256], sizes = [8, 128], strides = [1, 1]} : vector<8x384xf32> to vector<8x128xf32>
    %416 = arith.mulf %406, %394 : vector<8x128xf32>
    %417 = arith.addf %415, %416 : vector<8x128xf32>
    %418 = math.tanh %417 : vector<8x128xf32>
    %419 = arith.subf %355, %418 : vector<8x128xf32>
    %420 = arith.mulf %414, %419 : vector<8x128xf32>
    %421 = arith.addf %418, %420 : vector<8x128xf32>
    %422 = vector.extract_strided_slice %384 {offsets = [0, 0], sizes = [8, 128], strides = [1, 1]} : vector<8x384xf32> to vector<8x128xf32>
    %423 = vector.extract_strided_slice %395 {offsets = [0, 0], sizes = [8, 128], strides = [1, 1]} : vector<8x256xf32> to vector<8x128xf32>
    %424 = arith.addf %422, %423 : vector<8x128xf32>
    %425 = arith.negf %424 : vector<8x128xf32>
    %426 = math.exp %425 : vector<8x128xf32>
    %cst_76 = arith.constant 1.000000e+00 : f32
    %427 = vector.broadcast %cst_76 : f32 to vector<8x128xf32>
    %428 = arith.addf %427, %426 : vector<8x128xf32>
    %429 = arith.divf %427, %428 : vector<8x128xf32>
    %430 = vector.extract_strided_slice %384 {offsets = [0, 128], sizes = [8, 128], strides = [1, 1]} : vector<8x384xf32> to vector<8x128xf32>
    %431 = vector.extract_strided_slice %395 {offsets = [0, 128], sizes = [8, 128], strides = [1, 1]} : vector<8x256xf32> to vector<8x128xf32>
    %432 = arith.addf %430, %431 : vector<8x128xf32>
    %433 = arith.negf %432 : vector<8x128xf32>
    %434 = math.exp %433 : vector<8x128xf32>
    %cst_77 = arith.constant 1.000000e+00 : f32
    %435 = vector.broadcast %cst_77 : f32 to vector<8x128xf32>
    %436 = arith.addf %435, %434 : vector<8x128xf32>
    %437 = arith.divf %435, %436 : vector<8x128xf32>
    %438 = vector.extract_strided_slice %384 {offsets = [0, 256], sizes = [8, 128], strides = [1, 1]} : vector<8x384xf32> to vector<8x128xf32>
    %439 = arith.mulf %429, %398 : vector<8x128xf32>
    %440 = arith.addf %438, %439 : vector<8x128xf32>
    %441 = math.tanh %440 : vector<8x128xf32>
    %442 = arith.subf %378, %441 : vector<8x128xf32>
    %443 = arith.mulf %437, %442 : vector<8x128xf32>
    %444 = arith.addf %441, %443 : vector<8x128xf32>
    %445 = arith.maximumf %379, %421 : vector<8x128xf32>
    %446 = arith.maximumf %380, %444 : vector<8x128xf32>
    %447 = arith.addf %381, %421 : vector<8x128xf32>
    %448 = arith.addf %382, %444 : vector<8x128xf32>
    %c56_78 = arith.constant 56 : index
    %c0_79 = arith.constant 0 : index
    %449 = vector.load %arg10[%c56_78, %c0_79] : memref<64x768xf32, #tpu.memory_space<vmem>>, vector<8x384xf32>
    %c0_80 = arith.constant 0 : index
    %c384_81 = arith.constant 384 : index
    %450 = vector.load %arg10[%c0_80, %c384_81] : memref<64x768xf32, #tpu.memory_space<vmem>>, vector<8x384xf32>
    %451 = tpu.concatenate %421, %444 in 1 : vector<8x128xf32>, vector<8x128xf32> -> vector<8x256xf32>
    %452 = arith.truncf %451 : vector<8x256xf32> to vector<8x256xbf16>
    %c0_82 = arith.constant 0 : index
    %c0_83 = arith.constant 0 : index
    %453 = vector.load %arg2[%c0_82, %c0_83] : memref<256x768xbf16, #tpu.memory_space<vmem>>, vector<256x768xbf16>
    %cst_84 = arith.constant dense<0.000000e+00> : vector<8x768xf32>
    %454 = tpu.matmul %452, %453, %cst_84 {dimension_numbers = #tpu.dot_dimension_numbers<[1], [0], [0], [1], [0, 0, 1, 1], [], []>} : vector<8x256xbf16>, vector<256x768xbf16>, vector<8x768xf32> -> vector<8x768xf32>
    %455 = vector.extract_strided_slice %454 {offsets = [0, 0], sizes = [8, 384], strides = [1, 1]} : vector<8x768xf32> to vector<8x384xf32>
    %456 = vector.extract_strided_slice %454 {offsets = [0, 384], sizes = [8, 384], strides = [1, 1]} : vector<8x768xf32> to vector<8x384xf32>
    %457 = vector.extract_strided_slice %455 {offsets = [0, 0], sizes = [8, 256], strides = [1, 1]} : vector<8x384xf32> to vector<8x256xf32>
    %458 = vector.extract_strided_slice %455 {offsets = [0, 256], sizes = [8, 128], strides = [1, 1]} : vector<8x384xf32> to vector<8x128xf32>
    %459 = vector.broadcast %7 : vector<1x128xf32> to vector<8x128xf32>
    %460 = arith.addf %458, %459 : vector<8x128xf32>
    %461 = vector.extract_strided_slice %456 {offsets = [0, 0], sizes = [8, 256], strides = [1, 1]} : vector<8x384xf32> to vector<8x256xf32>
    %462 = vector.extract_strided_slice %456 {offsets = [0, 256], sizes = [8, 128], strides = [1, 1]} : vector<8x384xf32> to vector<8x128xf32>
    %463 = vector.broadcast %8 : vector<1x128xf32> to vector<8x128xf32>
    %464 = arith.addf %462, %463 : vector<8x128xf32>
    %465 = vector.extract_strided_slice %449 {offsets = [0, 0], sizes = [8, 128], strides = [1, 1]} : vector<8x384xf32> to vector<8x128xf32>
    %466 = vector.extract_strided_slice %457 {offsets = [0, 0], sizes = [8, 128], strides = [1, 1]} : vector<8x256xf32> to vector<8x128xf32>
    %467 = arith.addf %465, %466 : vector<8x128xf32>
    %468 = arith.negf %467 : vector<8x128xf32>
    %469 = math.exp %468 : vector<8x128xf32>
    %cst_85 = arith.constant 1.000000e+00 : f32
    %470 = vector.broadcast %cst_85 : f32 to vector<8x128xf32>
    %471 = arith.addf %470, %469 : vector<8x128xf32>
    %472 = arith.divf %470, %471 : vector<8x128xf32>
    %473 = vector.extract_strided_slice %449 {offsets = [0, 128], sizes = [8, 128], strides = [1, 1]} : vector<8x384xf32> to vector<8x128xf32>
    %474 = vector.extract_strided_slice %457 {offsets = [0, 128], sizes = [8, 128], strides = [1, 1]} : vector<8x256xf32> to vector<8x128xf32>
    %475 = arith.addf %473, %474 : vector<8x128xf32>
    %476 = arith.negf %475 : vector<8x128xf32>
    %477 = math.exp %476 : vector<8x128xf32>
    %cst_86 = arith.constant 1.000000e+00 : f32
    %478 = vector.broadcast %cst_86 : f32 to vector<8x128xf32>
    %479 = arith.addf %478, %477 : vector<8x128xf32>
    %480 = arith.divf %478, %479 : vector<8x128xf32>
    %481 = vector.extract_strided_slice %449 {offsets = [0, 256], sizes = [8, 128], strides = [1, 1]} : vector<8x384xf32> to vector<8x128xf32>
    %482 = arith.mulf %472, %460 : vector<8x128xf32>
    %483 = arith.addf %481, %482 : vector<8x128xf32>
    %484 = math.tanh %483 : vector<8x128xf32>
    %485 = arith.subf %421, %484 : vector<8x128xf32>
    %486 = arith.mulf %480, %485 : vector<8x128xf32>
    %487 = arith.addf %484, %486 : vector<8x128xf32>
    %488 = vector.extract_strided_slice %450 {offsets = [0, 0], sizes = [8, 128], strides = [1, 1]} : vector<8x384xf32> to vector<8x128xf32>
    %489 = vector.extract_strided_slice %461 {offsets = [0, 0], sizes = [8, 128], strides = [1, 1]} : vector<8x256xf32> to vector<8x128xf32>
    %490 = arith.addf %488, %489 : vector<8x128xf32>
    %491 = arith.negf %490 : vector<8x128xf32>
    %492 = math.exp %491 : vector<8x128xf32>
    %cst_87 = arith.constant 1.000000e+00 : f32
    %493 = vector.broadcast %cst_87 : f32 to vector<8x128xf32>
    %494 = arith.addf %493, %492 : vector<8x128xf32>
    %495 = arith.divf %493, %494 : vector<8x128xf32>
    %496 = vector.extract_strided_slice %450 {offsets = [0, 128], sizes = [8, 128], strides = [1, 1]} : vector<8x384xf32> to vector<8x128xf32>
    %497 = vector.extract_strided_slice %461 {offsets = [0, 128], sizes = [8, 128], strides = [1, 1]} : vector<8x256xf32> to vector<8x128xf32>
    %498 = arith.addf %496, %497 : vector<8x128xf32>
    %499 = arith.negf %498 : vector<8x128xf32>
    %500 = math.exp %499 : vector<8x128xf32>
    %cst_88 = arith.constant 1.000000e+00 : f32
    %501 = vector.broadcast %cst_88 : f32 to vector<8x128xf32>
    %502 = arith.addf %501, %500 : vector<8x128xf32>
    %503 = arith.divf %501, %502 : vector<8x128xf32>
    %504 = vector.extract_strided_slice %450 {offsets = [0, 256], sizes = [8, 128], strides = [1, 1]} : vector<8x384xf32> to vector<8x128xf32>
    %505 = arith.mulf %495, %464 : vector<8x128xf32>
    %506 = arith.addf %504, %505 : vector<8x128xf32>
    %507 = math.tanh %506 : vector<8x128xf32>
    %508 = arith.subf %444, %507 : vector<8x128xf32>
    %509 = arith.mulf %503, %508 : vector<8x128xf32>
    %510 = arith.addf %507, %509 : vector<8x128xf32>
    %511 = arith.maximumf %445, %487 : vector<8x128xf32>
    %512 = arith.maximumf %446, %510 : vector<8x128xf32>
    %513 = arith.addf %447, %487 : vector<8x128xf32>
    %514 = arith.addf %448, %510 : vector<8x128xf32>
    %515 = tpu.concatenate %487, %510 in 0 : vector<8x128xf32>, vector<8x128xf32> -> vector<16x128xf32>
    %516 = arith.truncf %515 : vector<16x128xf32> to vector<16x128xbf16>
    %517 = tpu.iota {dimensions = array<i32: 0>} : vector<8x16xi32>
    %518 = tpu.iota {dimensions = array<i32: 1>} : vector<8x16xi32>
    %c2_i32 = arith.constant 2 : i32
    %519 = vector.broadcast %c2_i32 : i32 to vector<8x16xi32>
    %520 = arith.muli %519, %517 : vector<8x16xi32>
    %521 = arith.cmpi eq, %518, %520 : vector<8x16xi32>
    %522 = arith.extui %521 : vector<8x16xi1> to vector<8x16xi32>
    %523 = arith.sitofp %522 : vector<8x16xi32> to vector<8x16xf32>
    %524 = arith.truncf %523 : vector<8x16xf32> to vector<8x16xbf16>
    %c2_i32_89 = arith.constant 2 : i32
    %525 = vector.broadcast %c2_i32_89 : i32 to vector<8x16xi32>
    %526 = arith.muli %525, %517 : vector<8x16xi32>
    %c1_i32 = arith.constant 1 : i32
    %527 = vector.broadcast %c1_i32 : i32 to vector<8x16xi32>
    %528 = arith.addi %526, %527 : vector<8x16xi32>
    %529 = arith.cmpi eq, %518, %528 : vector<8x16xi32>
    %530 = arith.extui %529 : vector<8x16xi1> to vector<8x16xi32>
    %531 = arith.sitofp %530 : vector<8x16xi32> to vector<8x16xf32>
    %532 = arith.truncf %531 : vector<8x16xf32> to vector<8x16xbf16>
    %cst_90 = arith.constant dense<0.000000e+00> : vector<8x128xf32>
    %533 = tpu.matmul %524, %516, %cst_90 {dimension_numbers = #tpu.dot_dimension_numbers<[1], [0], [0], [1], [0, 0, 1, 1], [], []>} : vector<8x16xbf16>, vector<16x128xbf16>, vector<8x128xf32> -> vector<8x128xf32>
    %cst_91 = arith.constant dense<0.000000e+00> : vector<8x128xf32>
    %534 = tpu.matmul %532, %516, %cst_91 {dimension_numbers = #tpu.dot_dimension_numbers<[1], [0], [0], [1], [0, 0, 1, 1], [], []>} : vector<8x16xbf16>, vector<16x128xbf16>, vector<8x128xf32> -> vector<8x128xf32>
    %cst_92 = arith.constant 1.250000e-01 : f32
    %535 = vector.broadcast %cst_92 : f32 to vector<8x128xf32>
    %536 = arith.mulf %513, %535 : vector<8x128xf32>
    %cst_93 = arith.constant 1.250000e-01 : f32
    %537 = vector.broadcast %cst_93 : f32 to vector<8x128xf32>
    %538 = arith.mulf %514, %537 : vector<8x128xf32>
    %539 = tpu.concatenate %511, %512, %536, %538, %533, %534 in 1 : vector<8x128xf32>, vector<8x128xf32>, vector<8x128xf32>, vector<8x128xf32>, vector<8x128xf32>, vector<8x128xf32> -> vector<8x768xf32>
    %540 = arith.truncf %539 : vector<8x768xf32> to vector<8x768xbf16>
    %c0_94 = arith.constant 0 : index
    %c0_95 = arith.constant 0 : index
    %541 = vector.load %arg5[%c0_94, %c0_95] : memref<768x64xbf16, #tpu.memory_space<vmem>>, vector<768x64xbf16>
    %cst_96 = arith.constant dense<0.000000e+00> : vector<8x64xf32>
    %542 = tpu.matmul %540, %541, %cst_96 {dimension_numbers = #tpu.dot_dimension_numbers<[1], [0], [0], [1], [0, 0, 1, 1], [], []>} : vector<8x768xbf16>, vector<768x64xbf16>, vector<8x64xf32> -> vector<8x64xf32>
    %c0_97 = arith.constant 0 : index
    %c0_98 = arith.constant 0 : index
    %543 = vector.load %arg6[%c0_97, %c0_98] : memref<1x64xf32, #tpu.memory_space<vmem>>, vector<1x64xf32>
    %544 = vector.broadcast %543 : vector<1x64xf32> to vector<8x64xf32>
    %545 = arith.addf %542, %544 : vector<8x64xf32>
    %cst_99 = arith.constant 0.000000e+00 : f32
    %546 = vector.broadcast %cst_99 : f32 to vector<8x64xf32>
    %547 = arith.maximumf %545, %546 : vector<8x64xf32>
    %548 = arith.truncf %547 : vector<8x64xf32> to vector<8x64xbf16>
    %c0_100 = arith.constant 0 : index
    %c0_101 = arith.constant 0 : index
    %549 = vector.load %arg7[%c0_100, %c0_101] : memref<64x4xbf16, #tpu.memory_space<vmem>>, vector<64x4xbf16>
    %cst_102 = arith.constant dense<0.000000e+00> : vector<8x4xf32>
    %550 = tpu.matmul %548, %549, %cst_102 {dimension_numbers = #tpu.dot_dimension_numbers<[1], [0], [0], [1], [0, 0, 1, 1], [], []>} : vector<8x64xbf16>, vector<64x4xbf16>, vector<8x4xf32> -> vector<8x4xf32>
    %c0_103 = arith.constant 0 : index
    %c0_104 = arith.constant 0 : index
    %551 = vector.load %arg8[%c0_103, %c0_104] : memref<1x4xf32, #tpu.memory_space<vmem>>, vector<1x4xf32>
    %552 = vector.broadcast %551 : vector<1x4xf32> to vector<8x4xf32>
    %553 = arith.addf %550, %552 : vector<8x4xf32>
    %cst_105 = arith.constant dense<0xFF800000> : vector<8xf32>
    %554 = vector.multi_reduction <maximumf>, %553, %cst_105 [1] : vector<8x4xf32> to vector<8xf32>
    %555 = vector.shape_cast %554 : vector<8xf32> to vector<8x1xf32>
    %556 = vector.broadcast %555 : vector<8x1xf32> to vector<8x4xf32>
    %557 = arith.subf %553, %556 : vector<8x4xf32>
    %558 = math.exp %557 : vector<8x4xf32>
    %cst_106 = arith.constant dense<0.000000e+00> : vector<8xf32>
    %559 = vector.multi_reduction <add>, %558, %cst_106 [1] : vector<8x4xf32> to vector<8xf32>
    %560 = vector.shape_cast %559 : vector<8xf32> to vector<8x1xf32>
    %561 = tpu.reciprocal %560 {approx = true} : vector<8x1xf32> -> vector<8x1xf32>
    %562 = vector.broadcast %561 : vector<8x1xf32> to vector<8x4xf32>
    %563 = arith.mulf %558, %562 : vector<8x4xf32>
    %c0_107 = arith.constant 0 : index
    %c0_108 = arith.constant 0 : index
    %564 = vector.load %arg9[%c0_107, %c0_108] : memref<8x4xf32, #tpu.memory_space<vmem>>, vector<8x4xf32>
    tpu.vector_store %arg9[%c0_107, %c0_108], %563 {strides = array<i32>} : memref<8x4xf32, #tpu.memory_space<vmem>>, vector<8x4xf32>,
    return
  }
}

</mosaic_0001>

<bundles_post_ra>
// kernel: best_classifier_forward.1
= control target key start
LH: loop header
LB: loop body
LE: loop exit
PB: predicated region body
PF: predicated region fallthrough
CT: control target
= control target key end

     0   :  { %v3871_v1 = vmov 0   ;;  %vm165_vm0 = vcmask 261120   ;;  %vm3873_vm1 = vmmov 0   ;;  %vm2331_vm3 = vcmask 130048   ;;  %s6226_s1 = inlined_call_operand.vmem [shape: bf16[32,768], index: 1, kind: input, shape index: {}]   ;;  %s6227_s0 = inlined_call_operand.vmem [shape: bf16[64,32], index: 0, kind: input, shape index: {}]   ;;  %s6228_s2 = inlined_call_operand.vmem [shape: bf16[256,768], index: 2, kind: input, shape index: {}]   ;;  %s6229_s3 = inlined_call_operand.vmem [shape: f32[1,768], index: 3, kind: input, shape index: {}]   ;;  %s6230_s4 = inlined_call_operand.vmem [shape: f32[1,256], index: 4, kind: input, shape index: {}]   ;;  %s6231_s5 = inlined_call_operand.vmem [shape: bf16[768,64], index: 5, kind: input, shape index: {}]   ;;  %s6232_s7 = inlined_call_operand.vmem [shape: bf16[64,4], index: 7, kind: input, shape index: {}]   ;;  %s6233_s6 = inlined_call_operand.vmem [shape: f32[1,64], index: 6, kind: input, shape index: {}]   ;;  %s6234_s8 = inlined_call_operand.vmem [shape: f32[1,4], index: 8, kind: input, shape index: {}]   ;;  %s6235_s9 = inlined_call_operand.vmem [shape: f32[8,4], index: 9, kind: output, shape index: {}]  }
   0x1   :  { %v3358_v0 = vld [vmem:[%s6226_s1 + $0x4] ss:$24 sps:$4 sm:$0xff]   ;;  %210 = vmatprep.mubr.bf16.mxu0 %v3871_v1  ;;  %283 = vmatprep.mubr.bf16.mxu1 %v3871_v1  ;;  %v3360_v2 = vld [vmem:[%s6226_s1] ss:$24 sps:$4 sm:$0xff]   ;;  %v3361_v3 = vld [vmem:[%s6226_s1 + $0x34] ss:$24 sps:$4 sm:$0xff]  }
   0x2   :  { %178 = vmatprep.subr.bf16.mxu0 %v3358_v0  ;;  %v3363_v4 = vld [vmem:[%s6226_s1 + $0xc] ss:$24 sps:$4 sm:$0xff]   ;;  %v3365_v5 = vld [vmem:[%s6226_s1 + $0x30] ss:$24 sps:$4 sm:$0xff]   ;;  %v3368_v8 = vld [vmem:[%s6226_s1 + $0x3c] ss:$24 sps:$4 sm:$0xff]  }
   0x3   :  { %179 = vmatpush1.bf16.msra.mxu0 %v3360_v2  ;;  %v3366_v6 = vld [vmem:[%s6226_s1 + $0x8] ss:$24 sps:$4 sm:$0xff]   ;;  %251 = vmatprep.subr.bf16.mxu1 %v3363_v4  ;;  %v3370_v9 = vld [vmem:[%s6226_s1 + $0x38] ss:$24 sps:$4 sm:$0xff]   ;;  %v3373_v11 = vld [vmem:[%s6226_s1 + $0x14] ss:$24 sps:$4 sm:$0xff]  }
   0x4   :  { %180 = vmatprep.subr.bf16.mxu0 %v3361_v3  ;;  %v3367_v7 = vld [vmem:[%s6227_s0] sm:$0xff]   ;;  %252 = vmatpush1.bf16.msra.mxu1 %v3366_v6  ;;  %v3371_v10 = vld [vmem:[%s6226_s1 + $0x10] ss:$24 sps:$4 sm:$0xff]   ;;  %v3379_v16 = vld [vmem:[%s6227_s0 + $0x18] sm:$0xff]   ;;  %vm2978_vm5 = vcmask 523264   ;;  %vm3022_vm6 = vcmask 31744  }
   0x5   :  { %253 = vmatprep.subr.bf16.mxu1 %v3368_v8  ;;  %v3378_v12 = vld [vmem:[%s6226_s1 + $0x44] ss:$24 sps:$4 sm:$0xff]   ;;  %v3376_v13 = vld [vmem:[%s6226_s1 + $0x40] ss:$24 sps:$4 sm:$0xff]   ;;  %v3374_v14 = vld [vmem:[%s6227_s0 + $0x8] sm:$0xff]  }
   0x6   :  { %v3375_v15 = vld [vmem:[%s6227_s0 + $0x10] sm:$0xff]   ;;  %v3987_v17 = vld [vmem:[%s6228_s2 + $0x4] ss:$24 sps:$4 sm:$0xff]   ;;  %v3992_v18 = vld [vmem:[%s6228_s2] ss:$24 sps:$4 sm:$0xff]  }
   0x7   :  { %181 = vmatpush1.bf16.msra.mxu0 %v3365_v5  ;;  %v3998_v19 = vld [vmem:[%s6228_s2 + $0xc] ss:$24 sps:$4 sm:$0xff]   ;;  %v4003_v20 = vld [vmem:[%s6228_s2 + $0x8] ss:$24 sps:$4 sm:$0xff]   ;;  %v4021_v23 = vld [vmem:[%s6228_s2 + $0x3c] ss:$24 sps:$4 sm:$0xff]  }
   0x8   :  { %324 = vmatprep.subr.bf16.mxu0 %v3373_v11  ;;  %254 = vmatpush1.bf16.msra.mxu1 %v3370_v9  ;;  %v4010_v21 = vld [vmem:[%s6228_s2 + $0x34] ss:$24 sps:$4 sm:$0xff]   ;;  %v4016_v22 = vld [vmem:[%s6228_s2 + $0x30] ss:$24 sps:$4 sm:$0xff]   ;;  %v4034_v25 = vld [vmem:[%s6228_s2 + $0x64] ss:$24 sps:$4 sm:$0xff]  }
   0x9   :  { %1085 = vmatprep.subr.bf16.mxu1 %v3987_v17  ;;  %v4027_v24 = vld [vmem:[%s6228_s2 + $0x38] ss:$24 sps:$4 sm:$0xff]   ;;  %v4045_v27 = vld [vmem:[%s6228_s2 + $0x6c] ss:$24 sps:$4 sm:$0xff]   ;;  %v4051_v28 = vld [vmem:[%s6228_s2 + $0x68] ss:$24 sps:$4 sm:$0xff]  }
   0xa   :  { %3055 = vmatmul.mubr.msk.bf16.vlgmr.msra.gmra.mrb[0].mxu0 %vm165_vm0, %v3367_v7  ;;  %v4040_v26 = vld [vmem:[%s6228_s2 + $0x60] ss:$24 sps:$4 sm:$0xff]   ;;  %v4058_v29 = vld [vmem:[%s6228_s2 + $0x94] ss:$24 sps:$4 sm:$0xff]   ;;  %v4064_v30 = vld [vmem:[%s6228_s2 + $0x90] ss:$24 sps:$4 sm:$0xff]  }
   0xb   :  { %325 = vmatpush1.bf16.msra.mxu0 %v3371_v10  ;;  %220 = vmatprep.mubr.bf16.mxu0 %v3871_v1  ;;  %v4069_v31 = vld [vmem:[%s6228_s2 + $0x9c] ss:$24 sps:$4 sm:$0xff]   ;;  %v4075_v32 = vld [vmem:[%s6228_s2 + $0x98] ss:$24 sps:$4 sm:$0xff]   ;;  %v4093_v35 = vld [vmem:[%s6228_s2 + $0xcc] ss:$24 sps:$4 sm:$0xff]  }
   0xc   :  { %326 = vmatprep.subr.bf16.mxu0 %v3378_v12  ;;  %3059 = vmatmul.mubr.msk.bf16.vlgmr.msra.gmra.mrb[0].mxu1 %vm165_vm0, %v3367_v7  ;;  %v4082_v33 = vld [vmem:[%s6228_s2 + $0xc4] ss:$24 sps:$4 sm:$0xff]   ;;  %v4088_v34 = vld [vmem:[%s6228_s2 + $0xc0] ss:$24 sps:$4 sm:$0xff]   ;;  %v4106_v37 = vld [vmem:[%s6228_s2 + $0xf4] ss:$24 sps:$4 sm:$0xff]  }
   0xd   :  { %293 = vmatprep.mubr.bf16.mxu1 %v3871_v1  ;;  %1086 = vmatpush1.bf16.msra.mxu1 %v3992_v18  ;;  %v4099_v36 = vld [vmem:[%s6228_s2 + $0xc8] ss:$24 sps:$4 sm:$0xff]   ;;  %v4117_v39 = vld [vmem:[%s6228_s2 + $0xfc] ss:$24 sps:$4 sm:$0xff]   ;;  %v4123_v40 = vld [vmem:[%s6228_s2 + $0xf8] ss:$24 sps:$4 sm:$0xff]  }
   0xe   :  { %1087 = vmatprep.subr.bf16.mxu1 %v4010_v21  ;;  %v4112_v38 = vld [vmem:[%s6228_s2 + $0xf0] ss:$24 sps:$4 sm:$0xff]   ;;  %6421 = vst [vmem:[#allocation3_spill] sm:$0xff] %v4117_v39  ;;  %6422 = vst [vmem:[#allocation4_spill] sm:$0xff] %v4123_v40  ;;  %v4130_v41 = vld [vmem:[%s6228_s2 + $0x124] ss:$24 sps:$4 sm:$0xff]  }
   0xf   :  { %327 = vmatpush1.bf16.msra.mxu0 %v3376_v13  ;;  %v4136_v42 = vld [vmem:[%s6228_s2 + $0x120] ss:$24 sps:$4 sm:$0xff]   ;;  %v4141_v43 = vld [vmem:[%s6228_s2 + $0x12c] ss:$24 sps:$4 sm:$0xff]   ;;  %v4160_v46 = vld [vmem:[%s6228_s2 + $0x150] ss:$24 sps:$4 sm:$0xff]  }
  0x10   :  { %1126 = vmatprep.subr.bf16.mxu0 %v3998_v19  ;;  %6423 = vst [vmem:[#allocation5_spill] sm:$0xff] %v4141_v43  ;;  %v4146_v44 = vld [vmem:[%s6228_s2 + $0x128] ss:$24 sps:$4 sm:$0xff]   ;;  %v4154_v45 = vld [vmem:[%s6228_s2 + $0x154] ss:$24 sps:$4 sm:$0xff]  }
  0x11   :  { %1088 = vmatpush1.bf16.msra.mxu1 %v4016_v22  ;;  %6424 = vst [vmem:[#allocation6_spill] sm:$0xff] %v4146_v44  ;;  %v4165_v47 = vld [vmem:[%s6228_s2 + $0x15c] ss:$24 sps:$4 sm:$0xff]   ;;  %v4171_v48 = vld [vmem:[%s6228_s2 + $0x158] ss:$24 sps:$4 sm:$0xff]  }
  0x12   :  { %3056 = vmatmul.mubr.msk.bf16.gmra.mrb[4].mxu0 %vm165_vm0, %v3374_v14  ;;  %1089 = vmatprep.subr.bf16.mxu1 %v4034_v25  ;;  %6425 = vst [vmem:[#allocation7_spill] sm:$0xff] %v4165_v47  ;;  %6426 = vst [vmem:[#allocation8_spill] sm:$0xff] %v4171_v48  ;;  %v4178_v49 = vld [vmem:[%s6228_s2 + $0x184] ss:$24 sps:$4 sm:$0xff]   ;;  %v4184_v50 = vld [vmem:[%s6228_s2 + $0x180] ss:$24 sps:$4 sm:$0xff]  }
  0x13   :  { %230 = vmatprep.mubr.bf16.mxu0 %v3871_v1  ;;  %v4189_v51 = vld [vmem:[%s6228_s2 + $0x18c] ss:$24 sps:$4 sm:$0xff]   ;;  %v4195_v52 = vld [vmem:[%s6228_s2 + $0x188] ss:$24 sps:$4 sm:$0xff]   ;;  %v4213_v55 = vld [vmem:[%s6228_s2 + $0x1bc] ss:$24 sps:$4 sm:$0xff]  }
  0x14   :  { %3060 = vmatmul.mubr.msk.bf16.gmra.mrb[4].mxu1 %vm165_vm0, %v3374_v14  ;;  %6427 = vst [vmem:[#allocation9_spill] sm:$0xff] %v4189_v51  ;;  %6428 = vst [vmem:[#allocation10_spill] sm:$0xff] %v4195_v52  ;;  %v4202_v53 = vld [vmem:[%s6228_s2 + $0x1b4] ss:$24 sps:$4 sm:$0xff]   ;;  %v4208_v54 = vld [vmem:[%s6228_s2 + $0x1b0] ss:$24 sps:$4 sm:$0xff]  }
  0x15   :  { %303 = vmatprep.mubr.bf16.mxu1 %v3871_v1  ;;  %1090 = vmatpush1.bf16.msra.mxu1 %v4040_v26  ;;  %6429 = vst [vmem:[#allocation11_spill] sm:$0xff] %v4213_v55  ;;  %v4219_v56 = vld [vmem:[%s6228_s2 + $0x1b8] ss:$24 sps:$4 sm:$0xff]   ;;  %v4226_v57 = vld [vmem:[%s6228_s2 + $0x1e4] ss:$24 sps:$4 sm:$0xff]  }
  0x16   :  { %1091 = vmatprep.subr.bf16.mxu1 %v4058_v29  ;;  %6430 = vst [vmem:[#allocation12_spill] sm:$0xff] %v4219_v56  ;;  %v4232_v58 = vld [vmem:[%s6228_s2 + $0x1e0] ss:$24 sps:$4 sm:$0xff]   ;;  %v4237_v59 = vld [vmem:[%s6228_s2 + $0x1ec] ss:$24 sps:$4 sm:$0xff]  }
  0x17   :  { %6431 = vst [vmem:[#allocation13_spill] sm:$0xff] %v4237_v59  ;;  %v4243_v60 = vld [vmem:[%s6228_s2 + $0x1e8] ss:$24 sps:$4 sm:$0xff]   ;;  %v4250_v61 = vld [vmem:[%s6228_s2 + $0x214] ss:$24 sps:$4 sm:$0xff]  }
  0x18   :  { %6432 = vst [vmem:[#allocation14_spill] sm:$0xff] %v4243_v60  ;;  %v4256_v62 = vld [vmem:[%s6228_s2 + $0x210] ss:$24 sps:$4 sm:$0xff]   ;;  %v4261_v63 = vld [vmem:[%s6228_s2 + $0x21c] ss:$24 sps:$4 sm:$0xff]  }
  0x19   :  { %1092 = vmatpush1.bf16.msra.mxu1 %v4064_v30  ;;  %6433 = vst [vmem:[#allocation15_spill] sm:$0xff] %v4261_v63  ;;  %v4267_v0 = vld [vmem:[%s6228_s2 + $0x218] ss:$24 sps:$4 sm:$0xff]   ;;  %v4285_v3 = vld [vmem:[%s6228_s2 + $0x24c] ss:$24 sps:$4 sm:$0xff]  }
  0x1a   :  { %3057 = vmatmul.mubr.msk.bf16.gmra.mrb[8].mxu0 %vm165_vm0, %v3375_v15  ;;  %1093 = vmatprep.subr.bf16.mxu1 %v4082_v33  ;;  %6434 = vst [vmem:[#allocation16_spill] sm:$0xff] %v4267_v0  ;;  %v4280_v2 = vld [vmem:[%s6228_s2 + $0x240] ss:$24 sps:$4 sm:$0xff]   ;;  %6435 = vst [vmem:[#allocation17_spill] sm:$0xff] %v4285_v3  ;;  %v4296_v5 = vld [vmem:[%s6228_s2 + $0x274] ss:$24 sps:$4 sm:$0xff]  }
  0x1b   :  { %240 = vmatprep.mubr.bf16.mxu0 %v3871_v1  ;;  %v4290_v4 = vld [vmem:[%s6228_s2 + $0x248] ss:$24 sps:$4 sm:$0xff]   ;;  %v4301_v6 = vld [vmem:[%s6228_s2 + $0x27c] ss:$24 sps:$4 sm:$0xff]   ;;  %v4320_v9 = vld [vmem:[%s6228_s2 + $0x278] ss:$24 sps:$4 sm:$0xff]  }
  0x1c   :  { %3061 = vmatmul.mubr.msk.bf16.gmra.mrb[8].mxu1 %vm165_vm0, %v3375_v15  ;;  %6436 = vst [vmem:[#allocation18_spill] sm:$0xff] %v4290_v4  ;;  %6437 = vst [vmem:[#allocation19_spill] sm:$0xff] %v4301_v6  ;;  %v4314_v8 = vld [vmem:[%s6228_s2 + $0x2a4] ss:$24 sps:$4 sm:$0xff]   ;;  %v4332_v11 = vld [vmem:[%s6228_s2 + $0x2a0] ss:$24 sps:$4 sm:$0xff]  }
  0x1d   :  { %313 = vmatprep.mubr.bf16.mxu1 %v3871_v1  ;;  %1094 = vmatpush1.bf16.msra.mxu1 %v4088_v34  ;;  %6439 = vst [vmem:[#allocation21_spill] sm:$0xff] %v4314_v8  ;;  %6440 = vst [vmem:[#allocation22_spill] sm:$0xff] %v4320_v9  ;;  %v4326_v10 = vld [vmem:[%s6228_s2 + $0x2ac] ss:$24 sps:$4 sm:$0xff]   ;;  %v4344_v13 = vld [vmem:[%s6228_s2 + $0x2a8] ss:$24 sps:$4 sm:$0xff]  }
  0x1e   :  { %1095 = vmatprep.subr.bf16.mxu1 %v4106_v37  ;;  %6441 = vst [vmem:[#allocation23_spill] sm:$0xff] %v4326_v10  ;;  %6442 = vst [vmem:[#allocation24_spill] sm:$0xff] %v4332_v11  ;;  %v4338_v12 = vld [vmem:[%s6228_s2 + $0x2d4] ss:$24 sps:$4 sm:$0xff]  }
  0x1f   :  { %6443 = vst [vmem:[#allocation25_spill] sm:$0xff] %v4338_v12  ;;  %6444 = vst [vmem:[#allocation26_spill] sm:$0xff] %v4344_v13 }
  0x21   :  { %1096 = vmatpush1.bf16.msra.mxu1 %v4112_v38 }
  0x22   :  { %3058 = vmatmul.mubr.msk.bf16.gmra.mrb[12].mxu0 %vm165_vm0, %v3379_v16  ;;  %1097 = vmatprep.subr.bf16.mxu1 %v4130_v41 }
  0x23   :  { %356 = vmatprep.mubr.bf16.mxu0 %v3871_v1 }
  0x24   :  { %3062 = vmatmul.mubr.msk.bf16.gmra.mrb[12].mxu1 %vm165_vm0, %v3379_v16 }
  0x25   :  { %1098 = vmatpush1.bf16.msra.mxu1 %v4136_v42 }
  0x26   :  { %1099 = vmatprep.subr.bf16.mxu1 %v4154_v45 }
  0x29   :  { %1100 = vmatpush1.bf16.msra.mxu1 %v4160_v46 }
  0x2a   :  { %3063 = vmatmul.mubr.msk.bf16.vlgmr.msra.gmra.mrb[16].mxu0 %vm165_vm0, %v3367_v7  ;;  %1101 = vmatprep.subr.bf16.mxu1 %v4178_v49  ;;  %v4308_v7 = vld [vmem:[%s6228_s2 + $0x270] ss:$24 sps:$4 sm:$0xff]  }
  0x2b   :  { %366 = vmatprep.mubr.bf16.mxu0 %v3871_v1  ;;  %1127 = vmatpush1.bf16.msra.mxu0 %v4003_v20  ;;  %6438 = vst [vmem:[#allocation20_spill] sm:$0xff] %v4308_v7 }
  0x2c   :  { %1128 = vmatprep.subr.bf16.mxu0 %v4021_v23 }
  0x2d   :  { %1102 = vmatpush1.bf16.msra.mxu1 %v4184_v50 }
  0x2e   :  { %1103 = vmatprep.subr.bf16.mxu1 %v4202_v53 }
  0x2f   :  { %1129 = vmatpush1.bf16.msra.mxu0 %v4027_v24 }
  0x30   :  { %1130 = vmatprep.subr.bf16.mxu0 %v4045_v27 }
  0x31   :  { %1104 = vmatpush1.bf16.msra.mxu1 %v4208_v54 }
  0x32   :  { %3064 = vmatmul.mubr.msk.bf16.gmra.mrb[20].mxu0 %vm165_vm0, %v3374_v14  ;;  %1105 = vmatprep.subr.bf16.mxu1 %v4226_v57  ;;  %v4350_v14 = vld [vmem:[%s6228_s2 + $0x2dc] ss:$24 sps:$4 sm:$0xff]  }
  0x33   :  { %376 = vmatprep.mubr.bf16.mxu0 %v3871_v1  ;;  %1131 = vmatpush1.bf16.msra.mxu0 %v4051_v28  ;;  %6445 = vst [vmem:[#allocation27_spill] sm:$0xff] %v4350_v14 }
  0x34   :  { %1132 = vmatprep.subr.bf16.mxu0 %v4069_v31 }
  0x35   :  { %1106 = vmatpush1.bf16.msra.mxu1 %v4232_v58 }
  0x36   :  { %1107 = vmatprep.subr.bf16.mxu1 %v4250_v61 }
  0x37   :  { %1133 = vmatpush1.bf16.msra.mxu0 %v4075_v32 }
  0x38   :  { %1134 = vmatprep.subr.bf16.mxu0 %v4093_v35 }
  0x39   :  { %1108 = vmatpush1.bf16.msra.mxu1 %v4256_v62 }
  0x3a   :  { %3065 = vmatmul.mubr.msk.bf16.gmra.mrb[24].mxu0 %vm165_vm0, %v3375_v15  ;;  %v4356_v15 = vld [vmem:[%s6228_s2 + $0x2d0] ss:$24 sps:$4 sm:$0xff]  }
  0x3b   :  { %386 = vmatprep.mubr.bf16.mxu0 %v3871_v1  ;;  %1135 = vmatpush1.bf16.msra.mxu0 %v4099_v36  ;;  %v4274_v1 = vld [vmem:[%s6228_s2 + $0x244] ss:$24 sps:$4 sm:$0xff]   ;;  %6446 = vst [vmem:[#allocation28_spill] sm:$0xff] %v4356_v15 }
  0x3c   :  { %1136 = vmatprep.subr.bf16.mxu0 %v4117_v39  ;;  %1109 = vmatprep.subr.bf16.mxu1 %v4274_v1 }
  0x3d   :  { %1110 = vmatpush1.bf16.msra.mxu1 %v4280_v2 }
  0x3e   :  { %1111 = vmatprep.subr.bf16.mxu1 %v4296_v5 }
  0x3f   :  { %1137 = vmatpush1.bf16.msra.mxu0 %v4123_v40 }
  0x40   :  { %1138 = vmatprep.subr.bf16.mxu0 %v4141_v43 }
  0x41   :  { %1112 = vmatpush1.bf16.msra.mxu1 %v4308_v7 }
  0x42   :  { %3066 = vmatmul.mubr.msk.bf16.gmra.mrb[28].mxu0 %vm165_vm0, %v3379_v16  ;;  %1113 = vmatprep.subr.bf16.mxu1 %v4314_v8  ;;  %v4363_v16 = vld [vmem:[%s6228_s2 + $0x2d8] ss:$24 sps:$4 sm:$0xff]  }
  0x43   :  { %1139 = vmatpush1.bf16.msra.mxu0 %v4146_v44  ;;  %6447 = vst [vmem:[#allocation29_spill] sm:$0xff] %v4363_v16 }
  0x44   :  { %1140 = vmatprep.subr.bf16.mxu0 %v4165_v47 }
  0x45   :  { %1114 = vmatpush1.bf16.msra.mxu1 %v4332_v11 }
  0x46   :  { %1115 = vmatprep.subr.bf16.mxu1 %v4338_v12 }
  0x47   :  { %1141 = vmatpush1.bf16.msra.mxu0 %v4171_v48 }
  0x48   :  { %1142 = vmatprep.subr.bf16.mxu0 %v4189_v51 }
  0x49   :  { %1116 = vmatpush1.bf16.msra.mxu1 %v4356_v15 }
  0x4b   :  { %1143 = vmatpush1.bf16.msra.mxu0 %v4195_v52 }
  0x4c   :  { %1144 = vmatprep.subr.bf16.mxu0 %v4213_v55 }
  0x4f   :  { %1145 = vmatpush1.bf16.msra.mxu0 %v4219_v56 }
  0x50   :  { %1146 = vmatprep.subr.bf16.mxu0 %v4237_v59 }
  0x53   :  { %1147 = vmatpush1.bf16.msra.mxu0 %v4243_v60 }
  0x54   :  { %1148 = vmatprep.subr.bf16.mxu0 %v4261_v63 }
  0x57   :  { %1149 = vmatpush1.bf16.msra.mxu0 %v4267_v0 }
  0x58   :  { %1150 = vmatprep.subr.bf16.mxu0 %v4285_v3 }
  0x5b   :  { %1151 = vmatpush1.bf16.msra.mxu0 %v4290_v4 }
  0x5c   :  { %1152 = vmatprep.subr.bf16.mxu0 %v4301_v6 }
  0x5f   :  { %1153 = vmatpush1.bf16.msra.mxu0 %v4320_v9 }
  0x60   :  { %1154 = vmatprep.subr.bf16.mxu0 %v4326_v10  ;;  %v4370_v10 = vld [vmem:[%s6228_s2 + $0x14] ss:$24 sps:$4 sm:$0xff]  }
  0x61   :  { %6448 = vst [vmem:[#allocation30_spill] sm:$0xff] %v4370_v10  ;;  %1167 = vmatprep.subr.bf16.mxu1 %v4370_v10 }
  0x63   :  { %1155 = vmatpush1.bf16.msra.mxu0 %v4344_v13  ;;  %v6254_v13 = vlaneseq }
  0x64   :  { %1156 = vmatprep.subr.bf16.mxu0 %v4350_v14  ;;  %v4382_v14 = vld [vmem:[%s6229_s3] sm:$0x3f] }
  0x65   :  { %v4376_v9 = vshrl.u32 %v6254_v13, 7 }
  0x67   :  { %1157 = vmatpush1.bf16.msra.mxu0 %v4363_v16  ;;  %6449 = vst [vmem:[#allocation31_spill] sm:$0xff] %v4376_v9  ;;  %v57_v6 = vsub.s32 0, %v4376_v9  ;;  %v69_v16 = vsub.s32 3, %v4376_v9  ;;  %v61_v3 = vsub.s32 1, %v4376_v9 }
  0x68   :  { %1262 = vmatprep.subr.bf16.mxu0 %v3987_v17  ;;  %v65_v17 = vsub.s32 2, %v4376_v9 }
  0x69   :  { %v4385_v4 = vrot.slane %v4382_v14, %v57_v6  ;;  %v4392_v60 = vrot.slane %v4382_v14, %v69_v16  ;;  %v4395_v59 = vrot.slane %v4382_v14, %v61_v3 }
  0x6a   :  { %v4398_v6 = vrot.slane %v4382_v14, %v65_v17 }
  0xdd   :  { %v212_v0 = vpop.f32.mrb[0].mxu0 }
  0xde   :  { %v213_v13 = vadd.f32 %v212_v0, %v4385_v4  ;;  %v214_v63 = vpop.f32.mrb[1].mxu0 }
  0xdf   :  { %v216_v56 = vpop.f32.mrb[2].mxu0  ;;  %v4403_v48 = vpop.f32.mrb[0].mxu1 }
  0xe0   :  { %v3067_v55 = vmul.f32 -1.442695, %v213_v13  ;;  %v4401_v52 = vadd.f32 %v216_v56, %v4385_v4  ;;  %v218_v51 = vpop.f32.mrb[3].mxu0  ;;  %v287_v47 = vpop.f32.mrb[1].mxu1 }
  0xe1   :  { %v4406_v0 = vadd.f32 %v218_v51, %v4395_v59  ;;  %v4409_v16 = vadd.f32 %v287_v47, %v4392_v60  ;;  %v289_v3 = vpop.f32.mrb[2].mxu1 }
  0xe2   :  { %6450 = vst [vmem:[#allocation32_spill] sm:$0xff] %v4401_v52  ;;  %3576 = vpow2.f32 %v3067_v55  ;;  %v4412_v44 = vadd.f32 %v289_v3, %v4398_v6  ;;  %v291_v17 = vpop.f32.mrb[3].mxu1  ;;  %v215_v52 = vadd.f32 %v214_v63, %v4395_v59 }
  0xe3   :  { %6451 = vst [vmem:[#allocation33_spill] sm:$0xff] %v4406_v0  ;;  %6452 = vst [vmem:[#allocation34_spill] sm:$0xff] %v4409_v16  ;;  %v4415_v13 = vadd.f32 %v291_v17, %v4392_v60 }
  0xe4   :  { %6453 = vst [vmem:[#allocation35_spill] sm:$0xff] %v4412_v44 }
  0xe5   :  { %6454 = vst [vmem:[#allocation36_spill] sm:$0xff] %v4415_v13  ;;  %v222_v56 = vpop.f32.mrb[4].mxu0  ;;  %v3068_v13 = vmul.f32 -1.442695, %v215_v52 }
  0xe6   :  { %v4419_v43 = vadd.f32 %v222_v56, %v4385_v4  ;;  %v224_v51 = vpop.f32.mrb[5].mxu0 }
  0xe7   :  { %v4422_v55 = vadd.f32 %v224_v51, %v4395_v59  ;;  %v226_v47 = vpop.f32.mrb[6].mxu0  ;;  %v295_v44 = vpop.f32.mrb[4].mxu1  ;;  %3578 = vpow2.f32 %v3068_v13 }
  0xe8   :  { %6455 = vst [vmem:[#allocation37_spill] sm:$0xff] %v4419_v43  ;;  %v4425_v16 = vadd.f32 %v226_v47, %v4385_v4  ;;  %v228_v3 = vpop.f32.mrb[7].mxu0  ;;  %v4431_v17 = vadd.f32 %v295_v44, %v4398_v6  ;;  %v297_v63 = vpop.f32.mrb[5].mxu1 }
  0xe9   :  { %6456 = vst [vmem:[#allocation38_spill] sm:$0xff] %v4422_v55  ;;  %v4428_v0 = vadd.f32 %v228_v3, %v4395_v59  ;;  %v4434_v56 = vadd.f32 %v297_v63, %v4392_v60  ;;  %v299_v43 = vpop.f32.mrb[6].mxu1 }
  0xea   :  { %6457 = vst [vmem:[#allocation39_spill] sm:$0xff] %v4425_v16  ;;  %6459 = vst [vmem:[#allocation41_spill] sm:$0xff] %v4431_v17  ;;  %v4437_v51 = vadd.f32 %v299_v43, %v4398_v6  ;;  %v301_v55 = vpop.f32.mrb[7].mxu1 }
  0xeb   :  { %6458 = vst [vmem:[#allocation40_spill] sm:$0xff] %v4428_v0  ;;  %6460 = vst [vmem:[#allocation42_spill] sm:$0xff] %v4434_v56  ;;  %v4440_v16 = vadd.f32 %v301_v55, %v4392_v60 }
  0xec   :  { %6461 = vst [vmem:[#allocation43_spill] sm:$0xff] %v4437_v51  ;;  %v3577_v47 = vpop.eup %3576 }
  0xed   :  { %6462 = vst [vmem:[#allocation44_spill] sm:$0xff] %v4440_v16  ;;  %v456_v40 = vadd.f32 1.0, %v3577_v47  ;;  %v232_v3 = vpop.f32.mrb[8].mxu0 }
  0xee   :  { %v4443_v44 = vadd.f32 %v232_v3, %v4385_v4  ;;  %v234_v0 = vpop.f32.mrb[9].mxu0 }
  0xef   :  { %3580 = vrcp.f32 %v456_v40  ;;  %v4446_v52 = vadd.f32 %v234_v0, %v4395_v59  ;;  %v236_v63 = vpop.f32.mrb[10].mxu0  ;;  %v305_v51 = vpop.f32.mrb[8].mxu1 }
  0xf0   :  { %6463 = vst [vmem:[#allocation45_spill] sm:$0xff] %v4443_v44  ;;  %v4449_v43 = vadd.f32 %v236_v63, %v4385_v4  ;;  %v238_v56 = vpop.f32.mrb[11].mxu0  ;;  %v4455_v47 = vadd.f32 %v305_v51, %v4398_v6  ;;  %v307_v13 = vpop.f32.mrb[9].mxu1  ;;  %v73_v51 = vsub.s32 4, %v4376_v9 }
  0xf1   :  { %6464 = vst [vmem:[#allocation46_spill] sm:$0xff] %v4446_v52  ;;  %v4452_v55 = vadd.f32 %v238_v56, %v4395_v59  ;;  %v4458_v3 = vadd.f32 %v307_v13, %v4392_v60  ;;  %v309_v40 = vpop.f32.mrb[10].mxu1  ;;  %v4473_v13 = vld [vmem:[%s6230_s4] ss:$0 sm:$0xff] }
  0xf2   :  { %6465 = vst [vmem:[#allocation47_spill] sm:$0xff] %v4449_v43  ;;  %6467 = vst [vmem:[#allocation49_spill] sm:$0xff] %v4455_v47  ;;  %v4461_v0 = vadd.f32 %v309_v40, %v4398_v6  ;;  %v311_v16 = vpop.f32.mrb[11].mxu1 }
  0xf3   :  { %6466 = vst [vmem:[#allocation48_spill] sm:$0xff] %v4452_v55  ;;  %6468 = vst [vmem:[#allocation50_spill] sm:$0xff] %v4458_v3  ;;  %v4464_v63 = vadd.f32 %v311_v16, %v4392_v60  ;;  %v3579_v16 = vpop.eup %3578 }
  0xf4   :  { %6469 = vst [vmem:[#allocation51_spill] sm:$0xff] %v4461_v0  ;;  %6472 = vst [vmem:[#allocation54_spill] sm:$0xff] %v4473_v13  ;;  %v77_v0 = vsub.s32 5, %v4376_v9 }
  0xf5   :  { %6470 = vst [vmem:[#allocation52_spill] sm:$0xff] %v4464_v63  ;;  %v242_v43 = vpop.f32.mrb[12].mxu0 }
  0xf6   :  { %v4467_v52 = vadd.f32 %v242_v43, %v4385_v4  ;;  %v244_v56 = vpop.f32.mrb[13].mxu0 }
  0xf7   :  { %v4476_v55 = vadd.f32 %v244_v56, %v4395_v59  ;;  %v246_v40 = vpop.f32.mrb[14].mxu0  ;;  %v286_v56 = vadd.f32 %v4403_v48, %v4398_v6 }
  0xf8   :  { %6471 = vst [vmem:[#allocation53_spill] sm:$0xff] %v4467_v52  ;;  %v4480_v47 = vadd.f32 %v246_v40, %v4385_v4  ;;  %v248_v43 = vpop.f32.mrb[15].mxu0  ;;  %v315_v52 = vpop.f32.mrb[12].mxu1  ;;  %v74_v40 = vrot.slane %v4382_v14, %v73_v51 }
  0xf9   :  { %6473 = vst [vmem:[#allocation55_spill] sm:$0xff] %v4476_v55  ;;  %v3581_v44 = vpop.eup %3580  ;;  %v4483_v3 = vadd.f32 %v248_v43, %v4395_v59  ;;  %v4486_v17 = vadd.f32 %v315_v52, %v4398_v6  ;;  %v317_v63 = vpop.f32.mrb[13].mxu1  ;;  %v78_v52 = vrot.slane %v4382_v14, %v77_v0 }
  0xfa   :  { %6474 = vst [vmem:[#allocation56_spill] sm:$0xff] %v4480_v47  ;;  %v471_v55 = vmul.f32 %v3581_v44, %v4473_v13  ;;  %v4492_v9 = vadd.f32 %v317_v63, %v4392_v60  ;;  %v319_v4 = vpop.f32.mrb[14].mxu1  ;;  %v462_v47 = vadd.f32 1.0, %v3579_v16 }
  0xfb   :  { %6475 = vst [vmem:[#allocation57_spill] sm:$0xff] %v4483_v3  ;;  %6476 = vst [vmem:[#allocation58_spill] sm:$0xff] %v4486_v17  ;;  %v4496_v39 = vadd.f32 %v319_v4, %v4398_v6  ;;  %v321_v59 = vpop.f32.mrb[15].mxu1 }
  0xfc   :  { %v472_v43 = vadd.f32 %v471_v55, %v286_v56  ;;  %v322_v3 = vadd.f32 %v321_v59, %v4392_v60 }
  0xfd   :  { %6477 = vst [vmem:[#allocation59_spill] sm:$0xff] %v4496_v39  ;;  %v358_v17 = vpop.f32.mrb[16].mxu0 }
  0xfe   :  { %3582 = vtanh.f32 %v472_v43  ;;  %v3070_v48 = vmul.f32 -1.442695, %v322_v3  ;;  %v4500_v44 = vadd.f32 %v358_v17, %v74_v40  ;;  %v360_v63 = vpop.f32.mrb[17].mxu0 }
  0xff   :  { %3584 = vrcp.f32 %v462_v47  ;;  %v4502_v13 = vadd.f32 %v360_v63, %v78_v52  ;;  %v362_v51 = vpop.f32.mrb[18].mxu0 }
 0x100   :  { %6478 = vst [vmem:[#allocation60_spill] sm:$0xff] %v4500_v44  ;;  %3586 = vpow2.f32 %v3070_v48  ;;  %v4504_v16 = vadd.f32 %v362_v51, %v74_v40  ;;  %v364_v6 = vpop.f32.mrb[19].mxu0 }
 0x101   :  { %6479 = vst [vmem:[#allocation61_spill] sm:$0xff] %v4502_v13  ;;  %v4506_v4 = vadd.f32 %v364_v6, %v78_v52 }
 0x102   :  { %6480 = vst [vmem:[#allocation62_spill] sm:$0xff] %v4504_v16 }
 0x103   :  { %6481 = vst [vmem:[#allocation63_spill] sm:$0xff] %v4506_v4 }
 0x105   :  { %v368_v14 = vpop.f32.mrb[20].mxu0 }
 0x106   :  { %v4508_v55 = vadd.f32 %v368_v14, %v74_v40  ;;  %v370_v60 = vpop.f32.mrb[21].mxu0 }
 0x107   :  { %v4510_v0 = vadd.f32 %v370_v60, %v78_v52  ;;  %v372_v3 = vpop.f32.mrb[22].mxu0 }
 0x108   :  { %6482 = vst [vmem:[#allocation64_spill] sm:$0xff] %v4508_v55  ;;  %v3583_v17 = vpop.eup %3582  ;;  %v4512_v56 = vadd.f32 %v372_v3, %v74_v40  ;;  %v374_v47 = vpop.f32.mrb[23].mxu0 }
 0x109   :  { %6483 = vst [vmem:[#allocation65_spill] sm:$0xff] %v4510_v0  ;;  %v3585_v59 = vpop.eup %3584  ;;  %v474_v43 = vsub.f32 0.0, %v3583_v17  ;;  %v4514_v63 = vadd.f32 %v374_v47, %v78_v52 }
 0x10a   :  { %6484 = vst [vmem:[#allocation66_spill] sm:$0xff] %v4512_v56  ;;  %v3587_v48 = vpop.eup %3586 }
 0x10b   :  { %6485 = vst [vmem:[#allocation67_spill] sm:$0xff] %v4514_v63  ;;  %v475_v51 = vmul.f32 %v3585_v59, %v474_v43  ;;  %v480_v13 = vadd.f32 1.0, %v3587_v48  ;;  %v4529_v59 = vld [vmem:[%s6230_s4 + $0x1] ss:$0 sm:$0xff] }
 0x10d   :  { %v4516_v6 = vadd.f32 %v3583_v17, %v475_v51  ;;  %3588 = vrcp.f32 %v480_v13  ;;  %v378_v14 = vpop.f32.mrb[24].mxu0 }
 0x10e   :  { %v4518_v44 = vadd.f32 %v378_v14, %v74_v40  ;;  %v380_v60 = vpop.f32.mrb[25].mxu0 }
 0x10f   :  { %6486 = vst [vmem:[#allocation68_spill] sm:$0xff] %v4516_v6  ;;  %v4520_v39 = vadd.f32 %v380_v60, %v78_v52  ;;  %v382_v4 = vpop.f32.mrb[26].mxu0 }
 0x110   :  { %6487 = vst [vmem:[#allocation69_spill] sm:$0xff] %v4518_v44  ;;  %v4522_v3 = vadd.f32 %v382_v4, %v74_v40  ;;  %v384_v16 = vpop.f32.mrb[27].mxu0 }
 0x111   :  { %6488 = vst [vmem:[#allocation70_spill] sm:$0xff] %v4520_v39  ;;  %v4524_v0 = vadd.f32 %v384_v16, %v78_v52 }
 0x112   :  { %6489 = vst [vmem:[#allocation71_spill] sm:$0xff] %v4522_v3 }
 0x113   :  { %6490 = vst [vmem:[#allocation72_spill] sm:$0xff] %v4524_v0 }
 0x115   :  { %v388_v47 = vpop.f32.mrb[28].mxu0 }
 0x116   :  { %v4531_v17 = vadd.f32 %v388_v47, %v74_v40  ;;  %v390_v13 = vpop.f32.mrb[29].mxu0 }
 0x117   :  { %v3589_v43 = vpop.eup %3588  ;;  %v4533_v48 = vadd.f32 %v390_v13, %v78_v52  ;;  %v392_v51 = vpop.f32.mrb[30].mxu0  ;;  %v4672_v13 = vld [vmem:[%s6228_s2 + $0x1c0] ss:$24 sps:$4 sm:$0xff]  }
 0x118   :  { %6491 = vst [vmem:[#allocation73_spill] sm:$0xff] %v4531_v17  ;;  %v393_v14 = vadd.f32 %v392_v51, %v74_v40  ;;  %v394_v60 = vpop.f32.mrb[31].mxu0  ;;  %v495_v4 = vmul.f32 %v3589_v43, %v4529_v59  ;;  %v4678_v43 = vld [vmem:[%s6228_s2 + $0x1f4] ss:$24 sps:$4 sm:$0xff]   ;;  %v4686_v51 = vld [vmem:[%s6228_s2 + $0x1f0] ss:$24 sps:$4 sm:$0xff]  }
 0x119   :  { %v395_v55 = vadd.f32 %v394_v60, %v78_v52  ;;  %v4543_v52 = vld [vmem:[%s6228_s2 + $0x10] ss:$24 sps:$4 sm:$0xff]   ;;  %v4700_v60 = vld [vmem:[%s6228_s2 + $0x220] ss:$24 sps:$4 sm:$0xff]  }
 0x11a   :  { %v3071_v16 = vmul.f32 -1.442695, %v393_v14  ;;  %v4692_v14 = vld [vmem:[%s6228_s2 + $0x224] ss:$24 sps:$4 sm:$0xff]  }
 0x11b   :  { %v496_v63 = vadd.f32 %v495_v4, %v395_v55  ;;  %v4547_v55 = vpack.c.bf16 %v4516_v6, %v4516_v6  ;;  %v4706_v4 = vld [vmem:[%s6228_s2 + $0x254] ss:$24 sps:$4 sm:$0xff]  }
 0x11c   :  { %3590 = vpow2.f32 %v3071_v16  ;;  %6493 = vst [vmem:[#allocation75_spill] sm:$0xff] %v4706_v4  ;;  %v4714_v16 = vld [vmem:[%s6228_s2 + $0x250] ss:$24 sps:$4 sm:$0xff]  }
 0x11d   :  { %3592 = vtanh.f32 %v496_v63  ;;  %v4580_v63 = vld [vmem:[%s6228_s2 + $0xa4] ss:$24 sps:$4 sm:$0xff]   ;;  %6494 = vst [vmem:[#allocation76_spill] sm:$0xff] %v4714_v16 }
 0x126   :  { %v3591_v56 = vpop.eup %3590 }
 0x127   :  { %v486_v39 = vadd.f32 1.0, %v3591_v56  ;;  %v3593_v44 = vpop.eup %3592  ;;  %v4574_v56 = vld [vmem:[%s6228_s2 + $0x70] ss:$24 sps:$4 sm:$0xff]  }
 0x128   :  { %v498_v47 = vsub.f32 0.0, %v3593_v44 }
 0x129   :  { %3594 = vrcp.f32 %v486_v39  ;;  %v4552_v39 = vld [vmem:[%s6228_s2 + $0x44] ss:$24 sps:$4 sm:$0xff]  }
 0x133   :  { %v3595_v0 = vpop.eup %3594 }
 0x134   :  { %v499_v3 = vmul.f32 %v3595_v0, %v498_v47  ;;  %v4566_v0 = vld [vmem:[%s6228_s2 + $0x74] ss:$24 sps:$4 sm:$0xff]   ;;  %v4720_v47 = vld [vmem:[%s6228_s2 + $0x284] ss:$24 sps:$4 sm:$0xff]  }
 0x135   :  { %6495 = vst [vmem:[#allocation77_spill] sm:$0xff] %v4720_v47 }
 0x136   :  { %v4536_v17 = vadd.f32 %v3593_v44, %v499_v3  ;;  %v4560_v44 = vld [vmem:[%s6228_s2 + $0x40] ss:$24 sps:$4 sm:$0xff]   ;;  %v4664_v3 = vld [vmem:[%s6228_s2 + $0x1c4] ss:$24 sps:$4 sm:$0xff]  }
 0x138   :  { %6492 = vst [vmem:[#allocation74_spill] sm:$0xff] %v4536_v17  ;;  %v508_v40 = vpack.c.bf16 %v4536_v17, %v4536_v17 }
 0x13a   :  { %1117 = vmatprep.mubr.bf16.mxu1 %v508_v40  ;;  %1158 = vmatprep.mubr.bf16.mxu0 %v508_v40 }
 0x13b   :  { %1118 = vmatmul.mubr.bf16.vlgmr.msra.gmra.mrb[16].mxu1 %v4547_v55  ;;  %1159 = vmatmul.mubr.bf16.vlgmr.msra.gmra.mrb[32].mxu0 %v4547_v55 }
 0x13c   :  { %1168 = vmatpush1.bf16.msra.mxu1 %v4543_v52  ;;  %1199 = vmatprep.mubr.bf16.mxu1 %v508_v40  ;;  %v4728_v40 = vld [vmem:[%s6228_s2 + $0x280] ss:$24 sps:$4 sm:$0xff]  }
 0x13d   :  { %1169 = vmatprep.subr.bf16.mxu1 %v4552_v39  ;;  %1263 = vmatpush1.bf16.msra.mxu0 %v3992_v18  ;;  %v4588_v18 = vld [vmem:[%s6228_s2 + $0xa0] ss:$24 sps:$4 sm:$0xff]   ;;  %6496 = vst [vmem:[#allocation78_spill] sm:$0xff] %v4728_v40 }
 0x13e   :  { %1264 = vmatprep.subr.bf16.mxu0 %v4010_v21  ;;  %v4594_v21 = vld [vmem:[%s6228_s2 + $0xd4] ss:$24 sps:$4 sm:$0xff]  }
 0x140   :  { %1170 = vmatpush1.bf16.msra.mxu1 %v4560_v44 }
 0x141   :  { %1171 = vmatprep.subr.bf16.mxu1 %v4566_v0  ;;  %1265 = vmatpush1.bf16.msra.mxu0 %v4016_v22  ;;  %v4602_v22 = vld [vmem:[%s6228_s2 + $0xd0] ss:$24 sps:$4 sm:$0xff]  }
 0x142   :  { %1266 = vmatprep.subr.bf16.mxu0 %v4034_v25  ;;  %v4608_v25 = vld [vmem:[%s6228_s2 + $0x104] ss:$24 sps:$4 sm:$0xff]  }
 0x144   :  { %1172 = vmatpush1.bf16.msra.mxu1 %v4574_v56 }
 0x145   :  { %1173 = vmatprep.subr.bf16.mxu1 %v4580_v63  ;;  %1267 = vmatpush1.bf16.msra.mxu0 %v4040_v26  ;;  %v4616_v26 = vld [vmem:[%s6228_s2 + $0x100] ss:$24 sps:$4 sm:$0xff]  }
 0x146   :  { %1268 = vmatprep.subr.bf16.mxu0 %v4058_v29  ;;  %v4622_v29 = vld [vmem:[%s6228_s2 + $0x134] ss:$24 sps:$4 sm:$0xff]  }
 0x148   :  { %1174 = vmatpush1.bf16.msra.mxu1 %v4588_v18 }
 0x149   :  { %1175 = vmatprep.subr.bf16.mxu1 %v4594_v21  ;;  %1269 = vmatpush1.bf16.msra.mxu0 %v4064_v30  ;;  %v4630_v30 = vld [vmem:[%s6228_s2 + $0x130] ss:$24 sps:$4 sm:$0xff]  }
 0x14a   :  { %1270 = vmatprep.subr.bf16.mxu0 %v4082_v33  ;;  %v4636_v33 = vld [vmem:[%s6228_s2 + $0x164] ss:$24 sps:$4 sm:$0xff]  }
 0x14c   :  { %1176 = vmatpush1.bf16.msra.mxu1 %v4602_v22 }
 0x14d   :  { %1177 = vmatprep.subr.bf16.mxu1 %v4608_v25  ;;  %1271 = vmatpush1.bf16.msra.mxu0 %v4088_v34  ;;  %v4644_v34 = vld [vmem:[%s6228_s2 + $0x160] ss:$24 sps:$4 sm:$0xff]  }
 0x14e   :  { %1272 = vmatprep.subr.bf16.mxu0 %v4106_v37  ;;  %v4650_v37 = vld [vmem:[%s6228_s2 + $0x194] ss:$24 sps:$4 sm:$0xff]  }
 0x150   :  { %1178 = vmatpush1.bf16.msra.mxu1 %v4616_v26 }
 0x151   :  { %1179 = vmatprep.subr.bf16.mxu1 %v4622_v29  ;;  %1273 = vmatpush1.bf16.msra.mxu0 %v4112_v38  ;;  %v4658_v38 = vld [vmem:[%s6228_s2 + $0x190] ss:$24 sps:$4 sm:$0xff]  }
 0x152   :  { %1274 = vmatprep.subr.bf16.mxu0 %v4130_v41 }
 0x154   :  { %1180 = vmatpush1.bf16.msra.mxu1 %v4630_v30 }
 0x155   :  { %1181 = vmatprep.subr.bf16.mxu1 %v4636_v33  ;;  %1275 = vmatpush1.bf16.msra.mxu0 %v4136_v42 }
 0x156   :  { %1276 = vmatprep.subr.bf16.mxu0 %v4154_v45 }
 0x158   :  { %1182 = vmatpush1.bf16.msra.mxu1 %v4644_v34 }
 0x159   :  { %1183 = vmatprep.subr.bf16.mxu1 %v4650_v37  ;;  %1277 = vmatpush1.bf16.msra.mxu0 %v4160_v46 }
 0x15a   :  { %1278 = vmatprep.subr.bf16.mxu0 %v4178_v49 }
 0x15c   :  { %1184 = vmatpush1.bf16.msra.mxu1 %v4658_v38 }
 0x15d   :  { %1185 = vmatprep.subr.bf16.mxu1 %v4664_v3  ;;  %1279 = vmatpush1.bf16.msra.mxu0 %v4184_v50 }
 0x15e   :  { %1280 = vmatprep.subr.bf16.mxu0 %v4202_v53 }
 0x160   :  { %1186 = vmatpush1.bf16.msra.mxu1 %v4672_v13 }
 0x161   :  { %1187 = vmatprep.subr.bf16.mxu1 %v4678_v43  ;;  %1281 = vmatpush1.bf16.msra.mxu0 %v4208_v54 }
 0x162   :  { %1282 = vmatprep.subr.bf16.mxu0 %v4226_v57 }
 0x164   :  { %1188 = vmatpush1.bf16.msra.mxu1 %v4686_v51 }
 0x165   :  { %1189 = vmatprep.subr.bf16.mxu1 %v4692_v14  ;;  %1283 = vmatpush1.bf16.msra.mxu0 %v4232_v58 }
 0x166   :  { %1284 = vmatprep.subr.bf16.mxu0 %v4250_v61 }
 0x168   :  { %1190 = vmatpush1.bf16.msra.mxu1 %v4700_v60 }
 0x169   :  { %1191 = vmatprep.subr.bf16.mxu1 %v4706_v4  ;;  %1285 = vmatpush1.bf16.msra.mxu0 %v4256_v62  ;;  %v4734_v4 = vld [vmem:[%s6228_s2 + $0x2b4] ss:$24 sps:$4 sm:$0xff]  }
 0x16a   :  { %1286 = vmatprep.subr.bf16.mxu0 %v4274_v1  ;;  %6497 = vst [vmem:[#allocation79_spill] sm:$0xff] %v4734_v4 }
 0x16c   :  { %1192 = vmatpush1.bf16.msra.mxu1 %v4714_v16  ;;  %v4742_v16 = vld [vmem:[%s6228_s2 + $0x2b0] ss:$24 sps:$4 sm:$0xff]  }
 0x16d   :  { %1193 = vmatprep.subr.bf16.mxu1 %v4720_v47  ;;  %1287 = vmatpush1.bf16.msra.mxu0 %v4280_v2  ;;  %6498 = vst [vmem:[#allocation80_spill] sm:$0xff] %v4742_v16  ;;  %v4748_v47 = vld [vmem:[%s6228_s2 + $0x2e4] ss:$24 sps:$4 sm:$0xff]  }
 0x16e   :  { %1288 = vmatprep.subr.bf16.mxu0 %v4296_v5  ;;  %6499 = vst [vmem:[#allocation81_spill] sm:$0xff] %v4748_v47 }
 0x170   :  { %1194 = vmatpush1.bf16.msra.mxu1 %v4728_v40  ;;  %v4756_v40 = vld [vmem:[%s6228_s2 + $0x2e0] ss:$24 sps:$4 sm:$0xff]  }
 0x171   :  { %1195 = vmatprep.subr.bf16.mxu1 %v4734_v4  ;;  %1289 = vmatpush1.bf16.msra.mxu0 %v4308_v7  ;;  %6500 = vst [vmem:[#allocation82_spill] sm:$0xff] %v4756_v40  ;;  %v6527_v4 = vld [vmem:[#allocation35_spill] sm:$0xff] }
 0x172   :  { %1290 = vmatprep.subr.bf16.mxu0 %v4314_v8  ;;  %v6526_v8 = vld [vmem:[#allocation54_spill] sm:$0xff] }
 0x174   :  { %1196 = vmatpush1.bf16.msra.mxu1 %v4742_v16 }
 0x175   :  { %1197 = vmatprep.subr.bf16.mxu1 %v4748_v47  ;;  %1291 = vmatpush1.bf16.msra.mxu0 %v4332_v11 }
 0x176   :  { %1292 = vmatprep.subr.bf16.mxu0 %v4338_v12 }
 0x178   :  { %1198 = vmatpush1.bf16.msra.mxu1 %v4756_v40 }
 0x179   :  { %1303 = vmatprep.subr.bf16.mxu1 %v3998_v19  ;;  %1293 = vmatpush1.bf16.msra.mxu0 %v4356_v15  ;;  %v6501_v19 = vld [vmem:[#allocation3_spill] sm:$0xff] }
 0x17a   :  { %1344 = vmatprep.subr.bf16.mxu0 %v4370_v10 }
 0x17b   :  { %1200 = vmatmul.mubr.bf16.vlgmr.msra.gmra.mrb[20].mxu1 %v4547_v55  ;;  %v6502_v55 = vld [vmem:[#allocation4_spill] sm:$0xff] }
 0x17c   :  { %1304 = vmatpush1.bf16.msra.mxu1 %v4003_v20  ;;  %v6503_v20 = vld [vmem:[#allocation5_spill] sm:$0xff] }
 0x17d   :  { %1305 = vmatprep.subr.bf16.mxu1 %v4021_v23  ;;  %v6504_v23 = vld [vmem:[#allocation6_spill] sm:$0xff] }
 0x180   :  { %1306 = vmatpush1.bf16.msra.mxu1 %v4027_v24  ;;  %v6505_v24 = vld [vmem:[#allocation7_spill] sm:$0xff] }
 0x181   :  { %1307 = vmatprep.subr.bf16.mxu1 %v4045_v27  ;;  %v6506_v27 = vld [vmem:[#allocation8_spill] sm:$0xff] }
 0x184   :  { %1308 = vmatpush1.bf16.msra.mxu1 %v4051_v28  ;;  %v6507_v28 = vld [vmem:[#allocation9_spill] sm:$0xff] }
 0x185   :  { %1309 = vmatprep.subr.bf16.mxu1 %v4069_v31  ;;  %v6508_v31 = vld [vmem:[#allocation10_spill] sm:$0xff] }
 0x188   :  { %1310 = vmatpush1.bf16.msra.mxu1 %v4075_v32  ;;  %v6509_v32 = vld [vmem:[#allocation11_spill] sm:$0xff] }
 0x189   :  { %1311 = vmatprep.subr.bf16.mxu1 %v4093_v35  ;;  %v6510_v35 = vld [vmem:[#allocation12_spill] sm:$0xff] }
 0x18c   :  { %1312 = vmatpush1.bf16.msra.mxu1 %v4099_v36  ;;  %v6511_v36 = vld [vmem:[#allocation13_spill] sm:$0xff] }
 0x18d   :  { %1313 = vmatprep.subr.bf16.mxu1 %v6501_v19  ;;  %v6512_v19 = vld [vmem:[#allocation14_spill] sm:$0xff] }
 0x190   :  { %1314 = vmatpush1.bf16.msra.mxu1 %v6502_v55  ;;  %v6513_v55 = vld [vmem:[#allocation15_spill] sm:$0xff] }
 0x191   :  { %1315 = vmatprep.subr.bf16.mxu1 %v6503_v20  ;;  %v6514_v20 = vld [vmem:[#allocation16_spill] sm:$0xff] }
 0x194   :  { %1316 = vmatpush1.bf16.msra.mxu1 %v6504_v23  ;;  %v6515_v23 = vld [vmem:[#allocation17_spill] sm:$0xff] }
 0x195   :  { %1317 = vmatprep.subr.bf16.mxu1 %v6505_v24  ;;  %v6516_v24 = vld [vmem:[#allocation18_spill] sm:$0xff] }
 0x198   :  { %1318 = vmatpush1.bf16.msra.mxu1 %v6506_v27  ;;  %v6517_v27 = vld [vmem:[#allocation19_spill] sm:$0xff] }
 0x199   :  { %1319 = vmatprep.subr.bf16.mxu1 %v6507_v28  ;;  %v6518_v28 = vld [vmem:[#allocation22_spill] sm:$0xff] }
 0x19c   :  { %1320 = vmatpush1.bf16.msra.mxu1 %v6508_v31  ;;  %v6519_v31 = vld [vmem:[#allocation23_spill] sm:$0xff] }
 0x19d   :  { %1321 = vmatprep.subr.bf16.mxu1 %v6509_v32  ;;  %v6520_v32 = vld [vmem:[#allocation26_spill] sm:$0xff] }
 0x1a0   :  { %1322 = vmatpush1.bf16.msra.mxu1 %v6510_v35  ;;  %v6521_v35 = vld [vmem:[#allocation27_spill] sm:$0xff] }
 0x1a1   :  { %1323 = vmatprep.subr.bf16.mxu1 %v6511_v36  ;;  %v6522_v36 = vld [vmem:[#allocation29_spill] sm:$0xff] }
 0x1a4   :  { %1324 = vmatpush1.bf16.msra.mxu1 %v6512_v19 }
 0x1a5   :  { %1325 = vmatprep.subr.bf16.mxu1 %v6513_v55 }
 0x1a8   :  { %1326 = vmatpush1.bf16.msra.mxu1 %v6514_v20  ;;  %v4800_v20 = vld [vmem:[%s6228_s2 + $0x4] ss:$24 sps:$4 sm:$0xff]  }
 0x1a9   :  { %1327 = vmatprep.subr.bf16.mxu1 %v6515_v23  ;;  %6523 = vst [vmem:[#allocation3_spill] sm:$0xff] %v4800_v20 }
 0x1ac   :  { %1328 = vmatpush1.bf16.msra.mxu1 %v6516_v24 }
 0x1ad   :  { %1329 = vmatprep.subr.bf16.mxu1 %v6517_v27  ;;  %v6524_v27 = vld [vmem:[#allocation32_spill] sm:$0xff] }
 0x1b0   :  { %1330 = vmatpush1.bf16.msra.mxu1 %v6518_v28 }
 0x1b1   :  { %1331 = vmatprep.subr.bf16.mxu1 %v6519_v31  ;;  %v6525_v31 = vld [vmem:[#allocation33_spill] sm:$0xff] }
 0x1b4   :  { %1332 = vmatpush1.bf16.msra.mxu1 %v6520_v32 }
 0x1b5   :  { %1333 = vmatprep.subr.bf16.mxu1 %v6521_v35 }
 0x1b8   :  { %1334 = vmatpush1.bf16.msra.mxu1 %v6522_v36 }
 0x1b9   :  { %1439 = vmatprep.subr.bf16.mxu1 %v4800_v20 }
 0x20e   :  { %v1119_v24 = vpop.f32.mrb[16].mxu1  ;;  %v1160_v23 = vpop.f32.mrb[32].mxu0 }
 0x20f   :  { %v1210_v55 = vadd.f32 %v1119_v24, %v6524_v27  ;;  %v1121_v28 = vpop.f32.mrb[17].mxu1  ;;  %v1162_v19 = vpop.f32.mrb[33].mxu0  ;;  %v1208_v24 = vadd.f32 %v6526_v8, %v1160_v23 }
 0x210   :  { %v1217_v10 = vadd.f32 %v1121_v28, %v6525_v31  ;;  %v1230_v32 = vadd.f32 %v1162_v19, %v4492_v9  ;;  %v1123_v35 = vpop.f32.mrb[18].mxu1  ;;  %v1164_v15 = vpop.f32.mrb[34].mxu0 }
 0x211   :  { %v3169_v36 = vmul.f32 -1.442695, %v1210_v55  ;;  %v1124_v40 = vpop.f32.mrb[19].mxu1  ;;  %v1165_v12 = vpop.f32.mrb[35].mxu0 }
 0x212   :  { %v3170_v11 = vmul.f32 -1.442695, %v1217_v10  ;;  %v3171_v9 = vmul.f32 -1.442695, %v1230_v32 }
 0x213   :  { %3596 = vpow2.f32 %v3169_v36  ;;  %v6529_v36 = vld [vmem:[#allocation73_spill] sm:$0xff] }
 0x214   :  { %3598 = vpow2.f32 %v3170_v11 }
 0x21d   :  { %v3597_v47 = vpop.eup %3596 }
 0x21e   :  { %v1214_v16 = vadd.f32 1.0, %v3597_v47  ;;  %v3599_v20 = vpop.eup %3598 }
 0x21f   :  { %v1221_v31 = vadd.f32 1.0, %v3599_v20 }
 0x220   :  { %3600 = vrcp.f32 %v1214_v16 }
 0x22a   :  { %v3601_v27 = vpop.eup %3600 }
 0x22b   :  { %v1224_v7 = vmul.f32 %v3601_v27, %v1208_v24 }
 0x22d   :  { %v1225_v28 = vadd.f32 %v1224_v7, %v6527_v4 }
 0x22f   :  { %3602 = vtanh.f32 %v1225_v28 }
 0x230   :  { %3604 = vrcp.f32 %v1221_v31 }
 0x231   :  { %3606 = vpow2.f32 %v3171_v9 }
 0x239   :  { %v3603_v15 = vpop.eup %3602 }
 0x23a   :  { %v1227_v12 = vsub.f32 %v4516_v6, %v3603_v15  ;;  %v3605_v10 = vpop.eup %3604  ;;  %v5049_v6 = vld [vmem:[%s6228_s2 + $0x188] ss:$24 sps:$4 sm:$0xff]  }
 0x23b   :  { %v3607_v11 = vpop.eup %3606 }
 0x23c   :  { %v1228_v40 = vmul.f32 %v3605_v10, %v1227_v12  ;;  %v1234_v16 = vadd.f32 1.0, %v3607_v11 }
 0x23e   :  { %v4809_v47 = vadd.f32 %v3603_v15, %v1228_v40  ;;  %3608 = vrcp.f32 %v1234_v16 }
 0x240   :  { %6528 = vst [vmem:[#allocation4_spill] sm:$0xff] %v4809_v47  ;;  %v4821_v16 = vpack.c.bf16 %v4809_v47, %v4809_v47 }
 0x248   :  { %v3609_v20 = vpop.eup %3608 }
 0x24e   :  { %v1201_v35 = vpop.f32.mrb[20].mxu1 }
 0x24f   :  { %v1237_v19 = vadd.f32 %v1201_v35, %v6529_v36  ;;  %v1203_v55 = vpop.f32.mrb[21].mxu1  ;;  %v4836_v35 = vld [vmem:[%s6228_s2 + $0x34] ss:$24 sps:$4 sm:$0xff]   ;;  %v4844_v36 = vld [vmem:[%s6228_s2 + $0x30] ss:$24 sps:$4 sm:$0xff]  }
 0x250   :  { %v1209_v7 = vadd.f32 %v4529_v59, %v1203_v55  ;;  %v1205_v4 = vpop.f32.mrb[22].mxu1  ;;  %v4858_v55 = vld [vmem:[%s6228_s2 + $0x60] ss:$24 sps:$4 sm:$0xff]  }
 0x251   :  { %v3172_v23 = vmul.f32 -1.442695, %v1237_v19  ;;  %v1206_v32 = vpop.f32.mrb[23].mxu1  ;;  %v4850_v19 = vld [vmem:[%s6228_s2 + $0x64] ss:$24 sps:$4 sm:$0xff]  }
 0x252   :  { %v1244_v24 = vmul.f32 %v3609_v20, %v1209_v7  ;;  %v4864_v7 = vld [vmem:[%s6228_s2 + $0x94] ss:$24 sps:$4 sm:$0xff]   ;;  %v4872_v4 = vld [vmem:[%s6228_s2 + $0x90] ss:$24 sps:$4 sm:$0xff]   ;;  %v4878_v20 = vld [vmem:[%s6228_s2 + $0xc4] ss:$24 sps:$4 sm:$0xff]  }
 0x253   :  { %3610 = vpow2.f32 %v3172_v23  ;;  %v4886_v23 = vld [vmem:[%s6228_s2 + $0xc0] ss:$24 sps:$4 sm:$0xff]   ;;  %v4892_v32 = vld [vmem:[%s6228_s2 + $0xf4] ss:$24 sps:$4 sm:$0xff]  }
 0x254   :  { %v1245_v27 = vadd.f32 %v1244_v24, %v4533_v48  ;;  %v4830_v48 = vld [vmem:[%s6228_s2] ss:$24 sps:$4 sm:$0xff]   ;;  %v4900_v24 = vld [vmem:[%s6228_s2 + $0xf0] ss:$24 sps:$4 sm:$0xff]  }
 0x256   :  { %3612 = vtanh.f32 %v1245_v27  ;;  %v4953_v27 = vld [vmem:[%s6228_s2 + $0x8] ss:$24 sps:$4 sm:$0xff]  }
 0x257   :  { %6546 = vst [vmem:[#allocation7_spill] sm:$0xff] %v4953_v27 }
 0x25d   :  { %v3611_v28 = vpop.eup %3610 }
 0x25e   :  { %v1241_v31 = vadd.f32 1.0, %v3611_v28  ;;  %v4959_v28 = vld [vmem:[%s6228_s2 + $0x3c] ss:$24 sps:$4 sm:$0xff]  }
 0x25f   :  { %6547 = vst [vmem:[#allocation8_spill] sm:$0xff] %v4959_v28 }
 0x260   :  { %3614 = vrcp.f32 %v1241_v31  ;;  %v3613_v9 = vpop.eup %3612  ;;  %v4965_v31 = vld [vmem:[%s6228_s2 + $0x38] ss:$24 sps:$4 sm:$0xff]  }
 0x261   :  { %v1247_v15 = vsub.f32 %v4536_v17, %v3613_v9  ;;  %6548 = vst [vmem:[#allocation9_spill] sm:$0xff] %v4965_v31  ;;  %v5043_v17 = vld [vmem:[%s6228_s2 + $0x18c] ss:$24 sps:$4 sm:$0xff]  }
 0x26a   :  { %v3615_v12 = vpop.eup %3614 }
 0x26b   :  { %v1248_v10 = vmul.f32 %v3615_v12, %v1247_v15  ;;  %v4977_v15 = vld [vmem:[%s6228_s2 + $0x68] ss:$24 sps:$4 sm:$0xff]   ;;  %v4983_v12 = vld [vmem:[%s6228_s2 + $0x9c] ss:$24 sps:$4 sm:$0xff]  }
 0x26c   :  { %6550 = vst [vmem:[#allocation11_spill] sm:$0xff] %v4977_v15  ;;  %6551 = vst [vmem:[#allocation32_spill] sm:$0xff] %v4983_v12 }
 0x26d   :  { %v4815_v40 = vadd.f32 %v3613_v9, %v1248_v10  ;;  %v4971_v9 = vld [vmem:[%s6228_s2 + $0x6c] ss:$24 sps:$4 sm:$0xff]   ;;  %v4989_v10 = vld [vmem:[%s6228_s2 + $0x98] ss:$24 sps:$4 sm:$0xff]  }
 0x26e   :  { %6549 = vst [vmem:[#allocation10_spill] sm:$0xff] %v4971_v9  ;;  %6552 = vst [vmem:[#allocation33_spill] sm:$0xff] %v4989_v10 }
 0x26f   :  { %6530 = vst [vmem:[#allocation5_spill] sm:$0xff] %v4815_v40  ;;  %v1261_v11 = vpack.c.bf16 %v4815_v40, %v4815_v40 }
 0x271   :  { %1294 = vmatprep.mubr.bf16.mxu0 %v1261_v11  ;;  %1335 = vmatprep.mubr.bf16.mxu1 %v1261_v11 }
 0x272   :  { %1295 = vmatmul.mubr.bf16.vlgmr.msra.gmra.mrb[36].mxu0 %v4821_v16  ;;  %1336 = vmatmul.mubr.bf16.vlgmr.msra.gmra.mrb[24].mxu1 %v4821_v16 }
 0x273   :  { %1345 = vmatpush1.bf16.msra.mxu0 %v4543_v52  ;;  %1376 = vmatprep.mubr.bf16.mxu0 %v1261_v11  ;;  %v4995_v11 = vld [vmem:[%s6228_s2 + $0xcc] ss:$24 sps:$4 sm:$0xff]  }
 0x274   :  { %1346 = vmatprep.subr.bf16.mxu0 %v4552_v39  ;;  %1440 = vmatpush1.bf16.msra.mxu1 %v4830_v48  ;;  %6553 = vst [vmem:[#allocation54_spill] sm:$0xff] %v4995_v11 }
 0x275   :  { %1441 = vmatprep.subr.bf16.mxu1 %v4836_v35 }
 0x277   :  { %1347 = vmatpush1.bf16.msra.mxu0 %v4560_v44 }
 0x278   :  { %1348 = vmatprep.subr.bf16.mxu0 %v4566_v0  ;;  %1442 = vmatpush1.bf16.msra.mxu1 %v4844_v36 }
 0x279   :  { %1443 = vmatprep.subr.bf16.mxu1 %v4850_v19 }
 0x27b   :  { %1349 = vmatpush1.bf16.msra.mxu0 %v4574_v56 }
 0x27c   :  { %1350 = vmatprep.subr.bf16.mxu0 %v4580_v63  ;;  %1444 = vmatpush1.bf16.msra.mxu1 %v4858_v55 }
 0x27d   :  { %1445 = vmatprep.subr.bf16.mxu1 %v4864_v7 }
 0x27f   :  { %1351 = vmatpush1.bf16.msra.mxu0 %v4588_v18 }
 0x280   :  { %1352 = vmatprep.subr.bf16.mxu0 %v4594_v21  ;;  %1446 = vmatpush1.bf16.msra.mxu1 %v4872_v4 }
 0x281   :  { %1447 = vmatprep.subr.bf16.mxu1 %v4878_v20 }
 0x283   :  { %1353 = vmatpush1.bf16.msra.mxu0 %v4602_v22 }
 0x284   :  { %1354 = vmatprep.subr.bf16.mxu0 %v4608_v25  ;;  %1448 = vmatpush1.bf16.msra.mxu1 %v4886_v23 }
 0x285   :  { %1449 = vmatprep.subr.bf16.mxu1 %v4892_v32 }
 0x287   :  { %1355 = vmatpush1.bf16.msra.mxu0 %v4616_v26 }
 0x288   :  { %1356 = vmatprep.subr.bf16.mxu0 %v4622_v29  ;;  %1450 = vmatpush1.bf16.msra.mxu1 %v4900_v24 }
 0x289   :  { %1451 = vmatprep.subr.bf16.mxu1 %v4130_v41  ;;  %v6531_v41 = vld [vmem:[#allocation75_spill] sm:$0xff] }
 0x28b   :  { %1357 = vmatpush1.bf16.msra.mxu0 %v4630_v30 }
 0x28c   :  { %1358 = vmatprep.subr.bf16.mxu0 %v4636_v33  ;;  %1452 = vmatpush1.bf16.msra.mxu1 %v4136_v42  ;;  %v6532_v42 = vld [vmem:[#allocation76_spill] sm:$0xff] }
 0x28d   :  { %1453 = vmatprep.subr.bf16.mxu1 %v4154_v45  ;;  %v6533_v45 = vld [vmem:[#allocation77_spill] sm:$0xff] }
 0x28f   :  { %1359 = vmatpush1.bf16.msra.mxu0 %v4644_v34 }
 0x290   :  { %1360 = vmatprep.subr.bf16.mxu0 %v4650_v37  ;;  %1454 = vmatpush1.bf16.msra.mxu1 %v4160_v46  ;;  %v6534_v46 = vld [vmem:[#allocation78_spill] sm:$0xff] }
 0x291   :  { %1455 = vmatprep.subr.bf16.mxu1 %v4178_v49  ;;  %v6535_v49 = vld [vmem:[#allocation79_spill] sm:$0xff] }
 0x293   :  { %1361 = vmatpush1.bf16.msra.mxu0 %v4658_v38 }
 0x294   :  { %1362 = vmatprep.subr.bf16.mxu0 %v4664_v3  ;;  %1456 = vmatpush1.bf16.msra.mxu1 %v4184_v50  ;;  %v6536_v50 = vld [vmem:[#allocation20_spill] sm:$0xff] }
 0x295   :  { %1457 = vmatprep.subr.bf16.mxu1 %v4202_v53  ;;  %v6537_v53 = vld [vmem:[#allocation21_spill] sm:$0xff] }
 0x297   :  { %1363 = vmatpush1.bf16.msra.mxu0 %v4672_v13 }
 0x298   :  { %1364 = vmatprep.subr.bf16.mxu0 %v4678_v43  ;;  %1458 = vmatpush1.bf16.msra.mxu1 %v4208_v54  ;;  %v6538_v54 = vld [vmem:[#allocation80_spill] sm:$0xff] }
 0x299   :  { %1459 = vmatprep.subr.bf16.mxu1 %v4226_v57  ;;  %v6539_v57 = vld [vmem:[#allocation81_spill] sm:$0xff] }
 0x29b   :  { %1365 = vmatpush1.bf16.msra.mxu0 %v4686_v51 }
 0x29c   :  { %1366 = vmatprep.subr.bf16.mxu0 %v4692_v14  ;;  %1460 = vmatpush1.bf16.msra.mxu1 %v4232_v58  ;;  %v6540_v58 = vld [vmem:[#allocation24_spill] sm:$0xff] }
 0x29d   :  { %1461 = vmatprep.subr.bf16.mxu1 %v4250_v61  ;;  %v6541_v61 = vld [vmem:[#allocation25_spill] sm:$0xff] }
 0x29f   :  { %1367 = vmatpush1.bf16.msra.mxu0 %v4700_v60 }
 0x2a0   :  { %1368 = vmatprep.subr.bf16.mxu0 %v6531_v41  ;;  %1462 = vmatpush1.bf16.msra.mxu1 %v4256_v62  ;;  %v6542_v62 = vld [vmem:[#allocation82_spill] sm:$0xff] }
 0x2a1   :  { %1463 = vmatprep.subr.bf16.mxu1 %v4274_v1  ;;  %v4944_v1 = vld [vmem:[%s6228_s2 + $0xc] ss:$24 sps:$4 sm:$0xff]  }
 0x2a2   :  { %6543 = vst [vmem:[#allocation6_spill] sm:$0xff] %v4944_v1 }
 0x2a3   :  { %1369 = vmatpush1.bf16.msra.mxu0 %v6532_v42 }
 0x2a4   :  { %1370 = vmatprep.subr.bf16.mxu0 %v6533_v45  ;;  %1464 = vmatpush1.bf16.msra.mxu1 %v4280_v2  ;;  %v6544_v2 = vld [vmem:[#allocation28_spill] sm:$0xff] }
 0x2a5   :  { %1465 = vmatprep.subr.bf16.mxu1 %v4296_v5  ;;  %v6545_v5 = vld [vmem:[#allocation30_spill] sm:$0xff]  ;;  %6561 = vst [vmem:[#allocation28_spill] sm:$0xff] %v5043_v17 }
 0x2a6   :  { %6562 = vst [vmem:[#allocation30_spill] sm:$0xff] %v5049_v6 }
 0x2a7   :  { %1371 = vmatpush1.bf16.msra.mxu0 %v6534_v46 }
 0x2a8   :  { %1372 = vmatprep.subr.bf16.mxu0 %v6535_v49  ;;  %1466 = vmatpush1.bf16.msra.mxu1 %v6536_v50  ;;  %v5007_v50 = vld [vmem:[%s6228_s2 + $0xfc] ss:$24 sps:$4 sm:$0xff]  }
 0x2a9   :  { %1467 = vmatprep.subr.bf16.mxu1 %v6537_v53  ;;  %6555 = vst [vmem:[#allocation73_spill] sm:$0xff] %v5007_v50  ;;  %v5013_v53 = vld [vmem:[%s6228_s2 + $0xf8] ss:$24 sps:$4 sm:$0xff]  }
 0x2aa   :  { %6556 = vst [vmem:[#allocation75_spill] sm:$0xff] %v5013_v53 }
 0x2ab   :  { %1373 = vmatpush1.bf16.msra.mxu0 %v6538_v54  ;;  %v6581_v54 = vld [vmem:[#allocation41_spill] sm:$0xff] }
 0x2ac   :  { %1374 = vmatprep.subr.bf16.mxu0 %v6539_v57  ;;  %1468 = vmatpush1.bf16.msra.mxu1 %v6540_v58  ;;  %v5019_v58 = vld [vmem:[%s6228_s2 + $0x12c] ss:$24 sps:$4 sm:$0xff]  }
 0x2ad   :  { %1469 = vmatprep.subr.bf16.mxu1 %v6541_v61  ;;  %6557 = vst [vmem:[#allocation20_spill] sm:$0xff] %v5019_v58  ;;  %v5025_v61 = vld [vmem:[%s6228_s2 + $0x128] ss:$24 sps:$4 sm:$0xff]  }
 0x2ae   :  { %6558 = vst [vmem:[#allocation21_spill] sm:$0xff] %v5025_v61 }
 0x2af   :  { %1375 = vmatpush1.bf16.msra.mxu0 %v6542_v62 }
 0x2b0   :  { %1480 = vmatprep.subr.bf16.mxu0 %v4944_v1  ;;  %1470 = vmatpush1.bf16.msra.mxu1 %v6544_v2  ;;  %v5031_v2 = vld [vmem:[%s6228_s2 + $0x15c] ss:$24 sps:$4 sm:$0xff]  }
 0x2b1   :  { %1521 = vmatprep.subr.bf16.mxu1 %v6545_v5  ;;  %6559 = vst [vmem:[#allocation24_spill] sm:$0xff] %v5031_v2  ;;  %v5037_v5 = vld [vmem:[%s6228_s2 + $0x158] ss:$24 sps:$4 sm:$0xff]  }
 0x2b2   :  { %1377 = vmatmul.mubr.bf16.vlgmr.msra.gmra.mrb[40].mxu0 %v4821_v16  ;;  %v5001_v16 = vld [vmem:[%s6228_s2 + $0xc8] ss:$24 sps:$4 sm:$0xff]   ;;  %6560 = vst [vmem:[#allocation25_spill] sm:$0xff] %v5037_v5 }
 0x2b3   :  { %1481 = vmatpush1.bf16.msra.mxu0 %v4953_v27  ;;  %6554 = vst [vmem:[#allocation35_spill] sm:$0xff] %v5001_v16 }
 0x2b4   :  { %1482 = vmatprep.subr.bf16.mxu0 %v4959_v28 }
 0x2b7   :  { %1483 = vmatpush1.bf16.msra.mxu0 %v4965_v31  ;;  %v6580_v31 = vld [vmem:[#allocation52_spill] sm:$0xff] }
 0x2b8   :  { %1484 = vmatprep.subr.bf16.mxu0 %v4971_v9  ;;  %v6579_v9 = vld [vmem:[#allocation38_spill] sm:$0xff] }
 0x2bb   :  { %1485 = vmatpush1.bf16.msra.mxu0 %v4977_v15 }
 0x2bc   :  { %1486 = vmatprep.subr.bf16.mxu0 %v4983_v12  ;;  %v6578_v12 = vld [vmem:[#allocation37_spill] sm:$0xff] }
 0x2bf   :  { %1487 = vmatpush1.bf16.msra.mxu0 %v4989_v10  ;;  %v6573_v10 = vld [vmem:[#allocation23_spill] sm:$0xff] }
 0x2c0   :  { %1488 = vmatprep.subr.bf16.mxu0 %v4995_v11  ;;  %v6572_v11 = vld [vmem:[#allocation22_spill] sm:$0xff] }
 0x2c3   :  { %1489 = vmatpush1.bf16.msra.mxu0 %v5001_v16  ;;  %v6571_v16 = vld [vmem:[#allocation19_spill] sm:$0xff] }
 0x2c4   :  { %1490 = vmatprep.subr.bf16.mxu0 %v5007_v50  ;;  %v6569_v50 = vld [vmem:[#allocation17_spill] sm:$0xff] }
 0x2c7   :  { %1491 = vmatpush1.bf16.msra.mxu0 %v5013_v53  ;;  %v6568_v53 = vld [vmem:[#allocation16_spill] sm:$0xff] }
 0x2c8   :  { %1492 = vmatprep.subr.bf16.mxu0 %v5019_v58  ;;  %v6566_v58 = vld [vmem:[#allocation14_spill] sm:$0xff] }
 0x2cb   :  { %1493 = vmatpush1.bf16.msra.mxu0 %v5025_v61  ;;  %v6565_v61 = vld [vmem:[#allocation13_spill] sm:$0xff] }
 0x2cc   :  { %1494 = vmatprep.subr.bf16.mxu0 %v5031_v2  ;;  %v5055_v2 = vld [vmem:[%s6228_s2 + $0x1bc] ss:$24 sps:$4 sm:$0xff]  }
 0x2cd   :  { %6563 = vst [vmem:[#allocation83_spill] sm:$0xff] %v5055_v2 }
 0x2cf   :  { %1495 = vmatpush1.bf16.msra.mxu0 %v5037_v5  ;;  %v6564_v5 = vld [vmem:[#allocation12_spill] sm:$0xff] }
 0x2d0   :  { %1496 = vmatprep.subr.bf16.mxu0 %v5043_v17  ;;  %v6567_v17 = vld [vmem:[#allocation15_spill] sm:$0xff] }
 0x2d3   :  { %1497 = vmatpush1.bf16.msra.mxu0 %v5049_v6  ;;  %v6570_v6 = vld [vmem:[#allocation18_spill] sm:$0xff] }
 0x2d4   :  { %1498 = vmatprep.subr.bf16.mxu0 %v5055_v2  ;;  %v6574_v2 = vld [vmem:[#allocation26_spill] sm:$0xff] }
 0x2d7   :  { %1499 = vmatpush1.bf16.msra.mxu0 %v6564_v5  ;;  %v6575_v5 = vld [vmem:[#allocation27_spill] sm:$0xff] }
 0x2d8   :  { %1500 = vmatprep.subr.bf16.mxu0 %v6565_v61  ;;  %v6576_v61 = vld [vmem:[#allocation29_spill] sm:$0xff] }
 0x2db   :  { %1501 = vmatpush1.bf16.msra.mxu0 %v6566_v58  ;;  %v6577_v58 = vld [vmem:[#allocation3_spill] sm:$0xff] }
 0x2dc   :  { %1502 = vmatprep.subr.bf16.mxu0 %v6567_v17 }
 0x2df   :  { %1503 = vmatpush1.bf16.msra.mxu0 %v6568_v53 }
 0x2e0   :  { %1504 = vmatprep.subr.bf16.mxu0 %v6569_v50 }
 0x2e3   :  { %1505 = vmatpush1.bf16.msra.mxu0 %v6570_v6 }
 0x2e4   :  { %1506 = vmatprep.subr.bf16.mxu0 %v6571_v16 }
 0x2e7   :  { %1507 = vmatpush1.bf16.msra.mxu0 %v6572_v11 }
 0x2e8   :  { %1508 = vmatprep.subr.bf16.mxu0 %v6573_v10 }
 0x2eb   :  { %1509 = vmatpush1.bf16.msra.mxu0 %v6574_v2 }
 0x2ec   :  { %1510 = vmatprep.subr.bf16.mxu0 %v6575_v5 }
 0x2ef   :  { %1511 = vmatpush1.bf16.msra.mxu0 %v6576_v61 }
 0x2f0   :  { %1616 = vmatprep.subr.bf16.mxu0 %v6577_v58 }
 0x345   :  { %v1296_v17 = vpop.f32.mrb[36].mxu0  ;;  %v1337_v53 = vpop.f32.mrb[24].mxu1 }
 0x346   :  { %v1387_v50 = vadd.f32 %v1296_v17, %v6578_v12  ;;  %v1298_v15 = vpop.f32.mrb[37].mxu0  ;;  %v1339_v6 = vpop.f32.mrb[25].mxu1  ;;  %v1385_v12 = vadd.f32 %v6526_v8, %v1337_v53  ;;  %v6583_v53 = vld [vmem:[#allocation71_spill] sm:$0xff] }
 0x347   :  { %v1394_v16 = vadd.f32 %v1298_v15, %v6579_v9  ;;  %v1407_v11 = vadd.f32 %v1339_v6, %v6580_v31  ;;  %v1300_v28 = vpop.f32.mrb[38].mxu0  ;;  %v1341_v10 = vpop.f32.mrb[26].mxu1 }
 0x348   :  { %v3173_v27 = vmul.f32 -1.442695, %v1387_v50  ;;  %v1301_v2 = vpop.f32.mrb[39].mxu0  ;;  %v1342_v1 = vpop.f32.mrb[27].mxu1 }
 0x349   :  { %v3174_v5 = vmul.f32 -1.442695, %v1394_v16  ;;  %v3175_v28 = vmul.f32 -1.442695, %v1407_v11 }
 0x34a   :  { %3616 = vpow2.f32 %v3173_v27 }
 0x34b   :  { %3618 = vpow2.f32 %v3174_v5 }
 0x354   :  { %v3617_v61 = vpop.eup %3616 }
 0x355   :  { %v1391_v62 = vadd.f32 1.0, %v3617_v61  ;;  %v3619_v58 = vpop.eup %3618 }
 0x356   :  { %v1398_v15 = vadd.f32 1.0, %v3619_v58 }
 0x357   :  { %3620 = vrcp.f32 %v1391_v62 }
 0x361   :  { %v3621_v17 = vpop.eup %3620 }
 0x362   :  { %v1401_v57 = vmul.f32 %v3621_v17, %v1385_v12  ;;  %v6584_v12 = vld [vmem:[#allocation72_spill] sm:$0xff] }
 0x364   :  { %v1402_v9 = vadd.f32 %v1401_v57, %v6581_v54 }
 0x366   :  { %3622 = vtanh.f32 %v1402_v9 }
 0x367   :  { %3624 = vrcp.f32 %v1398_v15 }
 0x368   :  { %3626 = vpow2.f32 %v3175_v28 }
 0x370   :  { %v3623_v31 = vpop.eup %3622 }
 0x371   :  { %v1404_v1 = vsub.f32 %v4809_v47, %v3623_v31  ;;  %v3625_v27 = vpop.eup %3624  ;;  %v5260_v47 = vld [vmem:[%s6228_s2 + $0x14] ss:$24 sps:$4 sm:$0xff]  }
 0x372   :  { %v3627_v62 = vpop.eup %3626  ;;  %6599 = vst [vmem:[#allocation27_spill] sm:$0xff] %v5260_v47 }
 0x373   :  { %v1405_v50 = vmul.f32 %v3625_v27, %v1404_v1  ;;  %v1411_v16 = vadd.f32 1.0, %v3627_v62 }
 0x375   :  { %v5078_v6 = vadd.f32 %v3623_v31, %v1405_v50  ;;  %3628 = vrcp.f32 %v1411_v16  ;;  %v5142_v16 = vld [vmem:[%s6228_s2 + $0x150] ss:$24 sps:$4 sm:$0xff]  }
 0x377   :  { %6582 = vst [vmem:[#allocation12_spill] sm:$0xff] %v5078_v6  ;;  %v5090_v62 = vpack.c.bf16 %v5078_v6, %v5078_v6 }
 0x37f   :  { %v3629_v58 = vpop.eup %3628 }
 0x385   :  { %v1378_v8 = vpop.f32.mrb[40].mxu0 }
 0x386   :  { %v1414_v10 = vadd.f32 %v1378_v8, %v6583_v53  ;;  %v1380_v2 = vpop.f32.mrb[41].mxu0  ;;  %v5148_v8 = vld [vmem:[%s6228_s2 + $0x184] ss:$24 sps:$4 sm:$0xff]   ;;  %v5156_v53 = vld [vmem:[%s6228_s2 + $0x180] ss:$24 sps:$4 sm:$0xff]  }
 0x387   :  { %v1386_v54 = vadd.f32 %v4529_v59, %v1380_v2  ;;  %v1382_v57 = vpop.f32.mrb[42].mxu0  ;;  %v5170_v2 = vld [vmem:[%s6228_s2 + $0x1b0] ss:$24 sps:$4 sm:$0xff]  }
 0x388   :  { %v3176_v11 = vmul.f32 -1.442695, %v1414_v10  ;;  %v1383_v5 = vpop.f32.mrb[43].mxu0  ;;  %v5162_v10 = vld [vmem:[%s6228_s2 + $0x1b4] ss:$24 sps:$4 sm:$0xff]  }
 0x389   :  { %v1421_v61 = vmul.f32 %v3629_v58, %v1386_v54  ;;  %v5176_v54 = vld [vmem:[%s6228_s2 + $0x1e4] ss:$24 sps:$4 sm:$0xff]   ;;  %v5184_v57 = vld [vmem:[%s6228_s2 + $0x1e0] ss:$24 sps:$4 sm:$0xff]   ;;  %v5190_v58 = vld [vmem:[%s6228_s2 + $0x214] ss:$24 sps:$4 sm:$0xff]  }
 0x38a   :  { %3630 = vpow2.f32 %v3176_v11  ;;  %v5198_v11 = vld [vmem:[%s6228_s2 + $0x210] ss:$24 sps:$4 sm:$0xff]   ;;  %v5204_v5 = vld [vmem:[%s6228_s2 + $0x244] ss:$24 sps:$4 sm:$0xff]  }
 0x38b   :  { %v1422_v17 = vadd.f32 %v1421_v61, %v6584_v12  ;;  %6586 = vst [vmem:[#allocation14_spill] sm:$0xff] %v5198_v11  ;;  %6587 = vst [vmem:[#allocation15_spill] sm:$0xff] %v5204_v5  ;;  %v5212_v61 = vld [vmem:[%s6228_s2 + $0x240] ss:$24 sps:$4 sm:$0xff]   ;;  %v5218_v12 = vld [vmem:[%s6228_s2 + $0x274] ss:$24 sps:$4 sm:$0xff]  }
 0x38c   :  { %6588 = vst [vmem:[#allocation16_spill] sm:$0xff] %v5212_v61  ;;  %6589 = vst [vmem:[#allocation17_spill] sm:$0xff] %v5218_v12 }
 0x38d   :  { %3632 = vtanh.f32 %v1422_v17  ;;  %v5226_v17 = vld [vmem:[%s6228_s2 + $0x270] ss:$24 sps:$4 sm:$0xff]  }
 0x38e   :  { %6590 = vst [vmem:[#allocation18_spill] sm:$0xff] %v5226_v17 }
 0x394   :  { %v3631_v9 = vpop.eup %3630 }
 0x395   :  { %v1418_v15 = vadd.f32 1.0, %v3631_v9  ;;  %v5232_v9 = vld [vmem:[%s6228_s2 + $0x2a4] ss:$24 sps:$4 sm:$0xff]  }
 0x396   :  { %6591 = vst [vmem:[#allocation19_spill] sm:$0xff] %v5232_v9 }
 0x397   :  { %3634 = vrcp.f32 %v1418_v15  ;;  %v3633_v28 = vpop.eup %3632  ;;  %v6592_v15 = vld [vmem:[#allocation80_spill] sm:$0xff] }
 0x398   :  { %v1424_v31 = vsub.f32 %v4815_v40, %v3633_v28  ;;  %v5254_v40 = vld [vmem:[%s6228_s2 + $0x2d0] ss:$24 sps:$4 sm:$0xff]  }
 0x399   :  { %6598 = vst [vmem:[#allocation26_spill] sm:$0xff] %v5254_v40 }
 0x3a1   :  { %v3635_v1 = vpop.eup %3634 }
 0x3a2   :  { %v1425_v27 = vmul.f32 %v3635_v1, %v1424_v31  ;;  %v5240_v31 = vld [vmem:[%s6228_s2 + $0x2a0] ss:$24 sps:$4 sm:$0xff]   ;;  %v5246_v1 = vld [vmem:[%s6228_s2 + $0x2d4] ss:$24 sps:$4 sm:$0xff]  }
 0x3a3   :  { %6594 = vst [vmem:[#allocation22_spill] sm:$0xff] %v5240_v31  ;;  %6595 = vst [vmem:[#allocation23_spill] sm:$0xff] %v5246_v1 }
 0x3a4   :  { %v5084_v50 = vadd.f32 %v3633_v28, %v1425_v27  ;;  %v6593_v28 = vld [vmem:[#allocation81_spill] sm:$0xff]  ;;  %v6596_v27 = vld [vmem:[#allocation82_spill] sm:$0xff] }
 0x3a6   :  { %6585 = vst [vmem:[#allocation13_spill] sm:$0xff] %v5084_v50  ;;  %v1438_v59 = vpack.c.bf16 %v5084_v50, %v5084_v50 }
 0x3a8   :  { %1471 = vmatprep.mubr.bf16.mxu1 %v1438_v59  ;;  %1512 = vmatprep.mubr.bf16.mxu0 %v1438_v59 }
 0x3a9   :  { %1472 = vmatmul.mubr.bf16.vlgmr.msra.gmra.mrb[28].mxu1 %v5090_v62  ;;  %1513 = vmatmul.mubr.bf16.vlgmr.msra.gmra.mrb[44].mxu0 %v5090_v62 }
 0x3aa   :  { %1522 = vmatpush1.bf16.msra.mxu1 %v4543_v52  ;;  %1553 = vmatprep.mubr.bf16.mxu1 %v1438_v59  ;;  %v5120_v52 = vld [vmem:[%s6228_s2 + $0x124] ss:$24 sps:$4 sm:$0xff]  }
 0x3ab   :  { %1523 = vmatprep.subr.bf16.mxu1 %v4552_v39  ;;  %1617 = vmatpush1.bf16.msra.mxu0 %v4830_v48  ;;  %v5128_v39 = vld [vmem:[%s6228_s2 + $0x120] ss:$24 sps:$4 sm:$0xff]  }
 0x3ac   :  { %1618 = vmatprep.subr.bf16.mxu0 %v4836_v35  ;;  %v6597_v59 = vld [vmem:[#allocation6_spill] sm:$0xff] }
 0x3ae   :  { %1524 = vmatpush1.bf16.msra.mxu1 %v4560_v44  ;;  %v5134_v44 = vld [vmem:[%s6228_s2 + $0x154] ss:$24 sps:$4 sm:$0xff]  }
 0x3af   :  { %1525 = vmatprep.subr.bf16.mxu1 %v4566_v0  ;;  %1619 = vmatpush1.bf16.msra.mxu0 %v4844_v36 }
 0x3b0   :  { %1620 = vmatprep.subr.bf16.mxu0 %v4850_v19 }
 0x3b2   :  { %1526 = vmatpush1.bf16.msra.mxu1 %v4574_v56 }
 0x3b3   :  { %1527 = vmatprep.subr.bf16.mxu1 %v4580_v63  ;;  %1621 = vmatpush1.bf16.msra.mxu0 %v4858_v55 }
 0x3b4   :  { %1622 = vmatprep.subr.bf16.mxu0 %v4864_v7 }
 0x3b6   :  { %1528 = vmatpush1.bf16.msra.mxu1 %v4588_v18 }
 0x3b7   :  { %1529 = vmatprep.subr.bf16.mxu1 %v4594_v21  ;;  %1623 = vmatpush1.bf16.msra.mxu0 %v4872_v4 }
 0x3b8   :  { %1624 = vmatprep.subr.bf16.mxu0 %v4878_v20 }
 0x3ba   :  { %1530 = vmatpush1.bf16.msra.mxu1 %v4602_v22 }
 0x3bb   :  { %1531 = vmatprep.subr.bf16.mxu1 %v4608_v25  ;;  %1625 = vmatpush1.bf16.msra.mxu0 %v4886_v23 }
 0x3bc   :  { %1626 = vmatprep.subr.bf16.mxu0 %v4892_v32 }
 0x3be   :  { %1532 = vmatpush1.bf16.msra.mxu1 %v4616_v26 }
 0x3bf   :  { %1533 = vmatprep.subr.bf16.mxu1 %v4622_v29  ;;  %1627 = vmatpush1.bf16.msra.mxu0 %v4900_v24 }
 0x3c0   :  { %1628 = vmatprep.subr.bf16.mxu0 %v5120_v52 }
 0x3c2   :  { %1534 = vmatpush1.bf16.msra.mxu1 %v4630_v30 }
 0x3c3   :  { %1535 = vmatprep.subr.bf16.mxu1 %v4636_v33  ;;  %1629 = vmatpush1.bf16.msra.mxu0 %v5128_v39 }
 0x3c4   :  { %1630 = vmatprep.subr.bf16.mxu0 %v5134_v44 }
 0x3c6   :  { %1536 = vmatpush1.bf16.msra.mxu1 %v4644_v34 }
 0x3c7   :  { %1537 = vmatprep.subr.bf16.mxu1 %v4650_v37  ;;  %1631 = vmatpush1.bf16.msra.mxu0 %v5142_v16 }
 0x3c8   :  { %1632 = vmatprep.subr.bf16.mxu0 %v5148_v8 }
 0x3ca   :  { %1538 = vmatpush1.bf16.msra.mxu1 %v4658_v38 }
 0x3cb   :  { %1539 = vmatprep.subr.bf16.mxu1 %v4664_v3  ;;  %1633 = vmatpush1.bf16.msra.mxu0 %v5156_v53 }
 0x3cc   :  { %1634 = vmatprep.subr.bf16.mxu0 %v5162_v10 }
 0x3ce   :  { %1540 = vmatpush1.bf16.msra.mxu1 %v4672_v13 }
 0x3cf   :  { %1541 = vmatprep.subr.bf16.mxu1 %v4678_v43  ;;  %1635 = vmatpush1.bf16.msra.mxu0 %v5170_v2 }
 0x3d0   :  { %1636 = vmatprep.subr.bf16.mxu0 %v5176_v54 }
 0x3d2   :  { %1542 = vmatpush1.bf16.msra.mxu1 %v4686_v51 }
 0x3d3   :  { %1543 = vmatprep.subr.bf16.mxu1 %v4692_v14  ;;  %1637 = vmatpush1.bf16.msra.mxu0 %v5184_v57 }
 0x3d4   :  { %1638 = vmatprep.subr.bf16.mxu0 %v5190_v58 }
 0x3d6   :  { %1544 = vmatpush1.bf16.msra.mxu1 %v4700_v60 }
 0x3d7   :  { %1545 = vmatprep.subr.bf16.mxu1 %v6531_v41  ;;  %1639 = vmatpush1.bf16.msra.mxu0 %v5198_v11 }
 0x3d8   :  { %1640 = vmatprep.subr.bf16.mxu0 %v5204_v5 }
 0x3da   :  { %1546 = vmatpush1.bf16.msra.mxu1 %v6532_v42 }
 0x3db   :  { %1547 = vmatprep.subr.bf16.mxu1 %v6533_v45  ;;  %1641 = vmatpush1.bf16.msra.mxu0 %v5212_v61 }
 0x3dc   :  { %1642 = vmatprep.subr.bf16.mxu0 %v5218_v12 }
 0x3de   :  { %1548 = vmatpush1.bf16.msra.mxu1 %v6534_v46 }
 0x3df   :  { %1549 = vmatprep.subr.bf16.mxu1 %v6535_v49  ;;  %1643 = vmatpush1.bf16.msra.mxu0 %v5226_v17  ;;  %v6608_v17 = vld [vmem:[#allocation35_spill] sm:$0xff]  ;;  %v6634_v49 = vld [vmem:[#allocation50_spill] sm:$0xff] }
 0x3e0   :  { %1644 = vmatprep.subr.bf16.mxu0 %v5232_v9  ;;  %v6607_v9 = vld [vmem:[#allocation54_spill] sm:$0xff] }
 0x3e2   :  { %1550 = vmatpush1.bf16.msra.mxu1 %v6592_v15  ;;  %v6606_v15 = vld [vmem:[#allocation33_spill] sm:$0xff] }
 0x3e3   :  { %1551 = vmatprep.subr.bf16.mxu1 %v6593_v28  ;;  %1645 = vmatpush1.bf16.msra.mxu0 %v5240_v31  ;;  %v6603_v31 = vld [vmem:[#allocation10_spill] sm:$0xff]  ;;  %v6604_v28 = vld [vmem:[#allocation11_spill] sm:$0xff] }
 0x3e4   :  { %1646 = vmatprep.subr.bf16.mxu0 %v5246_v1  ;;  %v6600_v1 = vld [vmem:[#allocation7_spill] sm:$0xff] }
 0x3e6   :  { %1552 = vmatpush1.bf16.msra.mxu1 %v6596_v27  ;;  %v6601_v27 = vld [vmem:[#allocation8_spill] sm:$0xff] }
 0x3e7   :  { %1657 = vmatprep.subr.bf16.mxu1 %v6597_v59  ;;  %1647 = vmatpush1.bf16.msra.mxu0 %v5254_v40  ;;  %v6602_v59 = vld [vmem:[#allocation9_spill] sm:$0xff]  ;;  %v6605_v40 = vld [vmem:[#allocation32_spill] sm:$0xff] }
 0x3e8   :  { %1698 = vmatprep.subr.bf16.mxu0 %v5260_v47  ;;  %v6609_v47 = vld [vmem:[#allocation73_spill] sm:$0xff] }
 0x3e9   :  { %1554 = vmatmul.mubr.bf16.vlgmr.msra.gmra.mrb[32].mxu1 %v5090_v62  ;;  %v6610_v62 = vld [vmem:[#allocation75_spill] sm:$0xff] }
 0x3ea   :  { %1658 = vmatpush1.bf16.msra.mxu1 %v6600_v1  ;;  %v6611_v1 = vld [vmem:[#allocation20_spill] sm:$0xff] }
 0x3eb   :  { %1659 = vmatprep.subr.bf16.mxu1 %v6601_v27  ;;  %v6612_v27 = vld [vmem:[#allocation21_spill] sm:$0xff] }
 0x3ee   :  { %1660 = vmatpush1.bf16.msra.mxu1 %v6602_v59  ;;  %v6613_v59 = vld [vmem:[#allocation24_spill] sm:$0xff] }
 0x3ef   :  { %1661 = vmatprep.subr.bf16.mxu1 %v6603_v31  ;;  %v6614_v31 = vld [vmem:[#allocation25_spill] sm:$0xff] }
 0x3f2   :  { %1662 = vmatpush1.bf16.msra.mxu1 %v6604_v28  ;;  %v6615_v28 = vld [vmem:[#allocation28_spill] sm:$0xff] }
 0x3f3   :  { %1663 = vmatprep.subr.bf16.mxu1 %v6605_v40  ;;  %v6616_v40 = vld [vmem:[#allocation30_spill] sm:$0xff] }
 0x3f6   :  { %1664 = vmatpush1.bf16.msra.mxu1 %v6606_v15  ;;  %v6617_v15 = vld [vmem:[#allocation83_spill] sm:$0xff] }
 0x3f7   :  { %1665 = vmatprep.subr.bf16.mxu1 %v6607_v9 }
 0x3fa   :  { %1666 = vmatpush1.bf16.msra.mxu1 %v6608_v17  ;;  %v6633_v17 = vld [vmem:[#allocation40_spill] sm:$0xff] }
 0x3fb   :  { %1667 = vmatprep.subr.bf16.mxu1 %v6609_v47  ;;  %v5285_v47 = vld [vmem:[%s6228_s2 + $0x1b8] ss:$24 sps:$4 sm:$0xff]  }
 0x3fc   :  { %6618 = vst [vmem:[#allocation29_spill] sm:$0xff] %v5285_v47 }
 0x3fe   :  { %1668 = vmatpush1.bf16.msra.mxu1 %v6610_v62 }
 0x3ff   :  { %1669 = vmatprep.subr.bf16.mxu1 %v6611_v1 }
 0x402   :  { %1670 = vmatpush1.bf16.msra.mxu1 %v6612_v27  ;;  %v5291_v27 = vld [vmem:[%s6228_s2 + $0x1ec] ss:$24 sps:$4 sm:$0xff]  }
 0x403   :  { %1671 = vmatprep.subr.bf16.mxu1 %v6613_v59  ;;  %6619 = vst [vmem:[#allocation37_spill] sm:$0xff] %v5291_v27  ;;  %v6632_v59 = vld [vmem:[#allocation39_spill] sm:$0xff] }
 0x406   :  { %1672 = vmatpush1.bf16.msra.mxu1 %v6614_v31 }
 0x407   :  { %1673 = vmatprep.subr.bf16.mxu1 %v6615_v28 }
 0x40a   :  { %1674 = vmatpush1.bf16.msra.mxu1 %v6616_v40  ;;  %v5297_v40 = vld [vmem:[%s6228_s2 + $0x1e8] ss:$24 sps:$4 sm:$0xff]  }
 0x40b   :  { %1675 = vmatprep.subr.bf16.mxu1 %v6617_v15  ;;  %6620 = vst [vmem:[#allocation38_spill] sm:$0xff] %v5297_v40  ;;  %v5303_v15 = vld [vmem:[%s6228_s2 + $0x21c] ss:$24 sps:$4 sm:$0xff]  }
 0x40c   :  { %6621 = vst [vmem:[#allocation52_spill] sm:$0xff] %v5303_v15 }
 0x40e   :  { %1676 = vmatpush1.bf16.msra.mxu1 %v5285_v47  ;;  %v5309_v47 = vld [vmem:[%s6228_s2 + $0x218] ss:$24 sps:$4 sm:$0xff]  }
 0x40f   :  { %1677 = vmatprep.subr.bf16.mxu1 %v5291_v27  ;;  %6622 = vst [vmem:[#allocation41_spill] sm:$0xff] %v5309_v47  ;;  %v5315_v27 = vld [vmem:[%s6228_s2 + $0x24c] ss:$24 sps:$4 sm:$0xff]  }
 0x410   :  { %6623 = vst [vmem:[#allocation71_spill] sm:$0xff] %v5315_v27 }
 0x412   :  { %1678 = vmatpush1.bf16.msra.mxu1 %v5297_v40  ;;  %v5321_v40 = vld [vmem:[%s6228_s2 + $0x248] ss:$24 sps:$4 sm:$0xff]  }
 0x413   :  { %1679 = vmatprep.subr.bf16.mxu1 %v5303_v15  ;;  %6624 = vst [vmem:[#allocation72_spill] sm:$0xff] %v5321_v40  ;;  %v5327_v15 = vld [vmem:[%s6228_s2 + $0x27c] ss:$24 sps:$4 sm:$0xff]  }
 0x414   :  { %6625 = vst [vmem:[#allocation84_spill] sm:$0xff] %v5327_v15 }
 0x416   :  { %1680 = vmatpush1.bf16.msra.mxu1 %v5309_v47  ;;  %v5333_v47 = vld [vmem:[%s6228_s2 + $0x278] ss:$24 sps:$4 sm:$0xff]  }
 0x417   :  { %1681 = vmatprep.subr.bf16.mxu1 %v5315_v27  ;;  %6626 = vst [vmem:[#allocation85_spill] sm:$0xff] %v5333_v47  ;;  %v5339_v27 = vld [vmem:[%s6228_s2 + $0x2ac] ss:$24 sps:$4 sm:$0xff]  }
 0x418   :  { %6627 = vst [vmem:[#allocation86_spill] sm:$0xff] %v5339_v27 }
 0x41a   :  { %1682 = vmatpush1.bf16.msra.mxu1 %v5321_v40  ;;  %v5345_v40 = vld [vmem:[%s6228_s2 + $0x2a8] ss:$24 sps:$4 sm:$0xff]  }
 0x41b   :  { %1683 = vmatprep.subr.bf16.mxu1 %v5327_v15  ;;  %6628 = vst [vmem:[#allocation87_spill] sm:$0xff] %v5345_v40  ;;  %v5351_v15 = vld [vmem:[%s6228_s2 + $0x2dc] ss:$24 sps:$4 sm:$0xff]  }
 0x41c   :  { %6629 = vst [vmem:[#allocation88_spill] sm:$0xff] %v5351_v15 }
 0x41e   :  { %1684 = vmatpush1.bf16.msra.mxu1 %v5333_v47  ;;  %v5357_v47 = vld [vmem:[%s6228_s2 + $0x2d8] ss:$24 sps:$4 sm:$0xff]  }
 0x41f   :  { %1685 = vmatprep.subr.bf16.mxu1 %v5339_v27  ;;  %6630 = vst [vmem:[#allocation89_spill] sm:$0xff] %v5357_v47  ;;  %v6631_v27 = vld [vmem:[#allocation3_spill] sm:$0xff] }
 0x422   :  { %1686 = vmatpush1.bf16.msra.mxu1 %v5345_v40 }
 0x423   :  { %1687 = vmatprep.subr.bf16.mxu1 %v5351_v15 }
 0x426   :  { %1688 = vmatpush1.bf16.msra.mxu1 %v5357_v47 }
 0x427   :  { %1793 = vmatprep.subr.bf16.mxu1 %v6631_v27 }
 0x47c   :  { %v1473_v28 = vpop.f32.mrb[28].mxu1  ;;  %v1514_v31 = vpop.f32.mrb[44].mxu0 }
 0x47d   :  { %v1564_v40 = vadd.f32 %v1473_v28, %v6632_v59  ;;  %v1475_v1 = vpop.f32.mrb[29].mxu1  ;;  %v1516_v62 = vpop.f32.mrb[45].mxu0  ;;  %v5367_v28 = vld [vmem:[%s6230_s4] ss:$0 sm:$0xff] }
 0x47e   :  { %v1571_v9 = vadd.f32 %v1475_v1, %v6633_v17  ;;  %v1584_v46 = vadd.f32 %v1516_v62, %v6634_v49  ;;  %v1477_v15 = vpop.f32.mrb[30].mxu1  ;;  %v1518_v12 = vpop.f32.mrb[46].mxu0  ;;  %v1562_v17 = vadd.f32 %v5367_v28, %v1514_v31  ;;  %v6637_v62 = vld [vmem:[#allocation69_spill] sm:$0xff] }
 0x47f   :  { %v3177_v61 = vmul.f32 -1.442695, %v1564_v40  ;;  %v1478_v45 = vpop.f32.mrb[31].mxu1  ;;  %v1519_v42 = vpop.f32.mrb[47].mxu0  ;;  %v6635_v12 = vld [vmem:[#allocation43_spill] sm:$0xff] }
 0x480   :  { %v3178_v5 = vmul.f32 -1.442695, %v1571_v9  ;;  %v3179_v42 = vmul.f32 -1.442695, %v1584_v46 }
 0x481   :  { %3636 = vpow2.f32 %v3177_v61 }
 0x482   :  { %3638 = vpow2.f32 %v3178_v5 }
 0x48b   :  { %v3637_v47 = vpop.eup %3636 }
 0x48c   :  { %v1568_v11 = vadd.f32 1.0, %v3637_v47  ;;  %v3639_v27 = vpop.eup %3638 }
 0x48d   :  { %v1575_v45 = vadd.f32 1.0, %v3639_v27  ;;  %v5378_v27 = vld [vmem:[%s6230_s4 + $0x1] ss:$0 sm:$0xff] }
 0x48e   :  { %3640 = vrcp.f32 %v1568_v11 }
 0x498   :  { %v3641_v49 = vpop.eup %3640 }
 0x499   :  { %v1578_v15 = vmul.f32 %v3641_v49, %v1562_v17 }
 0x49b   :  { %v1579_v40 = vadd.f32 %v1578_v15, %v6635_v12 }
 0x49d   :  { %3642 = vtanh.f32 %v1579_v40 }
 0x49e   :  { %3644 = vrcp.f32 %v1575_v45 }
 0x49f   :  { %3646 = vpow2.f32 %v3179_v42 }
 0x4a7   :  { %v3643_v47 = vpop.eup %3642 }
 0x4a8   :  { %v1581_v11 = vsub.f32 %v5078_v6, %v3643_v47  ;;  %v3645_v5 = vpop.eup %3644 }
 0x4a9   :  { %v3647_v1 = vpop.eup %3646 }
 0x4aa   :  { %v1582_v61 = vmul.f32 %v3645_v5, %v1581_v11  ;;  %v1588_v59 = vadd.f32 1.0, %v3647_v1 }
 0x4ac   :  { %v5372_v9 = vadd.f32 %v3643_v47, %v1582_v61  ;;  %3648 = vrcp.f32 %v1588_v59  ;;  %v6638_v47 = vld [vmem:[#allocation70_spill] sm:$0xff] }
 0x4ae   :  { %6636 = vst [vmem:[#allocation39_spill] sm:$0xff] %v5372_v9 }
 0x4b6   :  { %v3649_v12 = vpop.eup %3648 }
 0x4bc   :  { %v1555_v31 = vpop.f32.mrb[32].mxu1 }
 0x4bd   :  { %v1591_v17 = vadd.f32 %v1555_v31, %v6637_v62  ;;  %v1557_v49 = vpop.f32.mrb[33].mxu1 }
 0x4be   :  { %v1563_v46 = vadd.f32 %v5378_v27, %v1557_v49  ;;  %v1559_v15 = vpop.f32.mrb[34].mxu1 }
 0x4bf   :  { %v3180_v40 = vmul.f32 -1.442695, %v1591_v17  ;;  %v1560_v45 = vpop.f32.mrb[35].mxu1  ;;  %v5389_v17 = vpack.c.bf16 %v5372_v9, %v5372_v9  ;;  %v5402_v15 = vld [vmem:[%s6228_s2 + $0x44] ss:$24 sps:$4 sm:$0xff]  }
 0x4c0   :  { %v1598_v42 = vmul.f32 %v3649_v12, %v1563_v46  ;;  %v5396_v46 = vld [vmem:[%s6228_s2 + $0x10] ss:$24 sps:$4 sm:$0xff]   ;;  %v5410_v12 = vld [vmem:[%s6228_s2 + $0x40] ss:$24 sps:$4 sm:$0xff]  }
 0x4c1   :  { %3650 = vpow2.f32 %v3180_v40  ;;  %v6661_v40 = vld [vmem:[#allocation10_spill] sm:$0xff]  ;;  %v6662_v45 = vld [vmem:[#allocation11_spill] sm:$0xff] }
 0x4c2   :  { %v1599_v11 = vadd.f32 %v1598_v42, %v6638_v47  ;;  %v6663_v42 = vld [vmem:[#allocation32_spill] sm:$0xff]  ;;  %v6664_v47 = vld [vmem:[#allocation33_spill] sm:$0xff] }
 0x4c4   :  { %3652 = vtanh.f32 %v1599_v11  ;;  %v6665_v11 = vld [vmem:[#allocation54_spill] sm:$0xff] }
 0x4cb   :  { %v3651_v5 = vpop.eup %3650 }
 0x4cc   :  { %v1595_v61 = vadd.f32 1.0, %v3651_v5  ;;  %v6666_v5 = vld [vmem:[#allocation35_spill] sm:$0xff] }
 0x4ce   :  { %3654 = vrcp.f32 %v1595_v61  ;;  %v3653_v1 = vpop.eup %3652  ;;  %v6667_v61 = vld [vmem:[#allocation73_spill] sm:$0xff] }
 0x4cf   :  { %v1601_v59 = vsub.f32 %v5084_v50, %v3653_v1  ;;  %v6681_v50 = vld [vmem:[#allocation71_spill] sm:$0xff] }
 0x4d8   :  { %v3655_v31 = vpop.eup %3654 }
 0x4d9   :  { %v1602_v62 = vmul.f32 %v3655_v31, %v1601_v59  ;;  %v6669_v59 = vld [vmem:[#allocation20_spill] sm:$0xff]  ;;  %v6670_v31 = vld [vmem:[#allocation21_spill] sm:$0xff] }
 0x4db   :  { %v5383_v6 = vadd.f32 %v3653_v1, %v1602_v62  ;;  %v6668_v1 = vld [vmem:[#allocation75_spill] sm:$0xff]  ;;  %v6671_v62 = vld [vmem:[#allocation24_spill] sm:$0xff] }
 0x4dd   :  { %6639 = vst [vmem:[#allocation40_spill] sm:$0xff] %v5383_v6  ;;  %v1615_v49 = vpack.c.bf16 %v5383_v6, %v5383_v6 }
 0x4df   :  { %1648 = vmatprep.mubr.bf16.mxu0 %v1615_v49  ;;  %1689 = vmatprep.mubr.bf16.mxu1 %v1615_v49 }
 0x4e0   :  { %1649 = vmatmul.mubr.bf16.vlgmr.msra.gmra.mrb[48].mxu0 %v5389_v17  ;;  %1690 = vmatmul.mubr.bf16.vlgmr.msra.gmra.mrb[36].mxu1 %v5389_v17 }
 0x4e1   :  { %1699 = vmatpush1.bf16.msra.mxu0 %v5396_v46  ;;  %1730 = vmatprep.mubr.bf16.mxu0 %v1615_v49  ;;  %v6672_v49 = vld [vmem:[#allocation25_spill] sm:$0xff] }
 0x4e2   :  { %1700 = vmatprep.subr.bf16.mxu0 %v5402_v15  ;;  %1794 = vmatpush1.bf16.msra.mxu1 %v4830_v48 }
 0x4e3   :  { %1795 = vmatprep.subr.bf16.mxu1 %v4836_v35 }
 0x4e5   :  { %1701 = vmatpush1.bf16.msra.mxu0 %v5410_v12 }
 0x4e6   :  { %1702 = vmatprep.subr.bf16.mxu0 %v4566_v0  ;;  %1796 = vmatpush1.bf16.msra.mxu1 %v4844_v36  ;;  %v6640_v0 = vld [vmem:[#allocation14_spill] sm:$0xff] }
 0x4e7   :  { %1797 = vmatprep.subr.bf16.mxu1 %v4850_v19 }
 0x4e9   :  { %1703 = vmatpush1.bf16.msra.mxu0 %v4574_v56  ;;  %v6641_v56 = vld [vmem:[#allocation15_spill] sm:$0xff] }
 0x4ea   :  { %1704 = vmatprep.subr.bf16.mxu0 %v4580_v63  ;;  %1798 = vmatpush1.bf16.msra.mxu1 %v4858_v55  ;;  %v6642_v63 = vld [vmem:[#allocation76_spill] sm:$0xff] }
 0x4eb   :  { %1799 = vmatprep.subr.bf16.mxu1 %v4864_v7 }
 0x4ed   :  { %1705 = vmatpush1.bf16.msra.mxu0 %v4588_v18  ;;  %v6643_v18 = vld [vmem:[#allocation77_spill] sm:$0xff] }
 0x4ee   :  { %1706 = vmatprep.subr.bf16.mxu0 %v4594_v21  ;;  %1800 = vmatpush1.bf16.msra.mxu1 %v4872_v4  ;;  %v6644_v21 = vld [vmem:[#allocation16_spill] sm:$0xff] }
 0x4ef   :  { %1801 = vmatprep.subr.bf16.mxu1 %v4878_v20 }
 0x4f1   :  { %1707 = vmatpush1.bf16.msra.mxu0 %v4602_v22  ;;  %v6645_v22 = vld [vmem:[#allocation17_spill] sm:$0xff] }
 0x4f2   :  { %1708 = vmatprep.subr.bf16.mxu0 %v4608_v25  ;;  %1802 = vmatpush1.bf16.msra.mxu1 %v4886_v23  ;;  %v6646_v25 = vld [vmem:[#allocation78_spill] sm:$0xff] }
 0x4f3   :  { %1803 = vmatprep.subr.bf16.mxu1 %v4892_v32 }
 0x4f5   :  { %1709 = vmatpush1.bf16.msra.mxu0 %v4616_v26  ;;  %v6647_v26 = vld [vmem:[#allocation79_spill] sm:$0xff] }
 0x4f6   :  { %1710 = vmatprep.subr.bf16.mxu0 %v4622_v29  ;;  %1804 = vmatpush1.bf16.msra.mxu1 %v4900_v24  ;;  %v6648_v29 = vld [vmem:[#allocation18_spill] sm:$0xff] }
 0x4f7   :  { %1805 = vmatprep.subr.bf16.mxu1 %v5120_v52 }
 0x4f9   :  { %1711 = vmatpush1.bf16.msra.mxu0 %v4630_v30  ;;  %v6649_v30 = vld [vmem:[#allocation19_spill] sm:$0xff] }
 0x4fa   :  { %1712 = vmatprep.subr.bf16.mxu0 %v4636_v33  ;;  %1806 = vmatpush1.bf16.msra.mxu1 %v5128_v39  ;;  %v6650_v33 = vld [vmem:[#allocation80_spill] sm:$0xff] }
 0x4fb   :  { %1807 = vmatprep.subr.bf16.mxu1 %v5134_v44 }
 0x4fd   :  { %1713 = vmatpush1.bf16.msra.mxu0 %v4644_v34  ;;  %v6651_v34 = vld [vmem:[#allocation81_spill] sm:$0xff] }
 0x4fe   :  { %1714 = vmatprep.subr.bf16.mxu0 %v4650_v37  ;;  %1808 = vmatpush1.bf16.msra.mxu1 %v5142_v16  ;;  %v6652_v37 = vld [vmem:[#allocation22_spill] sm:$0xff] }
 0x4ff   :  { %1809 = vmatprep.subr.bf16.mxu1 %v5148_v8 }
 0x501   :  { %1715 = vmatpush1.bf16.msra.mxu0 %v4658_v38  ;;  %v6653_v38 = vld [vmem:[#allocation23_spill] sm:$0xff] }
 0x502   :  { %1716 = vmatprep.subr.bf16.mxu0 %v4664_v3  ;;  %1810 = vmatpush1.bf16.msra.mxu1 %v5156_v53  ;;  %v6654_v3 = vld [vmem:[#allocation82_spill] sm:$0xff] }
 0x503   :  { %1811 = vmatprep.subr.bf16.mxu1 %v5162_v10 }
 0x505   :  { %1717 = vmatpush1.bf16.msra.mxu0 %v4672_v13  ;;  %v6655_v13 = vld [vmem:[#allocation6_spill] sm:$0xff] }
 0x506   :  { %1718 = vmatprep.subr.bf16.mxu0 %v4678_v43  ;;  %1812 = vmatpush1.bf16.msra.mxu1 %v5170_v2  ;;  %v6656_v43 = vld [vmem:[#allocation26_spill] sm:$0xff] }
 0x507   :  { %1813 = vmatprep.subr.bf16.mxu1 %v5176_v54 }
 0x509   :  { %1719 = vmatpush1.bf16.msra.mxu0 %v4686_v51  ;;  %v6657_v51 = vld [vmem:[#allocation27_spill] sm:$0xff] }
 0x50a   :  { %1720 = vmatprep.subr.bf16.mxu0 %v4692_v14  ;;  %1814 = vmatpush1.bf16.msra.mxu1 %v5184_v57  ;;  %v6658_v14 = vld [vmem:[#allocation7_spill] sm:$0xff] }
 0x50b   :  { %1815 = vmatprep.subr.bf16.mxu1 %v5190_v58 }
 0x50d   :  { %1721 = vmatpush1.bf16.msra.mxu0 %v4700_v60  ;;  %v6659_v60 = vld [vmem:[#allocation8_spill] sm:$0xff] }
 0x50e   :  { %1722 = vmatprep.subr.bf16.mxu0 %v6531_v41  ;;  %1816 = vmatpush1.bf16.msra.mxu1 %v6640_v0  ;;  %v6660_v41 = vld [vmem:[#allocation9_spill] sm:$0xff] }
 0x50f   :  { %1817 = vmatprep.subr.bf16.mxu1 %v6641_v56 }
 0x511   :  { %1723 = vmatpush1.bf16.msra.mxu0 %v6642_v63  ;;  %v6674_v63 = vld [vmem:[#allocation30_spill] sm:$0xff] }
 0x512   :  { %1724 = vmatprep.subr.bf16.mxu0 %v6643_v18  ;;  %1818 = vmatpush1.bf16.msra.mxu1 %v6644_v21  ;;  %v6675_v18 = vld [vmem:[#allocation83_spill] sm:$0xff] }
 0x513   :  { %1819 = vmatprep.subr.bf16.mxu1 %v6645_v22 }
 0x515   :  { %1725 = vmatpush1.bf16.msra.mxu0 %v6646_v25  ;;  %v6676_v25 = vld [vmem:[#allocation29_spill] sm:$0xff] }
 0x516   :  { %1726 = vmatprep.subr.bf16.mxu0 %v6647_v26  ;;  %1820 = vmatpush1.bf16.msra.mxu1 %v6648_v29  ;;  %v6677_v26 = vld [vmem:[#allocation37_spill] sm:$0xff] }
 0x517   :  { %1821 = vmatprep.subr.bf16.mxu1 %v6649_v30 }
 0x519   :  { %1727 = vmatpush1.bf16.msra.mxu0 %v6650_v33  ;;  %v6678_v33 = vld [vmem:[#allocation38_spill] sm:$0xff] }
 0x51a   :  { %1728 = vmatprep.subr.bf16.mxu0 %v6651_v34  ;;  %1822 = vmatpush1.bf16.msra.mxu1 %v6652_v37  ;;  %v6679_v34 = vld [vmem:[#allocation52_spill] sm:$0xff] }
 0x51b   :  { %1823 = vmatprep.subr.bf16.mxu1 %v6653_v38 }
 0x51d   :  { %1729 = vmatpush1.bf16.msra.mxu0 %v6654_v3  ;;  %v6680_v3 = vld [vmem:[#allocation41_spill] sm:$0xff] }
 0x51e   :  { %1834 = vmatprep.subr.bf16.mxu0 %v6655_v13  ;;  %1824 = vmatpush1.bf16.msra.mxu1 %v6656_v43 }
 0x51f   :  { %1875 = vmatprep.subr.bf16.mxu1 %v6657_v51 }
 0x520   :  { %1731 = vmatmul.mubr.bf16.vlgmr.msra.gmra.mrb[52].mxu0 %v5389_v17  ;;  %v6673_v17 = vld [vmem:[#allocation28_spill] sm:$0xff] }
 0x521   :  { %1835 = vmatpush1.bf16.msra.mxu0 %v6658_v14 }
 0x522   :  { %1836 = vmatprep.subr.bf16.mxu0 %v6659_v60 }
 0x525   :  { %1837 = vmatpush1.bf16.msra.mxu0 %v6660_v41 }
 0x526   :  { %1838 = vmatprep.subr.bf16.mxu0 %v6661_v40  ;;  %v6693_v40 = vld [vmem:[#allocation49_spill] sm:$0xff] }
 0x529   :  { %1839 = vmatpush1.bf16.msra.mxu0 %v6662_v45 }
 0x52a   :  { %1840 = vmatprep.subr.bf16.mxu0 %v6663_v42 }
 0x52d   :  { %1841 = vmatpush1.bf16.msra.mxu0 %v6664_v47 }
 0x52e   :  { %1842 = vmatprep.subr.bf16.mxu0 %v6665_v11 }
 0x531   :  { %1843 = vmatpush1.bf16.msra.mxu0 %v6666_v5 }
 0x532   :  { %1844 = vmatprep.subr.bf16.mxu0 %v6667_v61  ;;  %v6692_v61 = vld [vmem:[#allocation44_spill] sm:$0xff] }
 0x535   :  { %1845 = vmatpush1.bf16.msra.mxu0 %v6668_v1  ;;  %v6691_v1 = vld [vmem:[#allocation46_spill] sm:$0xff] }
 0x536   :  { %1846 = vmatprep.subr.bf16.mxu0 %v6669_v59 }
 0x539   :  { %1847 = vmatpush1.bf16.msra.mxu0 %v6670_v31  ;;  %v6690_v31 = vld [vmem:[#allocation45_spill] sm:$0xff] }
 0x53a   :  { %1848 = vmatprep.subr.bf16.mxu0 %v6671_v62  ;;  %v6682_v62 = vld [vmem:[#allocation72_spill] sm:$0xff] }
 0x53d   :  { %1849 = vmatpush1.bf16.msra.mxu0 %v6672_v49  ;;  %v6683_v49 = vld [vmem:[#allocation84_spill] sm:$0xff] }
 0x53e   :  { %1850 = vmatprep.subr.bf16.mxu0 %v6673_v17  ;;  %v6684_v17 = vld [vmem:[#allocation85_spill] sm:$0xff] }
 0x541   :  { %1851 = vmatpush1.bf16.msra.mxu0 %v6674_v63  ;;  %v6685_v63 = vld [vmem:[#allocation86_spill] sm:$0xff] }
 0x542   :  { %1852 = vmatprep.subr.bf16.mxu0 %v6675_v18  ;;  %v6686_v18 = vld [vmem:[#allocation87_spill] sm:$0xff] }
 0x545   :  { %1853 = vmatpush1.bf16.msra.mxu0 %v6676_v25  ;;  %v6687_v25 = vld [vmem:[#allocation88_spill] sm:$0xff] }
 0x546   :  { %1854 = vmatprep.subr.bf16.mxu0 %v6677_v26  ;;  %v6688_v26 = vld [vmem:[#allocation89_spill] sm:$0xff] }
 0x549   :  { %1855 = vmatpush1.bf16.msra.mxu0 %v6678_v33  ;;  %v6689_v33 = vld [vmem:[#allocation3_spill] sm:$0xff] }
 0x54a   :  { %1856 = vmatprep.subr.bf16.mxu0 %v6679_v34 }
 0x54d   :  { %1857 = vmatpush1.bf16.msra.mxu0 %v6680_v3 }
 0x54e   :  { %1858 = vmatprep.subr.bf16.mxu0 %v6681_v50 }
 0x551   :  { %1859 = vmatpush1.bf16.msra.mxu0 %v6682_v62 }
 0x552   :  { %1860 = vmatprep.subr.bf16.mxu0 %v6683_v49 }
 0x555   :  { %1861 = vmatpush1.bf16.msra.mxu0 %v6684_v17 }
 0x556   :  { %1862 = vmatprep.subr.bf16.mxu0 %v6685_v63 }
 0x559   :  { %1863 = vmatpush1.bf16.msra.mxu0 %v6686_v18 }
 0x55a   :  { %1864 = vmatprep.subr.bf16.mxu0 %v6687_v25 }
 0x55d   :  { %1865 = vmatpush1.bf16.msra.mxu0 %v6688_v26 }
 0x55e   :  { %1970 = vmatprep.subr.bf16.mxu0 %v6689_v33 }
 0x5b3   :  { %v1650_v34 = vpop.f32.mrb[48].mxu0  ;;  %v1691_v3 = vpop.f32.mrb[36].mxu1 }
 0x5b4   :  { %v1741_v50 = vadd.f32 %v1650_v34, %v6690_v31  ;;  %v1652_v59 = vpop.f32.mrb[49].mxu0  ;;  %v1693_v62 = vpop.f32.mrb[37].mxu1  ;;  %v1739_v31 = vadd.f32 %v5367_v28, %v1691_v3 }
 0x5b5   :  { %v1748_v49 = vadd.f32 %v1652_v59, %v6691_v1  ;;  %v1761_v17 = vadd.f32 %v1693_v62, %v6692_v61  ;;  %v1654_v5 = vpop.f32.mrb[50].mxu0  ;;  %v1695_v63 = vpop.f32.mrb[38].mxu1 }
 0x5b6   :  { %v3181_v11 = vmul.f32 -1.442695, %v1741_v50  ;;  %v1655_v18 = vpop.f32.mrb[51].mxu0  ;;  %v1696_v47 = vpop.f32.mrb[39].mxu1 }
 0x5b7   :  { %v3182_v25 = vmul.f32 -1.442695, %v1748_v49  ;;  %v3183_v5 = vmul.f32 -1.442695, %v1761_v17  ;;  %v6694_v18 = vld [vmem:[#allocation66_spill] sm:$0xff] }
 0x5b8   :  { %3656 = vpow2.f32 %v3181_v11 }
 0x5b9   :  { %3658 = vpow2.f32 %v3182_v25 }
 0x5c2   :  { %v3657_v26 = vpop.eup %3656 }
 0x5c3   :  { %v1745_v42 = vadd.f32 1.0, %v3657_v26  ;;  %v3659_v33 = vpop.eup %3658 }
 0x5c4   :  { %v1752_v59 = vadd.f32 1.0, %v3659_v33 }
 0x5c5   :  { %3660 = vrcp.f32 %v1745_v42 }
 0x5cf   :  { %v3661_v34 = vpop.eup %3660 }
 0x5d0   :  { %v1755_v45 = vmul.f32 %v3661_v34, %v1739_v31  ;;  %v6695_v34 = vld [vmem:[#allocation67_spill] sm:$0xff] }
 0x5d2   :  { %v1756_v1 = vadd.f32 %v1755_v45, %v6693_v40 }
 0x5d4   :  { %3662 = vtanh.f32 %v1756_v1 }
 0x5d5   :  { %3664 = vrcp.f32 %v1752_v59 }
 0x5d6   :  { %3666 = vpow2.f32 %v3183_v5 }
 0x5de   :  { %v3663_v50 = vpop.eup %3662 }
 0x5df   :  { %v1758_v47 = vsub.f32 %v5372_v9, %v3663_v50  ;;  %v3665_v11 = vpop.eup %3664  ;;  %v6703_v9 = vld [vmem:[#allocation32_spill] sm:$0xff] }
 0x5e0   :  { %v3667_v42 = vpop.eup %3666 }
 0x5e1   :  { %v1759_v61 = vmul.f32 %v3665_v11, %v1758_v47  ;;  %v1765_v49 = vadd.f32 1.0, %v3667_v42 }
 0x5e3   :  { %v5511_v62 = vadd.f32 %v3663_v50, %v1759_v61  ;;  %3668 = vrcp.f32 %v1765_v49 }
 0x5ed   :  { %v3669_v3 = vpop.eup %3668 }
 0x5f3   :  { %v1732_v63 = vpop.f32.mrb[52].mxu0 }
 0x5f4   :  { %v1768_v25 = vadd.f32 %v1732_v63, %v6694_v18  ;;  %v1734_v26 = vpop.f32.mrb[53].mxu0  ;;  %v5523_v63 = vpack.c.bf16 %v5511_v62, %v5511_v62  ;;  %v5535_v18 = vld [vmem:[%s6228_s2 + $0x74] ss:$24 sps:$4 sm:$0xff]  }
 0x5f5   :  { %v1740_v40 = vadd.f32 %v5378_v27, %v1734_v26  ;;  %v1736_v45 = vpop.f32.mrb[54].mxu0  ;;  %v5627_v26 = vld [vmem:[%s6228_s2 + $0x190] ss:$24 sps:$4 sm:$0xff]  }
 0x5f6   :  { %v3184_v17 = vmul.f32 -1.442695, %v1768_v25  ;;  %v1737_v33 = vpop.f32.mrb[55].mxu0  ;;  %v5543_v25 = vld [vmem:[%s6228_s2 + $0x70] ss:$24 sps:$4 sm:$0xff]  }
 0x5f7   :  { %v1775_v31 = vmul.f32 %v3669_v3, %v1740_v40  ;;  %v5633_v40 = vld [vmem:[%s6228_s2 + $0x1c4] ss:$24 sps:$4 sm:$0xff]   ;;  %v5641_v45 = vld [vmem:[%s6228_s2 + $0x1c0] ss:$24 sps:$4 sm:$0xff]   ;;  %v5647_v3 = vld [vmem:[%s6228_s2 + $0x1f4] ss:$24 sps:$4 sm:$0xff]  }
 0x5f8   :  { %3670 = vpow2.f32 %v3184_v17  ;;  %v5655_v17 = vld [vmem:[%s6228_s2 + $0x1f0] ss:$24 sps:$4 sm:$0xff]   ;;  %v5661_v33 = vld [vmem:[%s6228_s2 + $0x224] ss:$24 sps:$4 sm:$0xff]  }
 0x5f9   :  { %v1776_v1 = vadd.f32 %v1775_v31, %v6695_v34  ;;  %v5669_v31 = vld [vmem:[%s6228_s2 + $0x220] ss:$24 sps:$4 sm:$0xff]   ;;  %v5675_v34 = vld [vmem:[%s6228_s2 + $0x254] ss:$24 sps:$4 sm:$0xff]  }
 0x5fb   :  { %3672 = vtanh.f32 %v1776_v1  ;;  %v5683_v1 = vld [vmem:[%s6228_s2 + $0x250] ss:$24 sps:$4 sm:$0xff]  }
 0x602   :  { %v3671_v59 = vpop.eup %3670 }
 0x603   :  { %v1772_v5 = vadd.f32 1.0, %v3671_v59  ;;  %v5689_v59 = vld [vmem:[%s6228_s2 + $0x284] ss:$24 sps:$4 sm:$0xff]  }
 0x605   :  { %3674 = vrcp.f32 %v1772_v5  ;;  %v3673_v50 = vpop.eup %3672  ;;  %v5697_v5 = vld [vmem:[%s6228_s2 + $0x280] ss:$24 sps:$4 sm:$0xff]  }
 0x606   :  { %v1778_v47 = vsub.f32 %v5383_v6, %v3673_v50  ;;  %6696 = vst [vmem:[#allocation50_spill] sm:$0xff] %v5697_v5  ;;  %v6702_v6 = vld [vmem:[#allocation11_spill] sm:$0xff] }
 0x60f   :  { %v3675_v11 = vpop.eup %3674 }
 0x610   :  { %v1779_v61 = vmul.f32 %v3675_v11, %v1778_v47  ;;  %v5711_v47 = vld [vmem:[%s6228_s2 + $0x2b0] ss:$24 sps:$4 sm:$0xff]   ;;  %v5717_v11 = vld [vmem:[%s6228_s2 + $0x2e4] ss:$24 sps:$4 sm:$0xff]  }
 0x611   :  { %6698 = vst [vmem:[#allocation69_spill] sm:$0xff] %v5711_v47  ;;  %6699 = vst [vmem:[#allocation70_spill] sm:$0xff] %v5717_v11 }
 0x612   :  { %v5517_v42 = vadd.f32 %v3673_v50, %v1779_v61  ;;  %v5703_v50 = vld [vmem:[%s6228_s2 + $0x2b4] ss:$24 sps:$4 sm:$0xff]   ;;  %v5725_v61 = vld [vmem:[%s6228_s2 + $0x2e0] ss:$24 sps:$4 sm:$0xff]  }
 0x613   :  { %6697 = vst [vmem:[#allocation43_spill] sm:$0xff] %v5703_v50  ;;  %6700 = vst [vmem:[#allocation14_spill] sm:$0xff] %v5725_v61 }
 0x614   :  { %v1792_v49 = vpack.c.bf16 %v5517_v42, %v5517_v42 }
 0x616   :  { %1825 = vmatprep.mubr.bf16.mxu1 %v1792_v49  ;;  %1866 = vmatprep.mubr.bf16.mxu0 %v1792_v49 }
 0x617   :  { %1826 = vmatmul.mubr.bf16.vlgmr.msra.gmra.mrb[40].mxu1 %v5523_v63  ;;  %1867 = vmatmul.mubr.bf16.vlgmr.msra.gmra.mrb[56].mxu0 %v5523_v63 }
 0x618   :  { %1876 = vmatpush1.bf16.msra.mxu1 %v5396_v46  ;;  %1907 = vmatprep.mubr.bf16.mxu1 %v1792_v49  ;;  %v6701_v49 = vld [vmem:[#allocation10_spill] sm:$0xff] }
 0x619   :  { %1877 = vmatprep.subr.bf16.mxu1 %v5402_v15  ;;  %1971 = vmatpush1.bf16.msra.mxu0 %v4830_v48  ;;  %v5549_v48 = vld [vmem:[%s6228_s2 + $0xa4] ss:$24 sps:$4 sm:$0xff]  }
 0x61a   :  { %1972 = vmatprep.subr.bf16.mxu0 %v4836_v35  ;;  %v5557_v35 = vld [vmem:[%s6228_s2 + $0xa0] ss:$24 sps:$4 sm:$0xff]  }
 0x61c   :  { %1878 = vmatpush1.bf16.msra.mxu1 %v5410_v12 }
 0x61d   :  { %1879 = vmatprep.subr.bf16.mxu1 %v5535_v18  ;;  %1973 = vmatpush1.bf16.msra.mxu0 %v4844_v36  ;;  %v5563_v36 = vld [vmem:[%s6228_s2 + $0xd4] ss:$24 sps:$4 sm:$0xff]  }
 0x61e   :  { %1974 = vmatprep.subr.bf16.mxu0 %v4850_v19  ;;  %v5571_v19 = vld [vmem:[%s6228_s2 + $0xd0] ss:$24 sps:$4 sm:$0xff]  }
 0x620   :  { %1880 = vmatpush1.bf16.msra.mxu1 %v5543_v25 }
 0x621   :  { %1881 = vmatprep.subr.bf16.mxu1 %v5549_v48  ;;  %1975 = vmatpush1.bf16.msra.mxu0 %v4858_v55  ;;  %v5577_v55 = vld [vmem:[%s6228_s2 + $0x104] ss:$24 sps:$4 sm:$0xff]  }
 0x622   :  { %1976 = vmatprep.subr.bf16.mxu0 %v4864_v7  ;;  %v5585_v7 = vld [vmem:[%s6228_s2 + $0x100] ss:$24 sps:$4 sm:$0xff]  }
 0x624   :  { %1882 = vmatpush1.bf16.msra.mxu1 %v5557_v35 }
 0x625   :  { %1883 = vmatprep.subr.bf16.mxu1 %v5563_v36  ;;  %1977 = vmatpush1.bf16.msra.mxu0 %v4872_v4  ;;  %v5591_v4 = vld [vmem:[%s6228_s2 + $0x134] ss:$24 sps:$4 sm:$0xff]  }
 0x626   :  { %1978 = vmatprep.subr.bf16.mxu0 %v4878_v20  ;;  %v5599_v20 = vld [vmem:[%s6228_s2 + $0x130] ss:$24 sps:$4 sm:$0xff]  }
 0x628   :  { %1884 = vmatpush1.bf16.msra.mxu1 %v5571_v19 }
 0x629   :  { %1885 = vmatprep.subr.bf16.mxu1 %v5577_v55  ;;  %1979 = vmatpush1.bf16.msra.mxu0 %v4886_v23  ;;  %v5605_v23 = vld [vmem:[%s6228_s2 + $0x164] ss:$24 sps:$4 sm:$0xff]  }
 0x62a   :  { %1980 = vmatprep.subr.bf16.mxu0 %v4892_v32  ;;  %v5613_v32 = vld [vmem:[%s6228_s2 + $0x160] ss:$24 sps:$4 sm:$0xff]  }
 0x62c   :  { %1886 = vmatpush1.bf16.msra.mxu1 %v5585_v7 }
 0x62d   :  { %1887 = vmatprep.subr.bf16.mxu1 %v5591_v4  ;;  %1981 = vmatpush1.bf16.msra.mxu0 %v4900_v24  ;;  %v5619_v24 = vld [vmem:[%s6228_s2 + $0x194] ss:$24 sps:$4 sm:$0xff]  }
 0x62e   :  { %1982 = vmatprep.subr.bf16.mxu0 %v5120_v52 }
 0x630   :  { %1888 = vmatpush1.bf16.msra.mxu1 %v5599_v20 }
 0x631   :  { %1889 = vmatprep.subr.bf16.mxu1 %v5605_v23  ;;  %1983 = vmatpush1.bf16.msra.mxu0 %v5128_v39 }
 0x632   :  { %1984 = vmatprep.subr.bf16.mxu0 %v5134_v44 }
 0x634   :  { %1890 = vmatpush1.bf16.msra.mxu1 %v5613_v32 }
 0x635   :  { %1891 = vmatprep.subr.bf16.mxu1 %v5619_v24  ;;  %1985 = vmatpush1.bf16.msra.mxu0 %v5142_v16 }
 0x636   :  { %1986 = vmatprep.subr.bf16.mxu0 %v5148_v8 }
 0x638   :  { %1892 = vmatpush1.bf16.msra.mxu1 %v5627_v26 }
 0x639   :  { %1893 = vmatprep.subr.bf16.mxu1 %v5633_v40  ;;  %1987 = vmatpush1.bf16.msra.mxu0 %v5156_v53 }
 0x63a   :  { %1988 = vmatprep.subr.bf16.mxu0 %v5162_v10 }
 0x63c   :  { %1894 = vmatpush1.bf16.msra.mxu1 %v5641_v45 }
 0x63d   :  { %1895 = vmatprep.subr.bf16.mxu1 %v5647_v3  ;;  %1989 = vmatpush1.bf16.msra.mxu0 %v5170_v2 }
 0x63e   :  { %1990 = vmatprep.subr.bf16.mxu0 %v5176_v54 }
 0x640   :  { %1896 = vmatpush1.bf16.msra.mxu1 %v5655_v17 }
 0x641   :  { %1897 = vmatprep.subr.bf16.mxu1 %v5661_v33  ;;  %1991 = vmatpush1.bf16.msra.mxu0 %v5184_v57 }
 0x642   :  { %1992 = vmatprep.subr.bf16.mxu0 %v5190_v58 }
 0x644   :  { %1898 = vmatpush1.bf16.msra.mxu1 %v5669_v31 }
 0x645   :  { %1899 = vmatprep.subr.bf16.mxu1 %v5675_v34  ;;  %1993 = vmatpush1.bf16.msra.mxu0 %v6640_v0 }
 0x646   :  { %1994 = vmatprep.subr.bf16.mxu0 %v6641_v56 }
 0x648   :  { %1900 = vmatpush1.bf16.msra.mxu1 %v5683_v1 }
 0x649   :  { %1901 = vmatprep.subr.bf16.mxu1 %v5689_v59  ;;  %1995 = vmatpush1.bf16.msra.mxu0 %v6644_v21  ;;  %v6732_v21 = vld [vmem:[#allocation51_spill] sm:$0xff] }
 0x64a   :  { %1996 = vmatprep.subr.bf16.mxu0 %v6645_v22 }
 0x64c   :  { %1902 = vmatpush1.bf16.msra.mxu1 %v5697_v5 }
 0x64d   :  { %1903 = vmatprep.subr.bf16.mxu1 %v5703_v50  ;;  %1997 = vmatpush1.bf16.msra.mxu0 %v6648_v29 }
 0x64e   :  { %1998 = vmatprep.subr.bf16.mxu0 %v6649_v30 }
 0x650   :  { %1904 = vmatpush1.bf16.msra.mxu1 %v5711_v47 }
 0x651   :  { %1905 = vmatprep.subr.bf16.mxu1 %v5717_v11  ;;  %1999 = vmatpush1.bf16.msra.mxu0 %v6652_v37 }
 0x652   :  { %2000 = vmatprep.subr.bf16.mxu0 %v6653_v38 }
 0x654   :  { %1906 = vmatpush1.bf16.msra.mxu1 %v5725_v61  ;;  %v6704_v61 = vld [vmem:[#allocation33_spill] sm:$0xff] }
 0x655   :  { %2011 = vmatprep.subr.bf16.mxu1 %v6655_v13  ;;  %2001 = vmatpush1.bf16.msra.mxu0 %v6656_v43  ;;  %v6705_v13 = vld [vmem:[#allocation54_spill] sm:$0xff]  ;;  %v6706_v43 = vld [vmem:[#allocation35_spill] sm:$0xff] }
 0x656   :  { %2052 = vmatprep.subr.bf16.mxu0 %v6657_v51  ;;  %v6707_v51 = vld [vmem:[#allocation73_spill] sm:$0xff] }
 0x657   :  { %1908 = vmatmul.mubr.bf16.vlgmr.msra.gmra.mrb[44].mxu1 %v5523_v63  ;;  %v6708_v63 = vld [vmem:[#allocation75_spill] sm:$0xff] }
 0x658   :  { %2012 = vmatpush1.bf16.msra.mxu1 %v6658_v14  ;;  %v6709_v14 = vld [vmem:[#allocation20_spill] sm:$0xff] }
 0x659   :  { %2013 = vmatprep.subr.bf16.mxu1 %v6659_v60  ;;  %v6710_v60 = vld [vmem:[#allocation21_spill] sm:$0xff] }
 0x65c   :  { %2014 = vmatpush1.bf16.msra.mxu1 %v6660_v41  ;;  %v6711_v41 = vld [vmem:[#allocation24_spill] sm:$0xff] }
 0x65d   :  { %2015 = vmatprep.subr.bf16.mxu1 %v6701_v49  ;;  %v6712_v49 = vld [vmem:[#allocation25_spill] sm:$0xff] }
 0x660   :  { %2016 = vmatpush1.bf16.msra.mxu1 %v6702_v6  ;;  %v6713_v6 = vld [vmem:[#allocation28_spill] sm:$0xff] }
 0x661   :  { %2017 = vmatprep.subr.bf16.mxu1 %v6703_v9  ;;  %v6714_v9 = vld [vmem:[#allocation30_spill] sm:$0xff] }
 0x664   :  { %2018 = vmatpush1.bf16.msra.mxu1 %v6704_v61  ;;  %v6715_v61 = vld [vmem:[#allocation83_spill] sm:$0xff] }
 0x665   :  { %2019 = vmatprep.subr.bf16.mxu1 %v6705_v13  ;;  %v6716_v13 = vld [vmem:[#allocation29_spill] sm:$0xff] }
 0x668   :  { %2020 = vmatpush1.bf16.msra.mxu1 %v6706_v43  ;;  %v6717_v43 = vld [vmem:[#allocation37_spill] sm:$0xff] }
 0x669   :  { %2021 = vmatprep.subr.bf16.mxu1 %v6707_v51  ;;  %v6718_v51 = vld [vmem:[#allocation38_spill] sm:$0xff] }
 0x66c   :  { %2022 = vmatpush1.bf16.msra.mxu1 %v6708_v63  ;;  %v6719_v63 = vld [vmem:[#allocation52_spill] sm:$0xff] }
 0x66d   :  { %2023 = vmatprep.subr.bf16.mxu1 %v6709_v14  ;;  %v6720_v14 = vld [vmem:[#allocation41_spill] sm:$0xff] }
 0x670   :  { %2024 = vmatpush1.bf16.msra.mxu1 %v6710_v60  ;;  %v6721_v60 = vld [vmem:[#allocation71_spill] sm:$0xff] }
 0x671   :  { %2025 = vmatprep.subr.bf16.mxu1 %v6711_v41  ;;  %v6722_v41 = vld [vmem:[#allocation72_spill] sm:$0xff] }
 0x674   :  { %2026 = vmatpush1.bf16.msra.mxu1 %v6712_v49  ;;  %v6723_v49 = vld [vmem:[#allocation84_spill] sm:$0xff] }
 0x675   :  { %2027 = vmatprep.subr.bf16.mxu1 %v6713_v6  ;;  %v6724_v6 = vld [vmem:[#allocation85_spill] sm:$0xff] }
 0x678   :  { %2028 = vmatpush1.bf16.msra.mxu1 %v6714_v9  ;;  %v6725_v9 = vld [vmem:[#allocation86_spill] sm:$0xff] }
 0x679   :  { %2029 = vmatprep.subr.bf16.mxu1 %v6715_v61  ;;  %v6726_v61 = vld [vmem:[#allocation87_spill] sm:$0xff] }
 0x67c   :  { %2030 = vmatpush1.bf16.msra.mxu1 %v6716_v13  ;;  %v6727_v13 = vld [vmem:[#allocation88_spill] sm:$0xff] }
 0x67d   :  { %2031 = vmatprep.subr.bf16.mxu1 %v6717_v43  ;;  %v6728_v43 = vld [vmem:[#allocation89_spill] sm:$0xff] }
 0x680   :  { %2032 = vmatpush1.bf16.msra.mxu1 %v6718_v51 }
 0x681   :  { %2033 = vmatprep.subr.bf16.mxu1 %v6719_v63 }
 0x684   :  { %2034 = vmatpush1.bf16.msra.mxu1 %v6720_v14  ;;  %v3838_v14 = vld [vmem:[%s6228_s2 + $0x4] ss:$24 sps:$4 sm:$0xff]  }
 0x685   :  { %2035 = vmatprep.subr.bf16.mxu1 %v6721_v60 }
 0x688   :  { %2036 = vmatpush1.bf16.msra.mxu1 %v6722_v41  ;;  %v6729_v41 = vld [vmem:[#allocation47_spill] sm:$0xff] }
 0x689   :  { %2037 = vmatprep.subr.bf16.mxu1 %v6723_v49 }
 0x68c   :  { %2038 = vmatpush1.bf16.msra.mxu1 %v6724_v6  ;;  %v6730_v6 = vld [vmem:[#allocation48_spill] sm:$0xff] }
 0x68d   :  { %2039 = vmatprep.subr.bf16.mxu1 %v6725_v9  ;;  %v6731_v9 = vld [vmem:[#allocation42_spill] sm:$0xff] }
 0x690   :  { %2040 = vmatpush1.bf16.msra.mxu1 %v6726_v61 }
 0x691   :  { %2041 = vmatprep.subr.bf16.mxu1 %v6727_v13 }
 0x694   :  { %2042 = vmatpush1.bf16.msra.mxu1 %v6728_v43 }
 0x695   :  { %2147 = vmatprep.subr.bf16.mxu1 %v3838_v14 }
 0x6ea   :  { %v1827_v60 = vpop.f32.mrb[40].mxu1  ;;  %v1868_v63 = vpop.f32.mrb[56].mxu0 }
 0x6eb   :  { %v1918_v51 = vadd.f32 %v1827_v60, %v6729_v41  ;;  %v1829_v49 = vpop.f32.mrb[41].mxu1  ;;  %v1870_v38 = vpop.f32.mrb[57].mxu0  ;;  %v1916_v60 = vadd.f32 %v5367_v28, %v1868_v63 }
 0x6ec   :  { %v1925_v37 = vadd.f32 %v1829_v49, %v6730_v6  ;;  %v1938_v11 = vadd.f32 %v1870_v38, %v6731_v9  ;;  %v1831_v61 = vpop.f32.mrb[42].mxu1  ;;  %v1872_v47 = vpop.f32.mrb[58].mxu0 }
 0x6ed   :  { %v3185_v13 = vmul.f32 -1.442695, %v1918_v51  ;;  %v1832_v30 = vpop.f32.mrb[43].mxu1  ;;  %v1873_v43 = vpop.f32.mrb[59].mxu0  ;;  %v6733_v51 = vld [vmem:[#allocation64_spill] sm:$0xff] }
 0x6ee   :  { %v3186_v29 = vmul.f32 -1.442695, %v1925_v37  ;;  %v3187_v38 = vmul.f32 -1.442695, %v1938_v11 }
 0x6ef   :  { %3676 = vpow2.f32 %v3185_v13 }
 0x6f0   :  { %3678 = vpow2.f32 %v3186_v29 }
 0x6f9   :  { %v3677_v50 = vpop.eup %3676 }
 0x6fa   :  { %v1922_v5 = vadd.f32 1.0, %v3677_v50  ;;  %v3679_v14 = vpop.eup %3678 }
 0x6fb   :  { %v1929_v6 = vadd.f32 1.0, %v3679_v14 }
 0x6fc   :  { %3680 = vrcp.f32 %v1922_v5 }
 0x706   :  { %v3681_v41 = vpop.eup %3680 }
 0x707   :  { %v1932_v22 = vmul.f32 %v3681_v41, %v1916_v60  ;;  %v6734_v41 = vld [vmem:[#allocation65_spill] sm:$0xff] }
 0x709   :  { %v1933_v49 = vadd.f32 %v1932_v22, %v6732_v21 }
 0x70b   :  { %3682 = vtanh.f32 %v1933_v49 }
 0x70c   :  { %3684 = vrcp.f32 %v1929_v6 }
 0x70d   :  { %3686 = vpow2.f32 %v3187_v38 }
 0x715   :  { %v3683_v30 = vpop.eup %3682 }
 0x716   :  { %v1935_v47 = vsub.f32 %v5511_v62, %v3683_v30  ;;  %v3685_v37 = vpop.eup %3684 }
 0x717   :  { %v3687_v29 = vpop.eup %3686 }
 0x718   :  { %v1936_v13 = vmul.f32 %v3685_v37, %v1935_v47  ;;  %v1942_v5 = vadd.f32 1.0, %v3687_v29 }
 0x71a   :  { %v5772_v50 = vadd.f32 %v3683_v30, %v1936_v13  ;;  %3688 = vrcp.f32 %v1942_v5 }
 0x724   :  { %v3689_v61 = vpop.eup %3688 }
 0x72a   :  { %v1909_v43 = vpop.f32.mrb[44].mxu1 }
 0x72b   :  { %v1945_v63 = vadd.f32 %v1909_v43, %v6733_v51  ;;  %v1911_v9 = vpop.f32.mrb[45].mxu1  ;;  %v5784_v43 = vpack.c.bf16 %v5772_v50, %v5772_v50  ;;  %v3839_v51 = vld [vmem:[%s6228_s2] ss:$24 sps:$4 sm:$0xff]  }
 0x72c   :  { %v1917_v21 = vadd.f32 %v5378_v27, %v1911_v9  ;;  %v1913_v22 = vpop.f32.mrb[46].mxu1  ;;  %v3841_v9 = vld [vmem:[%s6228_s2 + $0x30] ss:$24 sps:$4 sm:$0xff]  }
 0x72d   :  { %v3188_v11 = vmul.f32 -1.442695, %v1945_v63  ;;  %v1914_v14 = vpop.f32.mrb[47].mxu1  ;;  %v3840_v63 = vld [vmem:[%s6228_s2 + $0x34] ss:$24 sps:$4 sm:$0xff]  }
 0x72e   :  { %v1952_v60 = vmul.f32 %v3689_v61, %v1917_v21  ;;  %v3842_v21 = vld [vmem:[%s6228_s2 + $0x64] ss:$24 sps:$4 sm:$0xff]   ;;  %v3843_v22 = vld [vmem:[%s6228_s2 + $0x60] ss:$24 sps:$4 sm:$0xff]   ;;  %v3844_v61 = vld [vmem:[%s6228_s2 + $0x94] ss:$24 sps:$4 sm:$0xff]  }
 0x72f   :  { %3690 = vpow2.f32 %v3188_v11  ;;  %v3845_v11 = vld [vmem:[%s6228_s2 + $0x90] ss:$24 sps:$4 sm:$0xff]   ;;  %v3846_v14 = vld [vmem:[%s6228_s2 + $0xc4] ss:$24 sps:$4 sm:$0xff]  }
 0x730   :  { %v1953_v49 = vadd.f32 %v1952_v60, %v6734_v41  ;;  %v3847_v60 = vld [vmem:[%s6228_s2 + $0xc0] ss:$24 sps:$4 sm:$0xff]   ;;  %v3848_v41 = vld [vmem:[%s6228_s2 + $0xf4] ss:$24 sps:$4 sm:$0xff]  }
 0x732   :  { %3692 = vtanh.f32 %v1953_v49  ;;  %v3849_v49 = vld [vmem:[%s6228_s2 + $0xf0] ss:$24 sps:$4 sm:$0xff]  }
 0x739   :  { %v3691_v6 = vpop.eup %3690 }
 0x73a   :  { %v1949_v38 = vadd.f32 1.0, %v3691_v6  ;;  %v6747_v6 = vld [vmem:[#allocation27_spill] sm:$0xff] }
 0x73c   :  { %3694 = vrcp.f32 %v1949_v38  ;;  %v3693_v30 = vpop.eup %3692  ;;  %v3851_v38 = vld [vmem:[%s6228_s2 + $0x8] ss:$24 sps:$4 sm:$0xff]  }
 0x73d   :  { %v1955_v47 = vsub.f32 %v5517_v42, %v3693_v30 }
 0x746   :  { %v3695_v37 = vpop.eup %3694 }
 0x747   :  { %v1956_v13 = vmul.f32 %v3695_v37, %v1955_v47  ;;  %v3853_v47 = vld [vmem:[%s6228_s2 + $0x38] ss:$24 sps:$4 sm:$0xff]   ;;  %v3854_v37 = vld [vmem:[%s6228_s2 + $0x6c] ss:$24 sps:$4 sm:$0xff]  }
 0x749   :  { %v5778_v29 = vadd.f32 %v3693_v30, %v1956_v13  ;;  %v3852_v30 = vld [vmem:[%s6228_s2 + $0x3c] ss:$24 sps:$4 sm:$0xff]   ;;  %v3855_v13 = vld [vmem:[%s6228_s2 + $0x68] ss:$24 sps:$4 sm:$0xff]  }
 0x74b   :  { %v1969_v5 = vpack.c.bf16 %v5778_v29, %v5778_v29 }
 0x74d   :  { %2002 = vmatprep.mubr.bf16.mxu0 %v1969_v5  ;;  %2043 = vmatprep.mubr.bf16.mxu1 %v1969_v5 }
 0x74e   :  { %2003 = vmatmul.mubr.bf16.vlgmr.msra.gmra.mrb[60].mxu0 %v5784_v43  ;;  %2044 = vmatmul.mubr.bf16.vlgmr.msra.gmra.mrb[48].mxu1 %v5784_v43 }
 0x74f   :  { %2053 = vmatpush1.bf16.msra.mxu0 %v5396_v46  ;;  %2084 = vmatprep.mubr.bf16.mxu0 %v1969_v5  ;;  %v3856_v5 = vld [vmem:[%s6228_s2 + $0x9c] ss:$24 sps:$4 sm:$0xff]  }
 0x750   :  { %2054 = vmatprep.subr.bf16.mxu0 %v5402_v15  ;;  %2148 = vmatpush1.bf16.msra.mxu1 %v3839_v51  ;;  %v3858_v51 = vld [vmem:[%s6228_s2 + $0xcc] ss:$24 sps:$4 sm:$0xff]  }
 0x751   :  { %2149 = vmatprep.subr.bf16.mxu1 %v3840_v63  ;;  %v3859_v63 = vld [vmem:[%s6228_s2 + $0xc8] ss:$24 sps:$4 sm:$0xff]  }
 0x753   :  { %2055 = vmatpush1.bf16.msra.mxu0 %v5410_v12 }
 0x754   :  { %2056 = vmatprep.subr.bf16.mxu0 %v5535_v18  ;;  %2150 = vmatpush1.bf16.msra.mxu1 %v3841_v9  ;;  %v3860_v9 = vld [vmem:[%s6228_s2 + $0xfc] ss:$24 sps:$4 sm:$0xff]  }
 0x755   :  { %2151 = vmatprep.subr.bf16.mxu1 %v3842_v21  ;;  %v3861_v21 = vld [vmem:[%s6228_s2 + $0xf8] ss:$24 sps:$4 sm:$0xff]  }
 0x757   :  { %2057 = vmatpush1.bf16.msra.mxu0 %v5543_v25 }
 0x758   :  { %2058 = vmatprep.subr.bf16.mxu0 %v5549_v48  ;;  %2152 = vmatpush1.bf16.msra.mxu1 %v3843_v22  ;;  %v3862_v22 = vld [vmem:[%s6228_s2 + $0x12c] ss:$24 sps:$4 sm:$0xff]  }
 0x759   :  { %2153 = vmatprep.subr.bf16.mxu1 %v3844_v61  ;;  %v3863_v61 = vld [vmem:[%s6228_s2 + $0x128] ss:$24 sps:$4 sm:$0xff]  }
 0x75b   :  { %2059 = vmatpush1.bf16.msra.mxu0 %v5557_v35 }
 0x75c   :  { %2060 = vmatprep.subr.bf16.mxu0 %v5563_v36  ;;  %2154 = vmatpush1.bf16.msra.mxu1 %v3845_v11  ;;  %v3864_v11 = vld [vmem:[%s6228_s2 + $0x15c] ss:$24 sps:$4 sm:$0xff]  }
 0x75d   :  { %2155 = vmatprep.subr.bf16.mxu1 %v3846_v14  ;;  %v3865_v14 = vld [vmem:[%s6228_s2 + $0x158] ss:$24 sps:$4 sm:$0xff]  }
 0x75f   :  { %2061 = vmatpush1.bf16.msra.mxu0 %v5571_v19 }
 0x760   :  { %2062 = vmatprep.subr.bf16.mxu0 %v5577_v55  ;;  %2156 = vmatpush1.bf16.msra.mxu1 %v3847_v60  ;;  %v3866_v60 = vld [vmem:[%s6228_s2 + $0x18c] ss:$24 sps:$4 sm:$0xff]  }
 0x761   :  { %2157 = vmatprep.subr.bf16.mxu1 %v3848_v41  ;;  %v3867_v41 = vld [vmem:[%s6228_s2 + $0x188] ss:$24 sps:$4 sm:$0xff]  }
 0x763   :  { %2063 = vmatpush1.bf16.msra.mxu0 %v5585_v7 }
 0x764   :  { %2064 = vmatprep.subr.bf16.mxu0 %v5591_v4  ;;  %2158 = vmatpush1.bf16.msra.mxu1 %v3849_v49  ;;  %v3868_v49 = vld [vmem:[%s6228_s2 + $0x1bc] ss:$24 sps:$4 sm:$0xff]  }
 0x765   :  { %2159 = vmatprep.subr.bf16.mxu1 %v5120_v52  ;;  %v6735_v52 = vld [vmem:[#allocation16_spill] sm:$0xff] }
 0x767   :  { %2065 = vmatpush1.bf16.msra.mxu0 %v5599_v20 }
 0x768   :  { %2066 = vmatprep.subr.bf16.mxu0 %v5605_v23  ;;  %2160 = vmatpush1.bf16.msra.mxu1 %v5128_v39  ;;  %v6736_v39 = vld [vmem:[#allocation17_spill] sm:$0xff] }
 0x769   :  { %2161 = vmatprep.subr.bf16.mxu1 %v5134_v44  ;;  %v6737_v44 = vld [vmem:[#allocation50_spill] sm:$0xff] }
 0x76b   :  { %2067 = vmatpush1.bf16.msra.mxu0 %v5613_v32 }
 0x76c   :  { %2068 = vmatprep.subr.bf16.mxu0 %v5619_v24  ;;  %2162 = vmatpush1.bf16.msra.mxu1 %v5142_v16  ;;  %v6738_v16 = vld [vmem:[#allocation43_spill] sm:$0xff] }
 0x76d   :  { %2163 = vmatprep.subr.bf16.mxu1 %v5148_v8  ;;  %v6739_v8 = vld [vmem:[#allocation18_spill] sm:$0xff] }
 0x76f   :  { %2069 = vmatpush1.bf16.msra.mxu0 %v5627_v26 }
 0x770   :  { %2070 = vmatprep.subr.bf16.mxu0 %v5633_v40  ;;  %2164 = vmatpush1.bf16.msra.mxu1 %v5156_v53  ;;  %v6740_v53 = vld [vmem:[#allocation19_spill] sm:$0xff] }
 0x771   :  { %2165 = vmatprep.subr.bf16.mxu1 %v5162_v10  ;;  %v6741_v10 = vld [vmem:[#allocation69_spill] sm:$0xff] }
 0x773   :  { %2071 = vmatpush1.bf16.msra.mxu0 %v5641_v45 }
 0x774   :  { %2072 = vmatprep.subr.bf16.mxu0 %v5647_v3  ;;  %2166 = vmatpush1.bf16.msra.mxu1 %v5170_v2  ;;  %v6742_v2 = vld [vmem:[#allocation70_spill] sm:$0xff] }
 0x775   :  { %2167 = vmatprep.subr.bf16.mxu1 %v5176_v54  ;;  %v6743_v54 = vld [vmem:[#allocation22_spill] sm:$0xff] }
 0x777   :  { %2073 = vmatpush1.bf16.msra.mxu0 %v5655_v17 }
 0x778   :  { %2074 = vmatprep.subr.bf16.mxu0 %v5661_v33  ;;  %2168 = vmatpush1.bf16.msra.mxu1 %v5184_v57  ;;  %v6744_v57 = vld [vmem:[#allocation23_spill] sm:$0xff] }
 0x779   :  { %2169 = vmatprep.subr.bf16.mxu1 %v5190_v58  ;;  %v6745_v58 = vld [vmem:[#allocation14_spill] sm:$0xff] }
 0x77b   :  { %2075 = vmatpush1.bf16.msra.mxu0 %v5669_v31 }
 0x77c   :  { %2076 = vmatprep.subr.bf16.mxu0 %v5675_v34  ;;  %2170 = vmatpush1.bf16.msra.mxu1 %v6640_v0  ;;  %v3850_v0 = vld [vmem:[%s6228_s2 + $0xc] ss:$24 sps:$4 sm:$0xff]  }
 0x77d   :  { %2171 = vmatprep.subr.bf16.mxu1 %v6641_v56  ;;  %v6746_v56 = vld [vmem:[#allocation26_spill] sm:$0xff] }
 0x77f   :  { %2077 = vmatpush1.bf16.msra.mxu0 %v5683_v1 }
 0x780   :  { %2078 = vmatprep.subr.bf16.mxu0 %v5689_v59  ;;  %2172 = vmatpush1.bf16.msra.mxu1 %v6735_v52  ;;  %v6748_v52 = vld [vmem:[#allocation29_spill] sm:$0xff] }
 0x781   :  { %2173 = vmatprep.subr.bf16.mxu1 %v6736_v39  ;;  %v6749_v39 = vld [vmem:[#allocation37_spill] sm:$0xff] }
 0x783   :  { %2079 = vmatpush1.bf16.msra.mxu0 %v6737_v44 }
 0x784   :  { %2080 = vmatprep.subr.bf16.mxu0 %v6738_v16  ;;  %2174 = vmatpush1.bf16.msra.mxu1 %v6739_v8  ;;  %v6750_v8 = vld [vmem:[#allocation38_spill] sm:$0xff] }
 0x785   :  { %2175 = vmatprep.subr.bf16.mxu1 %v6740_v53  ;;  %v6751_v53 = vld [vmem:[#allocation52_spill] sm:$0xff] }
 0x787   :  { %2081 = vmatpush1.bf16.msra.mxu0 %v6741_v10 }
 0x788   :  { %2082 = vmatprep.subr.bf16.mxu0 %v6742_v2  ;;  %2176 = vmatpush1.bf16.msra.mxu1 %v6743_v54  ;;  %v6752_v54 = vld [vmem:[#allocation41_spill] sm:$0xff] }
 0x789   :  { %2177 = vmatprep.subr.bf16.mxu1 %v6744_v57  ;;  %v6753_v57 = vld [vmem:[#allocation71_spill] sm:$0xff] }
 0x78b   :  { %2083 = vmatpush1.bf16.msra.mxu0 %v6745_v58 }
 0x78c   :  { %2188 = vmatprep.subr.bf16.mxu0 %v3850_v0  ;;  %2178 = vmatpush1.bf16.msra.mxu1 %v6746_v56  ;;  %v6754_v0 = vld [vmem:[#allocation72_spill] sm:$0xff] }
 0x78d   :  { %2229 = vmatprep.subr.bf16.mxu1 %v6747_v6  ;;  %v6755_v56 = vld [vmem:[#allocation84_spill] sm:$0xff]  ;;  %v6756_v6 = vld [vmem:[#allocation85_spill] sm:$0xff] }
 0x78e   :  { %2085 = vmatmul.mubr.bf16.vlgmr.msra.gmra.mrb[64].mxu0 %v5784_v43  ;;  %v3857_v43 = vld [vmem:[%s6228_s2 + $0x98] ss:$24 sps:$4 sm:$0xff]  }
 0x78f   :  { %2189 = vmatpush1.bf16.msra.mxu0 %v3851_v38  ;;  %v6757_v38 = vld [vmem:[#allocation86_spill] sm:$0xff] }
 0x790   :  { %2190 = vmatprep.subr.bf16.mxu0 %v3852_v30  ;;  %v6758_v30 = vld [vmem:[#allocation87_spill] sm:$0xff] }
 0x793   :  { %2191 = vmatpush1.bf16.msra.mxu0 %v3853_v47  ;;  %v6759_v47 = vld [vmem:[#allocation88_spill] sm:$0xff] }
 0x794   :  { %2192 = vmatprep.subr.bf16.mxu0 %v3854_v37  ;;  %v6760_v37 = vld [vmem:[#allocation89_spill] sm:$0xff] }
 0x797   :  { %2193 = vmatpush1.bf16.msra.mxu0 %v3855_v13 }
 0x798   :  { %2194 = vmatprep.subr.bf16.mxu0 %v3856_v5 }
 0x79b   :  { %2195 = vmatpush1.bf16.msra.mxu0 %v3857_v43  ;;  %v6761_v43 = vld [vmem:[#allocation53_spill] sm:$0xff] }
 0x79c   :  { %2196 = vmatprep.subr.bf16.mxu0 %v3858_v51 }
 0x79f   :  { %2197 = vmatpush1.bf16.msra.mxu0 %v3859_v63 }
 0x7a0   :  { %2198 = vmatprep.subr.bf16.mxu0 %v3860_v9 }
 0x7a3   :  { %2199 = vmatpush1.bf16.msra.mxu0 %v3861_v21  ;;  %v6762_v21 = vld [vmem:[#allocation55_spill] sm:$0xff] }
 0x7a4   :  { %2200 = vmatprep.subr.bf16.mxu0 %v3862_v22 }
 0x7a7   :  { %2201 = vmatpush1.bf16.msra.mxu0 %v3863_v61  ;;  %v6763_v61 = vld [vmem:[#allocation36_spill] sm:$0xff] }
 0x7a8   :  { %2202 = vmatprep.subr.bf16.mxu0 %v3864_v11 }
 0x7ab   :  { %2203 = vmatpush1.bf16.msra.mxu0 %v3865_v14 }
 0x7ac   :  { %2204 = vmatprep.subr.bf16.mxu0 %v3866_v60 }
 0x7af   :  { %2205 = vmatpush1.bf16.msra.mxu0 %v3867_v41 }
 0x7b0   :  { %2206 = vmatprep.subr.bf16.mxu0 %v3868_v49 }
 0x7b3   :  { %2207 = vmatpush1.bf16.msra.mxu0 %v6748_v52 }
 0x7b4   :  { %2208 = vmatprep.subr.bf16.mxu0 %v6749_v39 }
 0x7b7   :  { %2209 = vmatpush1.bf16.msra.mxu0 %v6750_v8 }
 0x7b8   :  { %2210 = vmatprep.subr.bf16.mxu0 %v6751_v53 }
 0x7bb   :  { %2211 = vmatpush1.bf16.msra.mxu0 %v6752_v54 }
 0x7bc   :  { %2212 = vmatprep.subr.bf16.mxu0 %v6753_v57 }
 0x7bf   :  { %2213 = vmatpush1.bf16.msra.mxu0 %v6754_v0 }
 0x7c0   :  { %2214 = vmatprep.subr.bf16.mxu0 %v6755_v56 }
 0x7c3   :  { %2215 = vmatpush1.bf16.msra.mxu0 %v6756_v6  ;;  %v6764_v6 = vld [vmem:[#allocation58_spill] sm:$0xff] }
 0x7c4   :  { %2216 = vmatprep.subr.bf16.mxu0 %v6757_v38 }
 0x7c7   :  { %2217 = vmatpush1.bf16.msra.mxu0 %v6758_v30 }
 0x7c8   :  { %2218 = vmatprep.subr.bf16.mxu0 %v6759_v47 }
 0x7cb   :  { %2219 = vmatpush1.bf16.msra.mxu0 %v6760_v37 }
 0x821   :  { %v2004_v13 = vpop.f32.mrb[60].mxu0  ;;  %v2045_v5 = vpop.f32.mrb[48].mxu1 }
 0x822   :  { %v2095_v51 = vadd.f32 %v2004_v13, %v6761_v43  ;;  %v2006_v63 = vpop.f32.mrb[61].mxu0  ;;  %v2047_v9 = vpop.f32.mrb[49].mxu1  ;;  %v2093_v57 = vadd.f32 %v5367_v28, %v2045_v5  ;;  %v6765_v5 = vld [vmem:[#allocation62_spill] sm:$0xff] }
 0x823   :  { %v2102_v22 = vadd.f32 %v2006_v63, %v6762_v21  ;;  %v2115_v11 = vadd.f32 %v2047_v9, %v6763_v61  ;;  %v2008_v14 = vpop.f32.mrb[62].mxu0  ;;  %v2049_v60 = vpop.f32.mrb[50].mxu1 }
 0x824   :  { %v3189_v41 = vmul.f32 -1.442695, %v2095_v51  ;;  %v2009_v49 = vpop.f32.mrb[63].mxu0  ;;  %v2050_v52 = vpop.f32.mrb[51].mxu1 }
 0x825   :  { %v3190_v39 = vmul.f32 -1.442695, %v2102_v22  ;;  %v3191_v47 = vmul.f32 -1.442695, %v2115_v11 }
 0x826   :  { %3696 = vpow2.f32 %v3189_v41 }
 0x827   :  { %3698 = vpow2.f32 %v3190_v39  ;;  %v6766_v39 = vld [vmem:[#allocation63_spill] sm:$0xff] }
 0x830   :  { %v3697_v8 = vpop.eup %3696 }
 0x831   :  { %v2099_v53 = vadd.f32 1.0, %v3697_v8  ;;  %v3699_v54 = vpop.eup %3698 }
 0x832   :  { %v2106_v30 = vadd.f32 1.0, %v3699_v54 }
 0x833   :  { %3700 = vrcp.f32 %v2099_v53 }
 0x83d   :  { %v3701_v0 = vpop.eup %3700 }
 0x83e   :  { %v2109_v56 = vmul.f32 %v3701_v0, %v2093_v57 }
 0x840   :  { %v2110_v38 = vadd.f32 %v2109_v56, %v6764_v6 }
 0x842   :  { %3702 = vtanh.f32 %v2110_v38 }
 0x843   :  { %3704 = vrcp.f32 %v2106_v30 }
 0x844   :  { %3706 = vpow2.f32 %v3191_v47 }
 0x84c   :  { %v3703_v37 = vpop.eup %3702 }
 0x84d   :  { %v2112_v13 = vsub.f32 %v5772_v50, %v3703_v37  ;;  %v3705_v43 = vpop.eup %3704 }
 0x84e   :  { %v3707_v9 = vpop.eup %3706 }
 0x84f   :  { %v2113_v51 = vmul.f32 %v3705_v43, %v2112_v13  ;;  %v2119_v21 = vadd.f32 1.0, %v3707_v9  ;;  %v3869_v9 = vld [vmem:[%s6230_s4] ss:$0 sm:$0xff] }
 0x851   :  { %v5950_v63 = vadd.f32 %v3703_v37, %v2113_v51  ;;  %3708 = vrcp.f32 %v2119_v21 }
 0x853   :  { %v2145_v30 = vpack.c.bf16 %v5950_v63, %v5950_v63 }
 0x85b   :  { %v3709_v41 = vpop.eup %3708 }
 0x861   :  { %v2086_v28 = vpop.f32.mrb[64].mxu0 }
 0x862   :  { %v2122_v22 = vadd.f32 %v2086_v28, %v6765_v5  ;;  %v2088_v61 = vpop.f32.mrb[65].mxu0 }
 0x863   :  { %v2094_v14 = vadd.f32 %v5378_v27, %v2088_v61  ;;  %v2090_v60 = vpop.f32.mrb[66].mxu0 }
 0x864   :  { %v3192_v11 = vmul.f32 -1.442695, %v2122_v22  ;;  %v2091_v49 = vpop.f32.mrb[67].mxu0  ;;  %v6770_v22 = vld [vmem:[#allocation59_spill] sm:$0xff] }
 0x865   :  { %v2129_v52 = vmul.f32 %v3709_v41, %v2094_v14 }
 0x866   :  { %3710 = vpow2.f32 %v3192_v11 }
 0x867   :  { %v2130_v8 = vadd.f32 %v2129_v52, %v6766_v39 }
 0x869   :  { %3712 = vtanh.f32 %v2130_v8 }
 0x870   :  { %v3711_v53 = vpop.eup %3710 }
 0x871   :  { %v2126_v54 = vadd.f32 1.0, %v3711_v53 }
 0x873   :  { %3714 = vrcp.f32 %v2126_v54  ;;  %v3713_v57 = vpop.eup %3712 }
 0x874   :  { %v2132_v0 = vsub.f32 %v5778_v29, %v3713_v57 }
 0x87d   :  { %v3715_v56 = vpop.eup %3714 }
 0x87e   :  { %v2133_v6 = vmul.f32 %v3715_v56, %v2132_v0 }
 0x880   :  { %v5956_v38 = vadd.f32 %v3713_v57, %v2133_v6  ;;  %v6771_v57 = vld [vmem:[#allocation60_spill] sm:$0xff]  ;;  %v3870_v6 = vld [vmem:[%s6230_s4 + $0x1] ss:$0 sm:$0xff] }
 0x882   :  { %v2146_v27 = vpack.c.bf16 %v5956_v38, %v5956_v38 }
 0x884   :  { %2179 = vmatprep.mubr.bf16.mxu1 %v2146_v27  ;;  %2220 = vmatprep.mubr.bf16.mxu0 %v2146_v27 }
 0x885   :  { %2180 = vmatmul.mubr.bf16.vlgmr.msra.gmra.mrb[52].mxu1 %v2145_v30  ;;  %2221 = vmatmul.mubr.bf16.vlgmr.msra.gmra.mrb[68].mxu0 %v2145_v30 }
 0x886   :  { %2230 = vmatpush1.bf16.msra.mxu1 %v5396_v46  ;;  %2261 = vmatprep.mubr.bf16.mxu1 %v2146_v27  ;;  %v3524_v46 = vld [vmem:[%s6231_s5 + $0xc0] sm:$0xff]  }
 0x887   :  { %2231 = vmatprep.subr.bf16.mxu1 %v5402_v15  ;;  %v3525_v15 = vld [vmem:[%s6231_s5 + $0x80] sm:$0xff]  }
 0x88a   :  { %2232 = vmatpush1.bf16.msra.mxu1 %v5410_v12  ;;  %v3526_v12 = vld [vmem:[%s6231_s5 + $0xc8] sm:$0xff]  }
 0x88b   :  { %2233 = vmatprep.subr.bf16.mxu1 %v5535_v18  ;;  %v3527_v18 = vld [vmem:[%s6231_s5 + $0x88] sm:$0xff]  }
 0x88e   :  { %2234 = vmatpush1.bf16.msra.mxu1 %v5543_v25  ;;  %v3528_v25 = vld [vmem:[%s6231_s5 + $0xd0] sm:$0xff]  }
 0x88f   :  { %2235 = vmatprep.subr.bf16.mxu1 %v5549_v48  ;;  %v3529_v48 = vld [vmem:[%s6231_s5 + $0x90] sm:$0xff]  }
 0x892   :  { %2236 = vmatpush1.bf16.msra.mxu1 %v5557_v35  ;;  %v3530_v35 = vld [vmem:[%s6231_s5 + $0xd8] sm:$0xff]  }
 0x893   :  { %2237 = vmatprep.subr.bf16.mxu1 %v5563_v36  ;;  %v3531_v36 = vld [vmem:[%s6231_s5 + $0x98] sm:$0xff]  }
 0x896   :  { %2238 = vmatpush1.bf16.msra.mxu1 %v5571_v19  ;;  %v3532_v19 = vld [vmem:[%s6231_s5 + $0xe0] sm:$0xff]  }
 0x897   :  { %2239 = vmatprep.subr.bf16.mxu1 %v5577_v55  ;;  %v3872_v55 = vmov 0.0  }
 0x898   :  { %3331 = vmatprep.subr.bf16.mxu0 %v3872_v55  ;;  %3333 = vmatprep.mubr.msk.bf16.mxu0 %vm3873_vm1, %v3872_v55 }
 0x89a   :  { %2240 = vmatpush1.bf16.msra.mxu1 %v5585_v7  ;;  %v3533_v7 = vld [vmem:[%s6231_s5 + $0xa0] sm:$0xff]  }
 0x89b   :  { %2241 = vmatprep.subr.bf16.mxu1 %v5591_v4  ;;  %v3534_v4 = vld [vmem:[%s6231_s5 + $0xe8] sm:$0xff]  }
 0x89e   :  { %2242 = vmatpush1.bf16.msra.mxu1 %v5599_v20  ;;  %v3535_v20 = vld [vmem:[%s6231_s5 + $0xa8] sm:$0xff]  }
 0x89f   :  { %2243 = vmatprep.subr.bf16.mxu1 %v5605_v23  ;;  %v3536_v23 = vld [vmem:[%s6231_s5 + $0xf0] sm:$0xff]  }
 0x8a2   :  { %2244 = vmatpush1.bf16.msra.mxu1 %v5613_v32  ;;  %v3537_v32 = vld [vmem:[%s6231_s5 + $0xb0] sm:$0xff]  }
 0x8a3   :  { %2245 = vmatprep.subr.bf16.mxu1 %v5619_v24  ;;  %v3538_v24 = vld [vmem:[%s6231_s5 + $0xf8] sm:$0xff]  }
 0x8a6   :  { %2246 = vmatpush1.bf16.msra.mxu1 %v5627_v26  ;;  %v3539_v26 = vld [vmem:[%s6231_s5 + $0xb8] sm:$0xff]  }
 0x8a7   :  { %2247 = vmatprep.subr.bf16.mxu1 %v5633_v40 }
 0x8aa   :  { %2248 = vmatpush1.bf16.msra.mxu1 %v5641_v45 }
 0x8ab   :  { %2249 = vmatprep.subr.bf16.mxu1 %v5647_v3  ;;  %v6767_v3 = vld [vmem:[#allocation56_spill] sm:$0xff] }
 0x8ae   :  { %2250 = vmatpush1.bf16.msra.mxu1 %v5655_v17 }
 0x8af   :  { %2251 = vmatprep.subr.bf16.mxu1 %v5661_v33 }
 0x8b2   :  { %2252 = vmatpush1.bf16.msra.mxu1 %v5669_v31 }
 0x8b3   :  { %2253 = vmatprep.subr.bf16.mxu1 %v5675_v34  ;;  %v6768_v34 = vld [vmem:[#allocation57_spill] sm:$0xff] }
 0x8b6   :  { %2254 = vmatpush1.bf16.msra.mxu1 %v5683_v1 }
 0x8b7   :  { %2255 = vmatprep.subr.bf16.mxu1 %v5689_v59  ;;  %v6769_v59 = vld [vmem:[#allocation34_spill] sm:$0xff] }
 0x8ba   :  { %2256 = vmatpush1.bf16.msra.mxu1 %v6737_v44 }
 0x8bb   :  { %2257 = vmatprep.subr.bf16.mxu1 %v6738_v16 }
 0x8be   :  { %2258 = vmatpush1.bf16.msra.mxu1 %v6741_v10 }
 0x8bf   :  { %2259 = vmatprep.subr.bf16.mxu1 %v6742_v2 }
 0x8c2   :  { %2260 = vmatpush1.bf16.msra.mxu1 %v6745_v58 }
 0x8c3   :  { %3282 = vmatprep.subr.bf16.mxu1 %v3524_v46 }
 0x8c5   :  { %2262 = vmatmul.mubr.bf16.vlgmr.msra.gmra.mrb[56].mxu1 %v2145_v30 }
 0x8c6   :  { %3283 = vmatpush3.bf16.msra.mxu1 %v3525_v15 }
 0x8c7   :  { %3284 = vmatprep.subr.bf16.mxu1 %v3526_v12 }
 0x8ca   :  { %3285 = vmatpush3.bf16.msra.mxu1 %v3527_v18 }
 0x8cb   :  { %3286 = vmatprep.subr.bf16.mxu1 %v3528_v25  ;;  %v6772_v25 = vld [vmem:[#allocation61_spill] sm:$0xff] }
 0x8ce   :  { %3287 = vmatpush3.bf16.msra.mxu1 %v3529_v48 }
 0x8cf   :  { %3288 = vmatprep.subr.bf16.mxu1 %v3530_v35 }
 0x8d2   :  { %3289 = vmatpush3.bf16.msra.mxu1 %v3531_v36 }
 0x8d3   :  { %3290 = vmatprep.subr.bf16.mxu1 %v3532_v19  ;;  %v6773_v19 = vld [vmem:[#allocation68_spill] sm:$0xff] }
 0x8d6   :  { %3291 = vmatpush3.bf16.msra.mxu1 %v3533_v7  ;;  %v6774_v7 = vld [vmem:[#allocation4_spill] sm:$0xff] }
 0x8d7   :  { %3292 = vmatprep.subr.bf16.mxu1 %v3534_v4  ;;  %v1252_v4 = vadd.f32 %v6774_v7, %v6773_v19 }
 0x8da   :  { %3293 = vmatpush3.bf16.msra.mxu1 %v3535_v20  ;;  %v6775_v20 = vld [vmem:[#allocation12_spill] sm:$0xff] }
 0x8db   :  { %3294 = vmatprep.subr.bf16.mxu1 %v3536_v23  ;;  %v1429_v23 = vadd.f32 %v6775_v20, %v1252_v4  ;;  %v3550_v4 = vld [vmem:[%s6231_s5 + $0x68] sm:$0xff]  }
 0x8de   :  { %3295 = vmatpush3.bf16.msra.mxu1 %v3537_v32  ;;  %v6776_v32 = vld [vmem:[#allocation74_spill] sm:$0xff] }
 0x8df   :  { %3296 = vmatprep.subr.bf16.mxu1 %v3538_v24  ;;  %v6777_v24 = vld [vmem:[#allocation5_spill] sm:$0xff] }
 0x8e2   :  { %3297 = vmatpush3.bf16.msra.mxu1 %v3539_v26  ;;  %v1253_v26 = vadd.f32 %v6777_v24, %v6776_v32 }
 0x8e3   :  { %3343 = vmatprep.subr.bf16.mxu1 %v3872_v55 }
 0x958   :  { %v2181_v40 = vpop.f32.mrb[52].mxu1  ;;  %v2222_v45 = vpop.f32.mrb[68].mxu0 }
 0x959   :  { %v2272_v17 = vadd.f32 %v2181_v40, %v6767_v3  ;;  %v2183_v33 = vpop.f32.mrb[53].mxu1  ;;  %v2224_v31 = vpop.f32.mrb[69].mxu0  ;;  %v2270_v21 = vadd.f32 %v3869_v9, %v2222_v45  ;;  %v6778_v40 = vld [vmem:[#allocation39_spill] sm:$0xff]  ;;  %v6779_v3 = vld [vmem:[#allocation13_spill] sm:$0xff]  ;;  %v1251_v9 = vmax.f32 %v6776_v32, %v6777_v24  ;;  %v3551_v24 = vld [vmem:[%s6231_s5 + $0x28] sm:$0xff]  }
 0x95a   :  { %v2279_v1 = vadd.f32 %v2183_v33, %v6768_v34  ;;  %v2292_v44 = vadd.f32 %v2224_v31, %v6769_v59  ;;  %v2185_v16 = vpop.f32.mrb[54].mxu1  ;;  %v2226_v10 = vpop.f32.mrb[70].mxu0  ;;  %v1606_v45 = vadd.f32 %v6778_v40, %v1429_v23  ;;  %v6780_v31 = vlaneseq }
 0x95b   :  { %v3193_v2 = vmul.f32 -1.442695, %v2272_v17  ;;  %v2186_v58 = vpop.f32.mrb[55].mxu1  ;;  %v2227_v47 = vpop.f32.mrb[71].mxu0  ;;  %v1430_v17 = vadd.f32 %v6779_v3, %v1253_v26  ;;  %v6782_v16 = vld [vmem:[#allocation40_spill] sm:$0xff]  ;;  %v1250_v23 = vmax.f32 %v6773_v19, %v6774_v7  ;;  %v3552_v26 = vld [vmem:[%s6231_s5 + $0x70] sm:$0xff]  }
 0x95c   :  { %v3194_v37 = vmul.f32 -1.442695, %v2279_v1  ;;  %v3195_v60 = vmul.f32 -1.442695, %v2292_v44  ;;  %v2320_v34 = vand.u32 127, %v6780_v31  ;;  %v6781_v1 = vld [vmem:[#allocation31_spill] sm:$0xff]  ;;  %v1783_v44 = vadd.f32 %v5511_v62, %v1606_v45 }
 0x95d   :  { %3716 = vpow2.f32 %v3193_v2  ;;  %v2321_v59 = vmul.u32 2, %v6781_v1  ;;  %v1607_v10 = vadd.f32 %v6782_v16, %v1430_v17  ;;  %v1427_v32 = vmax.f32 %v1250_v23, %v6775_v20  ;;  %v3553_v19 = vld [vmem:[%s6231_s5 + $0x30] sm:$0xff]   ;;  %v3554_v7 = vld [vmem:[%s6231_s5 + $0x78] sm:$0xff]   ;;  %v3557_v31 = vld [vmem:[%s6231_s5 + $0x100] sm:$0xff]  }
 0x95e   :  { %3718 = vpow2.f32 %v3194_v37  ;;  %v1960_v2 = vadd.f32 %v5772_v50, %v1783_v44  ;;  %v3561_v1 = vld [vmem:[%s6231_s5 + $0x110] sm:$0xff]   ;;  %v3563_v44 = vld [vmem:[%s6231_s5 + $0x118] sm:$0xff]  }
 0x95f   :  { %v1784_v47 = vadd.f32 %v5517_v42, %v1607_v10  ;;  %vm2322_vm2 = vcmp.eq.s32.totalorder %v2320_v34, %v2321_v59  ;;  %v1604_v45 = vmax.f32 %v1427_v32, %v6778_v40  ;;  %v3555_v40 = vld [vmem:[%s6231_s5 + $0x38] sm:$0xff]   ;;  %v3565_v10 = vld [vmem:[%s6231_s5 + $0x120] sm:$0xff]  }
 0x960   :  { %v3250_v32 = vld [vmem:[%s6234_s8] ss:$0 sm:$0xff] }
 0x967   :  { %v3717_v13 = vpop.eup %3716 }
 0x968   :  { %v2276_v43 = vadd.f32 1.0, %v3717_v13  ;;  %v3719_v51 = vpop.eup %3718  ;;  %v2137_v13 = vadd.f32 %v5950_v63, %v1960_v2  ;;  %v3566_v2 = vld [vmem:[%s6231_s5 + $0x168] sm:$0xff]  }
 0x969   :  { %v2283_v14 = vadd.f32 1.0, %v3719_v51  ;;  %v1961_v51 = vadd.f32 %v5778_v29, %v1784_v47  ;;  %v3568_v47 = vld [vmem:[%s6231_s5 + $0x170] sm:$0xff]  }
 0x96a   :  { %3720 = vrcp.f32 %v2276_v43 }
 0x974   :  { %v3721_v28 = vpop.eup %3720 }
 0x975   :  { %v2286_v5 = vmul.f32 %v3721_v28, %v2270_v21 }
 0x977   :  { %v2287_v61 = vadd.f32 %v2286_v5, %v6770_v22  ;;  %v3197_v5 = vsel %vm2322_vm2, 1.0, %v3872_v55  ;;  %v2138_v22 = vadd.f32 %v5956_v38, %v1961_v51  ;;  %v3572_v51 = vld [vmem:[%s6232_s7] sm:$0xff]  }
 0x979   :  { %3722 = vtanh.f32 %v2287_v61  ;;  %v1428_v61 = vmax.f32 %v1251_v9, %v6779_v3  ;;  %v1781_v3 = vmax.f32 %v1604_v45, %v5511_v62  ;;  %v3573_v9 = vld [vmem:[%s6232_s7 + $0x8] sm:$0xff]  }
 0x97a   :  { %3724 = vrcp.f32 %v2283_v14  ;;  %v2326_v14 = vadd.s32 1, %v2321_v59  ;;  %v3562_v59 = vld [vmem:[%s6231_s5 + $0x158] sm:$0xff]  }
 0x97b   :  { %3726 = vpow2.f32 %v3195_v60  ;;  %v1958_v20 = vmax.f32 %v1781_v3, %v5772_v50 }
 0x97c   :  { %vm2327_vm4 = vcmp.eq.s32.totalorder %v2320_v34, %v2326_v14  ;;  %v3560_v34 = vld [vmem:[%s6231_s5 + $0x150] sm:$0xff]  }
 0x97d   :  { %v2135_v17 = vmax.f32 %v1958_v20, %v5950_v63 }
 0x983   :  { %v3723_v41 = vpop.eup %3722 }
 0x984   :  { %v2289_v11 = vsub.f32 %v5950_v63, %v3723_v41  ;;  %v3725_v49 = vpop.eup %3724  ;;  %v3558_v63 = vld [vmem:[%s6231_s5 + $0x148] sm:$0xff]  }
 0x985   :  { %v3727_v8 = vpop.eup %3726 }
 0x986   :  { %v2290_v52 = vmul.f32 %v3725_v49, %v2289_v11  ;;  %v2296_v53 = vadd.f32 1.0, %v3727_v8  ;;  %v1605_v11 = vmax.f32 %v1428_v61, %v6782_v16  ;;  %v2325_v49 = vpack.c.bf16 %v3197_v5, %v3197_v5  ;;  %v3564_v16 = vld [vmem:[%s6231_s5 + $0x160] sm:$0xff]  }
 0x988   :  { %v6053_v39 = vadd.f32 %v3723_v41, %v2290_v52  ;;  %3728 = vrcp.f32 %v2296_v53  ;;  %v1782_v53 = vmax.f32 %v1605_v11, %v5517_v42 }
 0x98a   :  { %v2314_v21 = vadd.f32 %v6053_v39, %v2137_v13  ;;  %v2312_v62 = vmax.f32 %v2135_v17, %v6053_v39  ;;  %v3570_v13 = vld [vmem:[%s6231_s5 + $0x178] sm:$0xff]  }
 0x98c   :  { %v2418_v52 = vmul.f32 0.125, %v2314_v21  ;;  %v2420_v50 = vpack.c.bf16 %v2312_v62, %v2312_v62 }
 0x992   :  { %v3729_v46 = vpop.eup %3728 }
 0x998   :  { %v2263_v54 = vpop.f32.mrb[56].mxu1 }
 0x999   :  { %v2299_v0 = vadd.f32 %v2263_v54, %v6771_v57  ;;  %v2265_v56 = vpop.f32.mrb[57].mxu1  ;;  %v3540_v57 = vld [vmem:[%s6231_s5 + $0x40] sm:$0xff]  }
 0x99a   :  { %v2271_v27 = vadd.f32 %v3870_v6, %v2265_v56  ;;  %v2267_v30 = vpop.f32.mrb[58].mxu1  ;;  %v2422_v56 = vpack.c.bf16 %v2418_v52, %v2418_v52  ;;  %v3198_v6 = vsel %vm2327_vm4, 1.0, %v3872_v55 }
 0x99b   :  { %v3196_v15 = vmul.f32 -1.442695, %v2299_v0  ;;  %v2268_v12 = vpop.f32.mrb[59].mxu1  ;;  %v1959_v0 = vmax.f32 %v1782_v53, %v5778_v29  ;;  %v2330_v30 = vpack.c.bf16 %v3198_v6, %v3198_v6  ;;  %v3541_v29 = vld [vmem:[%s6231_s5] sm:$0xff]  }
 0x99c   :  { %v2306_v18 = vmul.f32 %v3729_v46, %v2271_v27  ;;  %v3542_v46 = vld [vmem:[%s6231_s5 + $0x48] sm:$0xff]   ;;  %v3544_v12 = vld [vmem:[%s6231_s5 + $0x50] sm:$0xff]  }
 0x99d   :  { %3730 = vpow2.f32 %v3196_v15  ;;  %v2136_v27 = vmax.f32 %v1959_v0, %v5956_v38 }
 0x99e   :  { %v2307_v48 = vadd.f32 %v2306_v18, %v6772_v25  ;;  %v3545_v18 = vld [vmem:[%s6231_s5 + $0x10] sm:$0xff]   ;;  %v3546_v25 = vld [vmem:[%s6231_s5 + $0x58] sm:$0xff]  }
 0x9a0   :  { %3732 = vtanh.f32 %v2307_v48  ;;  %v3547_v48 = vld [vmem:[%s6231_s5 + $0x18] sm:$0xff]  }
 0x9a7   :  { %v3731_v35 = vpop.eup %3730 }
 0x9a8   :  { %v2303_v36 = vadd.f32 1.0, %v3731_v35  ;;  %v3548_v35 = vld [vmem:[%s6231_s5 + $0x60] sm:$0xff]  }
 0x9aa   :  { %3734 = vrcp.f32 %v2303_v36  ;;  %v3733_v33 = vpop.eup %3732  ;;  %v3549_v36 = vld [vmem:[%s6231_s5 + $0x20] sm:$0xff]  }
 0x9ab   :  { %v2309_v58 = vsub.f32 %v5956_v38, %v3733_v33  ;;  %v3543_v38 = vld [vmem:[%s6231_s5 + $0x8] sm:$0xff]  }
 0x9b4   :  { %v3735_v37 = vpop.eup %3734 }
 0x9b5   :  { %v2310_v43 = vmul.f32 %v3735_v37, %v2309_v58  ;;  %v3567_v58 = vld [vmem:[%s6231_s5 + $0x128] sm:$0xff]   ;;  %v3569_v37 = vld [vmem:[%s6231_s5 + $0x130] sm:$0xff]  }
 0x9b7   :  { %v2311_v28 = vadd.f32 %v3733_v33, %v2310_v43  ;;  %v3556_v33 = vld [vmem:[%s6231_s5 + $0x140] sm:$0xff]   ;;  %v3571_v43 = vld [vmem:[%s6231_s5 + $0x138] sm:$0xff]  }
 0x9b9   :  { %v2316_v60 = vpack.c.bf16 %v2311_v28, %v6053_v39  ;;  %v2315_v41 = vadd.f32 %v2311_v28, %v2138_v22  ;;  %v2313_v42 = vmax.f32 %v2136_v27, %v2311_v28  ;;  %v3559_v39 = vld [vmem:[%s6231_s5 + $0x108] sm:$0xff]  }
 0x9bb   :  { %3332 = vmatpush3.bf16.msra.mxu0 %v2316_v60  ;;  %v2419_v8 = vmul.f32 0.125, %v2315_v41  ;;  %v2421_v15 = vpack.c.bf16 %v2313_v42, %v2313_v42 }
 0x9bc   :  { %3337 = vmatprep.subr.bf16.mxu0 %v3872_v55 }
 0x9bd   :  { %v2423_v54 = vpack.c.bf16 %v2419_v8, %v2419_v8 }
 0x9be   :  { %3334 = vmatmul.mubr.msk.bf16.vlgmr.msra.gmra.mrb[72].mxu0 %vm2331_vm3, %v2325_v49 }
 0x9bf   :  { %3338 = vmatpush3.bf16.msra.mxu0 %v2316_v60  ;;  %2889 = vmatprep.mubr.bf16.mxu1 %v2423_v54 }
 0x9c0   :  { %2890 = vmatmul.mubr.bf16.vlgmr.msra.gmra.mrb[60].mxu1 %v2422_v56  ;;  %3339 = vmatprep.mubr.msk.bf16.mxu0 %vm3873_vm1, %v3872_v55  ;;  %v3201_v56 = vld [vmem:[%s6233_s6] ss:$0 sm:$0xff] }
 0x9c1   :  { %3260 = vmatprep.subr.bf16.mxu0 %v3540_v57  ;;  %3351 = vmatprep.mubr.msk.bf16.mxu1 %vm3873_vm1, %v3872_v55 }
 0x9c2   :  { %3344 = vmatpush3.bf16.msra.mxu1 %v3572_v51 }
 0x9c3   :  { %3345 = vmatprep.subr.bf16.mxu1 %v3872_v55 }
 0x9c6   :  { %3340 = vmatmul.mubr.msk.bf16.vlgmr.msra.gmra.mrb[76].mxu0 %vm2331_vm3, %v2330_v30  ;;  %3346 = vmatpush3.bf16.msra.mxu1 %v3573_v9 }
 0x9c7   :  { %3261 = vmatpush3.bf16.msra.mxu0 %v3541_v29  ;;  %2849 = vmatprep.mubr.bf16.mxu0 %v2421_v15  ;;  %v3574_v15 = vld [vmem:[%s6232_s7 + $0x10] sm:$0xff]  }
 0x9c8   :  { %3262 = vmatprep.subr.bf16.mxu0 %v3542_v46  ;;  %3347 = vmatprep.subr.bf16.mxu1 %v3872_v55 }
 0x9ca   :  { %3348 = vmatpush3.bf16.msra.mxu1 %v3574_v15 }
 0x9cb   :  { %3263 = vmatpush3.bf16.msra.mxu0 %v3543_v38  ;;  %3349 = vmatprep.subr.bf16.mxu1 %v3872_v55  ;;  %v3575_v38 = vld [vmem:[%s6232_s7 + $0x18] sm:$0xff]  }
 0x9cc   :  { %3264 = vmatprep.subr.bf16.mxu0 %v3544_v12 }
 0x9ce   :  { %3350 = vmatpush3.bf16.msra.mxu1 %v3575_v38 }
 0x9cf   :  { %3265 = vmatpush3.bf16.msra.mxu0 %v3545_v18 }
 0x9d0   :  { %3266 = vmatprep.subr.bf16.mxu0 %v3546_v25 }
 0x9d3   :  { %3267 = vmatpush3.bf16.msra.mxu0 %v3547_v48 }
 0x9d4   :  { %3268 = vmatprep.subr.bf16.mxu0 %v3548_v35 }
 0x9d7   :  { %3269 = vmatpush3.bf16.msra.mxu0 %v3549_v36 }
 0x9d8   :  { %3270 = vmatprep.subr.bf16.mxu0 %v3550_v4 }
 0x9db   :  { %3271 = vmatpush3.bf16.msra.mxu0 %v3551_v24 }
 0x9dc   :  { %3272 = vmatprep.subr.bf16.mxu0 %v3552_v26 }
 0x9df   :  { %3273 = vmatpush3.bf16.msra.mxu0 %v3553_v19 }
 0x9e0   :  { %3274 = vmatprep.subr.bf16.mxu0 %v3554_v7 }
 0x9e3   :  { %3275 = vmatpush3.bf16.msra.mxu0 %v3555_v40 }
 0x9e4   :  { %3304 = vmatprep.subr.bf16.mxu0 %v3556_v33 }
 0x9e6   :  { %2850 = vmatmul.mubr.bf16.vlgmr.msra.gmra.mrb[80].mxu0 %v2420_v50 }
 0x9e7   :  { %3305 = vmatpush3.bf16.msra.mxu0 %v3557_v31 }
 0x9e8   :  { %3306 = vmatprep.subr.bf16.mxu0 %v3558_v63 }
 0x9eb   :  { %3307 = vmatpush3.bf16.msra.mxu0 %v3559_v39 }
 0x9ec   :  { %3308 = vmatprep.subr.bf16.mxu0 %v3560_v34 }
 0x9ef   :  { %3309 = vmatpush3.bf16.msra.mxu0 %v3561_v1 }
 0x9f0   :  { %3310 = vmatprep.subr.bf16.mxu0 %v3562_v59 }
 0x9f3   :  { %3311 = vmatpush3.bf16.msra.mxu0 %v3563_v44 }
 0x9f4   :  { %3312 = vmatprep.subr.bf16.mxu0 %v3564_v16 }
 0x9f7   :  { %3313 = vmatpush3.bf16.msra.mxu0 %v3565_v10 }
 0x9f8   :  { %3314 = vmatprep.subr.bf16.mxu0 %v3566_v2 }
 0x9fb   :  { %3315 = vmatpush3.bf16.msra.mxu0 %v3567_v58 }
 0x9fc   :  { %3316 = vmatprep.subr.bf16.mxu0 %v3568_v47 }
 0x9ff   :  { %3317 = vmatpush3.bf16.msra.mxu0 %v3569_v37 }
 0xa00   :  { %3318 = vmatprep.subr.bf16.mxu0 %v3570_v13 }
 0xa03   :  { %3319 = vmatpush3.bf16.msra.mxu0 %v3571_v43 }
 0xa91   :  { %v2369_v21 = vpop.f32.mrb[72].mxu0 }
 0xa92   :  { %v3335_v28 = vpop.f32.mrb[73].mxu0  ;;  %v2424_v53 = vpack.c.bf16 %v2369_v21, %v2369_v21 }
 0xa93   :  { %v3298_v5 = vpop.f32.mrb[60].mxu1  ;;  %v2372_v22 = vpop.f32.mrb[74].mxu0 }
 0xa94   :  { %v3299_v61 = vpop.f32.mrb[61].mxu1  ;;  %v3336_v14 = vpop.f32.mrb[75].mxu0 }
 0xa95   :  { %v3300_v60 = vadd.f32 %v3299_v61, %v3298_v5  ;;  %v3301_v41 = vpop.f32.mrb[62].mxu1 }
 0xa96   :  { %v3302_v11 = vpop.f32.mrb[63].mxu1 }
 0xa99   :  { %v2412_v49 = vpop.f32.mrb[76].mxu0 }
 0xa9a   :  { %v2425_v52 = vpack.c.bf16 %v2412_v49, %v2412_v49  ;;  %v3341_v8 = vpop.f32.mrb[77].mxu0 }
 0xa9b   :  { %v2415_v54 = vpop.f32.mrb[78].mxu0 }
 0xa9c   :  { %2929 = vmatprep.mubr.bf16.mxu0 %v2425_v52  ;;  %v3342_v57 = vpop.f32.mrb[79].mxu0 }
 0xa9d   :  { %2930 = vmatmul.mubr.bf16.vlgmr.msra.gmra.mrb[84].mxu0 %v2424_v53 }
 0xab9   :  { %v3276_v0 = vpop.f32.mrb[80].mxu0 }
 0xaba   :  { %v3277_v6 = vpop.f32.mrb[81].mxu0 }
 0xabb   :  { %v3278_v27 = vadd.f32 %v3277_v6, %v3276_v0  ;;  %v3279_v42 = vpop.f32.mrb[82].mxu0 }
 0xabc   :  { %v3280_v30 = vpop.f32.mrb[83].mxu0 }
 0xabd   :  { %v2852_v29 = vadd.f32 %v3278_v27, %v3201_v56 }
 0xabf   :  { %v2892_v46 = vadd.f32 %v3300_v60, %v2852_v29 }
 0xb70   :  { %v3320_v12 = vpop.f32.mrb[84].mxu0 }
 0xb71   :  { %v3321_v18 = vpop.f32.mrb[85].mxu0 }
 0xb72   :  { %v3322_v25 = vadd.f32 %v3321_v18, %v3320_v12  ;;  %v3323_v48 = vpop.f32.mrb[86].mxu0 }
 0xb73   :  { %v3324_v35 = vpop.f32.mrb[87].mxu0 }
 0xb74   :  { %v2932_v36 = vadd.f32 %v3322_v25, %v2892_v46 }
 0xb76   :  { %v2937_v4 = vmax.f32 %v2932_v36, 0.0 }
 0xb78   :  { %v2938_v23 = vpack.c.bf16 %v2937_v4, %v2937_v4 }
 0xb7a   :  { %3352 = vmatmul.mubr.msk.bf16.vlgmr.msra.gmra.mrb[64].mxu1 %vm2978_vm5, %v2938_v23 }
 0xc4d   :  { %v3016_v55 = vpop.f32.mrb[64].mxu1 }
 0xc4e   :  { %v3017_v24 = vadd.f32 %v3250_v32, %v3016_v55  ;;  %v3353_v26 = vpop.f32.mrb[65].mxu1 }
 0xc4f   :  { %v3019_v45 = vpop.f32.mrb[66].mxu1 }
 0xc50   :  { %v3354_v3 = vpop.f32.mrb[67].mxu1  ;;  %v3023_v19 = vsel %vm3022_vm6, %v3017_v24, -inf }
 0xc51   :  { %3024 = vmax.xlane.f32.xlu0 %v3023_v19 }
 0xcde   :  { %v3025_v7 = vpop.xlane.xlu0 %3024 }
 0xcdf   :  { %v3026_v20 = vsub.f32 %v3017_v24, %v3025_v7 }
 0xce1   :  { %v3027_v17 = vmul.f32 1.442695, %v3026_v20 }
 0xce3   :  { %3736 = vpow2.f32 %v3027_v17 }
 0xced   :  { %v3737_v40 = vpop.eup %3736 }
 0xcee   :  { %v3029_v62 = vsel %vm3022_vm6, %v3737_v40, 0.0 }
 0xcef   :  { %3030 = vadd.xlane.f32.xlu0 %v3029_v62 }
 0xd7c   :  { %v3031_v33 = vpop.xlane.xlu0 %3030 }
 0xd7d   :  { %3738 = vrcp.f32 %v3031_v33 }
 0xd87   :  { %v3739_v31 = vpop.eup %3738 }
 0xd88   :  { %v3033_v50 = vmul.f32 %v3739_v31, %v3737_v40 }
 0xd8a   :  { %3034 = vst.msk [vmem:[%s6235_s9] sm:$0xff] %vm3022_vm6, %v3033_v50 }

</bundles_post_ra>
